<compile_context>
chip_gen: v5e
topology: v5e:2x2
jax: 0.10.0
libtpu: 0.0.40
codegen_flags: <defaults>
</compile_context>

<pallas_src>
import functools

import jax
import jax.numpy as jnp
from jax import lax
from jax.experimental import pallas as pl
from jax.experimental.pallas import tpu as pltpu

LANE = 128


def _round_up(v, m):
    return ((v + m - 1) // m) * m


@functools.lru_cache(maxsize=1)
def _vmem_limit_bytes():
    """Generation-aware VMEM budget (~60% of physical; v7x has only 64 MiB/TC)."""
    try:
        cap = pltpu.get_tpu_info().vmem_capacity_bytes
    except Exception:
        cap = 64 * 1024 * 1024
    return int(max(32 * 1024 * 1024, min(cap * 0.6, 100 * 1024 * 1024)))


def _cparams(sem=None):
    kw = dict(vmem_limit_bytes=_vmem_limit_bytes())
    if sem is not None:
        kw["dimension_semantics"] = sem
    return pltpu.CompilerParams(**kw)


# ------------------------------ Pallas kernels ------------------------------ #
def xw_kernel(h_ref, w_ref, xw_ref):
    """xw = bf16(h) @ bf16(W), f32 accumulation, bf16 output (row-tiled)."""
    xw_ref[...] = jnp.dot(h_ref[...], w_ref[...],
                          preferred_element_type=jnp.float32).astype(jnp.bfloat16)


def gcn_agg_kernel(a_ref, xw_ref, s_ref, t_ref, h_ref, acc_ref):
    """h = relu((A @ xw) * s + t') for one row tile; K-reduction over grid axis 1.

    Both A and XW are streamed per (row, K) block; f32 accumulator in VMEM scratch.
    """
    k = pl.program_id(1)

    @pl.when(k == 0)
    def _init():
        acc_ref[...] = jnp.zeros_like(acc_ref)

    acc_ref[...] += jnp.dot(a_ref[...], xw_ref[...],
                            preferred_element_type=jnp.float32)

    @pl.when(k == pl.num_programs(1) - 1)
    def _finalize():
        h_ref[...] = jnp.maximum(acc_ref[...] * s_ref[...] + t_ref[...],
                                 0.0).astype(h_ref.dtype)


def head_tile_kernel(h3_ref, fc1w_ref, fc1b_ref, fc2w_ref, fc2b_ref, poolb_ref,
                     out1_ref, out2_ref, pmax_ref, *, num_graphs):
    """fc1 -> fc2 -> per-tile masked max pool partials (fully parallel over row tiles)."""
    out1 = jnp.dot(h3_ref[...], fc1w_ref[...],
                   preferred_element_type=jnp.float32) + fc1b_ref[...]
    out2 = jnp.dot(out1.astype(jnp.bfloat16), fc2w_ref[...],
                   preferred_element_type=jnp.float32) + fc2b_ref[...]
    out1_ref[...] = out1.astype(out1_ref.dtype)
    out2_ref[...] = out2.astype(out2_ref.dtype)

    # poolb (rows-on-sublanes, graphs-on-lanes) is 0 for a graph's own nodes and
    # -1e30 elsewhere (incl. row padding). Static loop over the (small) graph count.
    parts = []
    for g in range(num_graphs):
        parts.append(jnp.max(out2 + poolb_ref[:, g:g + 1], axis=0, keepdims=True))
    pmax_ref[0] = jnp.concatenate(parts, axis=0)


def head_finalize_kernel(pmax_ref, fc3w_ref, fc3b_ref, gemb_ref, logits_ref):
    """Final max over tile partials -> fc3 -> log_softmax (tiny, gridless)."""
    gemb = jnp.max(pmax_ref[...], axis=0)
    gemb_ref[...] = gemb
    out3 = jnp.dot(gemb, fc3w_ref[...],
                   preferred_element_type=jnp.float32) + fc3b_ref[...]
    m = jnp.max(out3, axis=-1, keepdims=True)
    z = out3 - m
    logits_ref[...] = z - jnp.log(jnp.sum(jnp.exp(z), axis=-1, keepdims=True))


def fused_kernel(a_ref, x_ref, w0_ref, s0_ref, t0_ref, w1_ref, s1_ref, t1_ref,
                 w2_ref, s2_ref, t2_ref, fc1w_ref, fc1b_ref, fc2w_ref, fc2b_ref,
                 fc3w_ref, fc3b_ref, poolb_ref,
                 h1_ref, h2_ref, h3_ref, out1_ref, out2_ref, gemb_ref, logits_ref,
                 *, num_graphs):
    """Small-N fast path: whole forward in one VMEM-resident kernel."""
    a = a_ref[...]

    def gcn(h_bf, w_ref, s_ref, t_ref):
        xw = jnp.dot(h_bf, w_ref[...],
                     preferred_element_type=jnp.float32).astype(jnp.bfloat16)
        agg = jnp.dot(a, xw, preferred_element_type=jnp.float32)
        return jnp.maximum(agg * s_ref[...] + t_ref[...], 0.0)

    h1 = gcn(x_ref[...], w0_ref, s0_ref, t0_ref)
    h1_ref[...] = h1.astype(jnp.bfloat16)
    h2 = gcn(h1.astype(jnp.bfloat16), w1_ref, s1_ref, t1_ref)
    h2_ref[...] = h2.astype(jnp.bfloat16)
    h3 = gcn(h2.astype(jnp.bfloat16), w2_ref, s2_ref, t2_ref)
    h3_ref[...] = h3.astype(jnp.bfloat16)

    out1 = jnp.dot(h3.astype(jnp.bfloat16), fc1w_ref[...],
                   preferred_element_type=jnp.float32) + fc1b_ref[...]
    out2 = jnp.dot(out1.astype(jnp.bfloat16), fc2w_ref[...],
                   preferred_element_type=jnp.float32) + fc2b_ref[...]
    out1_ref[...] = out1.astype(jnp.bfloat16)
    out2_ref[...] = out2.astype(jnp.bfloat16)

    parts = []
    for g in range(num_graphs):
        parts.append(jnp.max(out2 + poolb_ref[:, g:g + 1], axis=0, keepdims=True))
    gemb = jnp.concatenate(parts, axis=0)
    gemb_ref[...] = gemb

    out3 = jnp.dot(gemb, fc3w_ref[...],
                   preferred_element_type=jnp.float32) + fc3b_ref[...]
    m = jnp.max(out3, axis=-1, keepdims=True)
    z = out3 - m
    logits_ref[...] = z - jnp.log(jnp.sum(jnp.exp(z), axis=-1, keepdims=True))


# ------------------------------ pallas_call wrappers ------------------------ #
def _call_xw(h, w, tm):
    np_, fin = h.shape
    dp = w.shape[1]
    return pl.pallas_call(
        xw_kernel,
        out_shape=jax.ShapeDtypeStruct((np_, dp), jnp.bfloat16),
        grid=(np_ // tm,),
        in_specs=[pl.BlockSpec((tm, fin), lambda i: (i, 0)),
                  pl.BlockSpec((fin, dp), lambda i: (0, 0))],
        out_specs=pl.BlockSpec((tm, dp), lambda i: (i, 0)),
        compiler_params=_cparams(("parallel",)),
    )(h, w)


def _call_gcn_agg(a_p, xw, s, t, tm, tk):
    np_ = a_p.shape[0]
    dp = xw.shape[1]
    return pl.pallas_call(
        gcn_agg_kernel,
        out_shape=jax.ShapeDtypeStruct((np_, dp), jnp.bfloat16),
        grid=(np_ // tm, np_ // tk),
        in_specs=[pl.BlockSpec((tm, tk), lambda i, k: (i, k)),   # stream A blocks
                  pl.BlockSpec((tk, dp), lambda i, k: (k, 0)),   # stream XW per K-tile
                  pl.BlockSpec((1, dp), lambda i, k: (0, 0)),
                  pl.BlockSpec((1, dp), lambda i, k: (0, 0))],
        out_specs=pl.BlockSpec((tm, dp), lambda i, k: (i, 0)),
        scratch_shapes=[pltpu.VMEM((tm, dp), jnp.float32)],
        compiler_params=_cparams(("parallel", "arbitrary")),
    )(a_p, xw, s, t)


def _call_head(h3, fc1w, fc1b, fc2w, fc2b, fc3w, fc3b, poolb, tm):
    np_, dp = h3.shape
    g = poolb.shape[1]
    cp = fc3w.shape[1]
    nt = np_ // tm

    out1, out2, pmax = pl.pallas_call(
        functools.partial(head_tile_kernel, num_graphs=g),
        out_shape=(jax.ShapeDtypeStruct((np_, dp), jnp.bfloat16),
                   jax.ShapeDtypeStruct((np_, dp), jnp.bfloat16),
                   jax.ShapeDtypeStruct((nt, g, dp), jnp.float32)),
        grid=(nt,),
        in_specs=[pl.BlockSpec((tm, dp), lambda i: (i, 0)),
                  pl.BlockSpec((dp, dp), lambda i: (0, 0)),
                  pl.BlockSpec((1, dp), lambda i: (0, 0)),
                  pl.BlockSpec((dp, dp), lambda i: (0, 0)),
                  pl.BlockSpec((1, dp), lambda i: (0, 0)),
                  pl.BlockSpec((tm, g), lambda i: (i, 0))],
        out_specs=(pl.BlockSpec((tm, dp), lambda i: (i, 0)),
                   pl.BlockSpec((tm, dp), lambda i: (i, 0)),
                   pl.BlockSpec((1, g, dp), lambda i: (i, 0, 0))),
        compiler_params=_cparams(("parallel",)),
    )(h3, fc1w, fc1b, fc2w, fc2b, poolb)

    gemb, logits = pl.pallas_call(
        head_finalize_kernel,
        out_shape=(jax.ShapeDtypeStruct((g, dp), jnp.float32),
                   jax.ShapeDtypeStruct((g, cp), jnp.float32)),
        compiler_params=_cparams(),
    )(pmax, fc3w, fc3b)
    return out1, out2, gemb, logits


# --------------------------------- forward ---------------------------------- #
def _pad2(a, rows, cols, fill=0.0):
    out = jnp.full((rows, cols), fill, dtype=a.dtype)
    return out.at[:a.shape[0], :a.shape[1]].set(a)


def gnn_forward(a_hat, x, params, mask, *, tile_n=None, force_tiled=False):
    """Returns (node_embeddings, graph_embedding, embeddings_per_layer, logits)."""
    n, f = x.shape
    g = mask.shape[0]
    d = params["w0"].shape[1]
    c = params["fc3w"].shape[1]
    bf = jnp.bfloat16

    fp, dp, cp = _round_up(f, LANE), _round_up(d, LANE), _round_up(c, LANE)

    use_fused = (not force_tiled) and _round_up(n, LANE) <= 1024
    if use_fused:
        npad = _round_up(n, LANE)
    else:
        tile_n = tile_n or 512          # big A tiles: agg kernel is HBM-bound on A
        npad = _round_up(n, tile_n)

    # --- pad + fold params (one-time glue, not the hot path) ----------------- #
    a_p = _pad2(a_hat.astype(jnp.float32), npad, npad).astype(bf)
    x_p = _pad2(x.astype(jnp.float32), npad, fp).astype(bf)

    def gcn_params(i, fin_pad):
        w = _pad2(params[f"w{i}"], fin_pad, dp).astype(bf)
        s = _pad2(params[f"bn{i}_s"], 1, dp)
        # fold GCN bias into BN shift: (agg + b)*s + t == agg*s + (t + b*s)
        t = _pad2(params[f"bn{i}_t"] + params[f"b{i}"] * params[f"bn{i}_s"], 1, dp)
        return w, s, t

    w0, s0, t0 = gcn_params(0, fp)
    w1, s1, t1 = gcn_params(1, dp)
    w2, s2, t2 = gcn_params(2, dp)

    fc1w = _pad2(params["fc1w"], dp, dp).astype(bf)
    fc1b = _pad2(params["fc1b"], 1, dp)
    fc2w = _pad2(params["fc2w"], dp, dp).astype(bf)
    fc2b = _pad2(params["fc2b"], 1, dp)
    fc3w = _pad2(params["fc3w"], dp, cp)
    fc3b = _pad2(params["fc3b"], 1, cp, fill=-1e30)  # padded classes -> ~0 softmax mass

    # transposed pool bias (npad, G): 0 inside graph, -1e30 outside (incl. row pad)
    mask_t = _pad2(mask.astype(jnp.float32).T, npad, g)
    poolb = (mask_t - 1.0) * 1e30

    # --- hot path -------------------------------------------------------------- #
    if use_fused:
        h1, h2, h3, out1, out2, gemb, logits = pl.pallas_call(
            functools.partial(fused_kernel, num_graphs=g),
            out_shape=(jax.ShapeDtypeStruct((npad, dp), bf),) * 5
                      + (jax.ShapeDtypeStruct((g, dp), jnp.float32),
                         jax.ShapeDtypeStruct((g, cp), jnp.float32)),
            compiler_params=_cparams(),
        )(a_p, x_p, w0, s0, t0, w1, s1, t1, w2, s2, t2,
          fc1w, fc1b, fc2w, fc2b, fc3w, fc3b, poolb)
    else:
        tm = tk = tile_n

        def gcn_layer(h_in, w, s, t):
            xw = _call_xw(h_in, w, tm)
            return _call_gcn_agg(a_p, xw, s, t, tm, tk)

        h1 = gcn_layer(x_p, w0, s0, t0)
        h2 = gcn_layer(h1, w1, s1, t1)
        h3 = gcn_layer(h2, w2, s2, t2)
        out1, out2, gemb, logits = _call_head(
            h3, fc1w, fc1b, fc2w, fc2b, fc3w, fc3b, poolb, tm)

    # --- slice padding off and restore module-facing f32 dtype ----------------- #
    f32 = jnp.float32
    h1 = h1[:n, :d].astype(f32)
    h2 = h2[:n, :d].astype(f32)
    h3 = h3[:n, :d].astype(f32)
    out1 = out1[:n, :d].astype(f32)
    out2 = out2[:n, :d].astype(f32)
    graph_embedding = gemb[:, :d]
    logits = logits[:, :c]

    embeddings_per_layer = [h1, h2, h3, out1, out2]
    return h3, graph_embedding, embeddings_per_layer, logits


# ------------------------- glue (plain JAX, not hot path) -------------------- #
def gcn_norm_dense(edge_index, num_nodes, edge_weight=None):
    """Dense D^-1/2 (A + I) D^-1/2 with A_hat[dst, src] = norm (PyG flow)."""
    src = edge_index[0]
    dst = edge_index[1]
    if edge_weight is None:
        edge_weight = jnp.ones(src.shape[0], dtype=jnp.float32)
    loop = jnp.arange(num_nodes, dtype=src.dtype)
    src = jnp.concatenate([src, loop])
    dst = jnp.concatenate([dst, loop])
    w = jnp.concatenate([edge_weight, jnp.ones(num_nodes, dtype=jnp.float32)])
    deg = jnp.zeros((num_nodes,), jnp.float32).at[dst].add(w)
    dinv = jnp.where(deg > 0, lax.rsqrt(deg), 0.0)
    norm = dinv[src] * w * dinv[dst]
    a = jnp.zeros((num_nodes, num_nodes), jnp.float32).at[dst, src].add(norm)
    return a


def init_params(key, num_features, dim, num_classes):
    keys = jax.random.split(key, 6)
    eps = 1e-5

    def lin(k, fan_in, fan_out):
        bound = 1.0 / jnp.sqrt(jnp.float32(fan_in))
        kw, kb = jax.random.split(k)
        w = jax.random.uniform(kw, (fan_in, fan_out), jnp.float32, -bound, bound)
        b = jax.random.uniform(kb, (1, fan_out), jnp.float32, -bound, bound)
        return w, b

    p = {}
    p["w0"], p["b0"] = lin(keys[0], num_features, dim)
    p["w1"], p["b1"] = lin(keys[1], dim, dim)
    p["w2"], p["b2"] = lin(keys[2], dim, dim)
    # BatchNorm1d default init: gamma=1, beta=0, running_mean=0, running_var=1.
    for i in range(3):
        gamma = jnp.ones((1, dim), jnp.float32)
        beta = jnp.zeros((1, dim), jnp.float32)
        rmean = jnp.zeros((1, dim), jnp.float32)
        rvar = jnp.ones((1, dim), jnp.float32)
        scale = gamma / jnp.sqrt(rvar + eps)
        shift = beta - rmean * scale
        p[f"bn{i}_s"] = scale
        p[f"bn{i}_t"] = shift
    p["fc1w"], p["fc1b"] = lin(keys[3], dim, dim)
    p["fc2w"], p["fc2b"] = lin(keys[4], dim, dim)
    p["fc3w"], p["fc3b"] = lin(keys[5], dim, num_classes)
    return p


def reference_forward(a_hat, x, p, mask):
    """Pure-JAX reference mirroring the kernels' precision policy
    (bf16 matmul operands, f32 accumulation, f32 elementwise math)."""
    bf = jnp.bfloat16
    f32 = jnp.float32
    a = a_hat.astype(bf)

    def gcn(h, w, b, s, t):
        xw = jnp.dot(h.astype(bf), w.astype(bf),
                     preferred_element_type=f32).astype(bf)
        conv = jnp.dot(a, xw, preferred_element_type=f32) + b
        return jnp.maximum(conv * s + t, 0.0)

    h1 = gcn(x, p["w0"], p["b0"], p["bn0_s"], p["bn0_t"])
    h2 = gcn(h1, p["w1"], p["b1"], p["bn1_s"], p["bn1_t"])
    h3 = gcn(h2, p["w2"], p["b2"], p["bn2_s"], p["bn2_t"])

    o1 = jnp.dot(h3.astype(bf), p["fc1w"].astype(bf),
                 preferred_element_type=f32) + p["fc1b"]
    o2 = jnp.dot(o1.astype(bf), p["fc2w"].astype(bf),
                 preferred_element_type=f32) + p["fc2b"]
    gemb = jnp.max(jnp.where(mask[:, :, None] > 0, o2[None], -1e30), axis=1)
    o3 = gemb @ p["fc3w"] + p["fc3b"]
    logits = o3 - jax.scipy.special.logsumexp(o3, axis=-1, keepdims=True)
    return h3, gemb, [h1, h2, h3, o1, o2], logits


def build_ring_batch(num_graphs, nodes_per_graph, num_features, key):
    """Ring graphs (both edge directions), PyG-style batch vector as a mask."""
    n = num_graphs * nodes_per_graph
    x = jax.random.normal(key, (n, num_features), jnp.float32)
    src, dst, batch = [], [], []
    for gi in range(num_graphs):
        off = gi * nodes_per_graph
        for i in range(nodes_per_graph):
            j = (i + 1) % nodes_per_graph
            src += [off + i, off + j]
            dst += [off + j, off + i]
        batch += [gi] * nodes_per_graph
    edge_index = jnp.array([src, dst], dtype=jnp.int32)
    batch = jnp.array(batch, dtype=jnp.int32)
    a_hat = gcn_norm_dense(edge_index, n)
    mask = (batch[None, :] == jnp.arange(num_graphs)[:, None]).astype(jnp.float32)
    return x, a_hat, mask


if __name__ == "__main__":
    key = jax.random.PRNGKey(0)
    k1, k2, kp = jax.random.split(key, 3)

    NUM_FEATURES, DIM, NUM_CLASSES = 8, 20, 2
    params = init_params(kp, NUM_FEATURES, DIM, NUM_CLASSES)

    def check(x, a_hat, mask, **kw):
        got = gnn_forward(a_hat, x, params, mask, **kw)
        jax.block_until_ready(got)
        node, gemb, embs, logits = got
        r_node, r_gemb, r_embs, r_logits = reference_forward(a_hat, x, params, mask)
        assert jnp.allclose(node, r_node, atol=2e-2, rtol=2e-2)
        assert jnp.allclose(gemb, r_gemb, atol=2e-2, rtol=2e-2)
        assert jnp.allclose(logits, r_logits, atol=2e-2, rtol=2e-2)
        for a_e, b_e in zip(embs, r_embs):
            assert jnp.allclose(a_e, b_e, atol=2e-2, rtol=2e-2)

    # Small problem (N=192 -> npad=256): fused single-kernel fast path.
    x, a_hat, mask = build_ring_batch(2, 96, NUM_FEATURES, k1)
    check(x, a_hat, mask)

    # Larger / batched problem (N=480 -> npad=512): exercise the tiled streaming path
    # (small tiles here just to keep the test quick; large N defaults to 512 tiles).
    x, a_hat, mask = build_ring_batch(5, 96, NUM_FEATURES, k2)
    check(x, a_hat, mask, force_tiled=True, tile_n=128)

    print("KERNEL_OK")
</pallas_src>

<mosaic_0001>
module attributes {stable_mosaic.version = 11 : i64} {
  func.func @fused_kernel(%arg0: memref<256x256xbf16, #tpu.memory_space<vmem>>, %arg1: memref<256x128xbf16, #tpu.memory_space<vmem>>, %arg2: memref<128x128xbf16, #tpu.memory_space<vmem>>, %arg3: memref<1x128xf32, #tpu.memory_space<vmem>>, %arg4: memref<1x128xf32, #tpu.memory_space<vmem>>, %arg5: memref<128x128xbf16, #tpu.memory_space<vmem>>, %arg6: memref<1x128xf32, #tpu.memory_space<vmem>>, %arg7: memref<1x128xf32, #tpu.memory_space<vmem>>, %arg8: memref<128x128xbf16, #tpu.memory_space<vmem>>, %arg9: memref<1x128xf32, #tpu.memory_space<vmem>>, %arg10: memref<1x128xf32, #tpu.memory_space<vmem>>, %arg11: memref<128x128xbf16, #tpu.memory_space<vmem>>, %arg12: memref<1x128xf32, #tpu.memory_space<vmem>>, %arg13: memref<128x128xbf16, #tpu.memory_space<vmem>>, %arg14: memref<1x128xf32, #tpu.memory_space<vmem>>, %arg15: memref<128x128xf32, #tpu.memory_space<vmem>>, %arg16: memref<1x128xf32, #tpu.memory_space<vmem>>, %arg17: memref<256x2xf32, #tpu.memory_space<vmem>>, %arg18: memref<256x128xbf16, #tpu.memory_space<vmem>>, %arg19: memref<256x128xbf16, #tpu.memory_space<vmem>>, %arg20: memref<256x128xbf16, #tpu.memory_space<vmem>>, %arg21: memref<256x128xbf16, #tpu.memory_space<vmem>>, %arg22: memref<256x128xbf16, #tpu.memory_space<vmem>>, %arg23: memref<2x128xf32, #tpu.memory_space<vmem>>, %arg24: memref<2x128xf32, #tpu.memory_space<vmem>>) attributes {dimension_semantics = [], scalar_prefetch = 0 : i64, scratch_operands = 0 : i64, tpu.core_type = #tpu.core_type<tc>} {
    %c0 = arith.constant 0 : index
    %c0_0 = arith.constant 0 : index
    %0 = vector.load %arg0[%c0, %c0_0] : memref<256x256xbf16, #tpu.memory_space<vmem>>, vector<256x256xbf16>
    %c0_1 = arith.constant 0 : index
    %c0_2 = arith.constant 0 : index
    %1 = vector.load %arg1[%c0_1, %c0_2] : memref<256x128xbf16, #tpu.memory_space<vmem>>, vector<256x128xbf16>
    %c0_3 = arith.constant 0 : index
    %c0_4 = arith.constant 0 : index
    %2 = vector.load %arg2[%c0_3, %c0_4] : memref<128x128xbf16, #tpu.memory_space<vmem>>, vector<128x128xbf16>
    %cst = arith.constant dense<0.000000e+00> : vector<256x128xf32>
    %3 = tpu.matmul %1, %2, %cst {dimension_numbers = #tpu.dot_dimension_numbers<[1], [0], [0], [1], [0, 0, 1, 1], [], []>} : vector<256x128xbf16>, vector<128x128xbf16>, vector<256x128xf32> -> vector<256x128xf32>
    %4 = arith.truncf %3 : vector<256x128xf32> to vector<256x128xbf16>
    %cst_5 = arith.constant dense<0.000000e+00> : vector<256x128xf32>
    %5 = tpu.matmul %0, %4, %cst_5 {dimension_numbers = #tpu.dot_dimension_numbers<[1], [0], [0], [1], [0, 0, 1, 1], [], []>} : vector<256x256xbf16>, vector<256x128xbf16>, vector<256x128xf32> -> vector<256x128xf32>
    %c0_6 = arith.constant 0 : index
    %c0_7 = arith.constant 0 : index
    %6 = vector.load %arg3[%c0_6, %c0_7] : memref<1x128xf32, #tpu.memory_space<vmem>>, vector<1x128xf32>
    %7 = vector.broadcast %6 : vector<1x128xf32> to vector<256x128xf32>
    %8 = arith.mulf %5, %7 : vector<256x128xf32>
    %c0_8 = arith.constant 0 : index
    %c0_9 = arith.constant 0 : index
    %9 = vector.load %arg4[%c0_8, %c0_9] : memref<1x128xf32, #tpu.memory_space<vmem>>, vector<1x128xf32>
    %10 = vector.broadcast %9 : vector<1x128xf32> to vector<256x128xf32>
    %11 = arith.addf %8, %10 : vector<256x128xf32>
    %cst_10 = arith.constant 0.000000e+00 : f32
    %12 = vector.broadcast %cst_10 : f32 to vector<256x128xf32>
    %13 = arith.maximumf %11, %12 : vector<256x128xf32>
    %14 = arith.truncf %13 : vector<256x128xf32> to vector<256x128xbf16>
    %c0_11 = arith.constant 0 : index
    %c0_12 = arith.constant 0 : index
    %15 = vector.load %arg18[%c0_11, %c0_12] : memref<256x128xbf16, #tpu.memory_space<vmem>>, vector<256x128xbf16>
    tpu.vector_store %arg18[%c0_11, %c0_12], %14 {strides = array<i32>} : memref<256x128xbf16, #tpu.memory_space<vmem>>, vector<256x128xbf16>,
    %16 = arith.truncf %13 : vector<256x128xf32> to vector<256x128xbf16>
    %c0_13 = arith.constant 0 : index
    %c0_14 = arith.constant 0 : index
    %17 = vector.load %arg5[%c0_13, %c0_14] : memref<128x128xbf16, #tpu.memory_space<vmem>>, vector<128x128xbf16>
    %cst_15 = arith.constant dense<0.000000e+00> : vector<256x128xf32>
    %18 = tpu.matmul %16, %17, %cst_15 {dimension_numbers = #tpu.dot_dimension_numbers<[1], [0], [0], [1], [0, 0, 1, 1], [], []>} : vector<256x128xbf16>, vector<128x128xbf16>, vector<256x128xf32> -> vector<256x128xf32>
    %19 = arith.truncf %18 : vector<256x128xf32> to vector<256x128xbf16>
    %cst_16 = arith.constant dense<0.000000e+00> : vector<256x128xf32>
    %20 = tpu.matmul %0, %19, %cst_16 {dimension_numbers = #tpu.dot_dimension_numbers<[1], [0], [0], [1], [0, 0, 1, 1], [], []>} : vector<256x256xbf16>, vector<256x128xbf16>, vector<256x128xf32> -> vector<256x128xf32>
    %c0_17 = arith.constant 0 : index
    %c0_18 = arith.constant 0 : index
    %21 = vector.load %arg6[%c0_17, %c0_18] : memref<1x128xf32, #tpu.memory_space<vmem>>, vector<1x128xf32>
    %22 = vector.broadcast %21 : vector<1x128xf32> to vector<256x128xf32>
    %23 = arith.mulf %20, %22 : vector<256x128xf32>
    %c0_19 = arith.constant 0 : index
    %c0_20 = arith.constant 0 : index
    %24 = vector.load %arg7[%c0_19, %c0_20] : memref<1x128xf32, #tpu.memory_space<vmem>>, vector<1x128xf32>
    %25 = vector.broadcast %24 : vector<1x128xf32> to vector<256x128xf32>
    %26 = arith.addf %23, %25 : vector<256x128xf32>
    %cst_21 = arith.constant 0.000000e+00 : f32
    %27 = vector.broadcast %cst_21 : f32 to vector<256x128xf32>
    %28 = arith.maximumf %26, %27 : vector<256x128xf32>
    %29 = arith.truncf %28 : vector<256x128xf32> to vector<256x128xbf16>
    %c0_22 = arith.constant 0 : index
    %c0_23 = arith.constant 0 : index
    %30 = vector.load %arg19[%c0_22, %c0_23] : memref<256x128xbf16, #tpu.memory_space<vmem>>, vector<256x128xbf16>
    tpu.vector_store %arg19[%c0_22, %c0_23], %29 {strides = array<i32>} : memref<256x128xbf16, #tpu.memory_space<vmem>>, vector<256x128xbf16>,
    %31 = arith.truncf %28 : vector<256x128xf32> to vector<256x128xbf16>
    %c0_24 = arith.constant 0 : index
    %c0_25 = arith.constant 0 : index
    %32 = vector.load %arg8[%c0_24, %c0_25] : memref<128x128xbf16, #tpu.memory_space<vmem>>, vector<128x128xbf16>
    %cst_26 = arith.constant dense<0.000000e+00> : vector<256x128xf32>
    %33 = tpu.matmul %31, %32, %cst_26 {dimension_numbers = #tpu.dot_dimension_numbers<[1], [0], [0], [1], [0, 0, 1, 1], [], []>} : vector<256x128xbf16>, vector<128x128xbf16>, vector<256x128xf32> -> vector<256x128xf32>
    %34 = arith.truncf %33 : vector<256x128xf32> to vector<256x128xbf16>
    %cst_27 = arith.constant dense<0.000000e+00> : vector<256x128xf32>
    %35 = tpu.matmul %0, %34, %cst_27 {dimension_numbers = #tpu.dot_dimension_numbers<[1], [0], [0], [1], [0, 0, 1, 1], [], []>} : vector<256x256xbf16>, vector<256x128xbf16>, vector<256x128xf32> -> vector<256x128xf32>
    %c0_28 = arith.constant 0 : index
    %c0_29 = arith.constant 0 : index
    %36 = vector.load %arg9[%c0_28, %c0_29] : memref<1x128xf32, #tpu.memory_space<vmem>>, vector<1x128xf32>
    %37 = vector.broadcast %36 : vector<1x128xf32> to vector<256x128xf32>
    %38 = arith.mulf %35, %37 : vector<256x128xf32>
    %c0_30 = arith.constant 0 : index
    %c0_31 = arith.constant 0 : index
    %39 = vector.load %arg10[%c0_30, %c0_31] : memref<1x128xf32, #tpu.memory_space<vmem>>, vector<1x128xf32>
    %40 = vector.broadcast %39 : vector<1x128xf32> to vector<256x128xf32>
    %41 = arith.addf %38, %40 : vector<256x128xf32>
    %cst_32 = arith.constant 0.000000e+00 : f32
    %42 = vector.broadcast %cst_32 : f32 to vector<256x128xf32>
    %43 = arith.maximumf %41, %42 : vector<256x128xf32>
    %44 = arith.truncf %43 : vector<256x128xf32> to vector<256x128xbf16>
    %c0_33 = arith.constant 0 : index
    %c0_34 = arith.constant 0 : index
    %45 = vector.load %arg20[%c0_33, %c0_34] : memref<256x128xbf16, #tpu.memory_space<vmem>>, vector<256x128xbf16>
    tpu.vector_store %arg20[%c0_33, %c0_34], %44 {strides = array<i32>} : memref<256x128xbf16, #tpu.memory_space<vmem>>, vector<256x128xbf16>,
    %46 = arith.truncf %43 : vector<256x128xf32> to vector<256x128xbf16>
    %c0_35 = arith.constant 0 : index
    %c0_36 = arith.constant 0 : index
    %47 = vector.load %arg11[%c0_35, %c0_36] : memref<128x128xbf16, #tpu.memory_space<vmem>>, vector<128x128xbf16>
    %cst_37 = arith.constant dense<0.000000e+00> : vector<256x128xf32>
    %48 = tpu.matmul %46, %47, %cst_37 {dimension_numbers = #tpu.dot_dimension_numbers<[1], [0], [0], [1], [0, 0, 1, 1], [], []>} : vector<256x128xbf16>, vector<128x128xbf16>, vector<256x128xf32> -> vector<256x128xf32>
    %c0_38 = arith.constant 0 : index
    %c0_39 = arith.constant 0 : index
    %49 = vector.load %arg12[%c0_38, %c0_39] : memref<1x128xf32, #tpu.memory_space<vmem>>, vector<1x128xf32>
    %50 = vector.broadcast %49 : vector<1x128xf32> to vector<256x128xf32>
    %51 = arith.addf %48, %50 : vector<256x128xf32>
    %52 = arith.truncf %51 : vector<256x128xf32> to vector<256x128xbf16>
    %c0_40 = arith.constant 0 : index
    %c0_41 = arith.constant 0 : index
    %53 = vector.load %arg13[%c0_40, %c0_41] : memref<128x128xbf16, #tpu.memory_space<vmem>>, vector<128x128xbf16>
    %cst_42 = arith.constant dense<0.000000e+00> : vector<256x128xf32>
    %54 = tpu.matmul %52, %53, %cst_42 {dimension_numbers = #tpu.dot_dimension_numbers<[1], [0], [0], [1], [0, 0, 1, 1], [], []>} : vector<256x128xbf16>, vector<128x128xbf16>, vector<256x128xf32> -> vector<256x128xf32>
    %c0_43 = arith.constant 0 : index
    %c0_44 = arith.constant 0 : index
    %55 = vector.load %arg14[%c0_43, %c0_44] : memref<1x128xf32, #tpu.memory_space<vmem>>, vector<1x128xf32>
    %56 = vector.broadcast %55 : vector<1x128xf32> to vector<256x128xf32>
    %57 = arith.addf %54, %56 : vector<256x128xf32>
    %58 = arith.truncf %51 : vector<256x128xf32> to vector<256x128xbf16>
    %c0_45 = arith.constant 0 : index
    %c0_46 = arith.constant 0 : index
    %59 = vector.load %arg21[%c0_45, %c0_46] : memref<256x128xbf16, #tpu.memory_space<vmem>>, vector<256x128xbf16>
    tpu.vector_store %arg21[%c0_45, %c0_46], %58 {strides = array<i32>} : memref<256x128xbf16, #tpu.memory_space<vmem>>, vector<256x128xbf16>,
    %60 = arith.truncf %57 : vector<256x128xf32> to vector<256x128xbf16>
    %c0_47 = arith.constant 0 : index
    %c0_48 = arith.constant 0 : index
    %61 = vector.load %arg22[%c0_47, %c0_48] : memref<256x128xbf16, #tpu.memory_space<vmem>>, vector<256x128xbf16>
    tpu.vector_store %arg22[%c0_47, %c0_48], %60 {strides = array<i32>} : memref<256x128xbf16, #tpu.memory_space<vmem>>, vector<256x128xbf16>,
    %c0_49 = arith.constant 0 : index
    %c0_50 = arith.constant 0 : index
    %62 = vector.load %arg17[%c0_49, %c0_50] : memref<256x2xf32, #tpu.memory_space<vmem>>, vector<256x1xf32>
    %63 = vector.broadcast %62 : vector<256x1xf32> to vector<256x128xf32>
    %64 = arith.addf %57, %63 : vector<256x128xf32>
    %cst_51 = arith.constant dense<0xFF800000> : vector<128xf32>
    %65 = vector.multi_reduction <maximumf>, %64, %cst_51 [0] : vector<256x128xf32> to vector<128xf32>
    %66 = vector.shape_cast %65 : vector<128xf32> to vector<1x128xf32>
    %c0_52 = arith.constant 0 : index
    %c1 = arith.constant 1 : index
    %67 = vector.load %arg17[%c0_52, %c1] : memref<256x2xf32, #tpu.memory_space<vmem>>, vector<256x1xf32>
    %68 = vector.broadcast %67 : vector<256x1xf32> to vector<256x128xf32>
    %69 = arith.addf %57, %68 : vector<256x128xf32>
    %cst_53 = arith.constant dense<0xFF800000> : vector<128xf32>
    %70 = vector.multi_reduction <maximumf>, %69, %cst_53 [0] : vector<256x128xf32> to vector<128xf32>
    %71 = vector.shape_cast %70 : vector<128xf32> to vector<1x128xf32>
    %72 = tpu.concatenate %66, %71 in 0 : vector<1x128xf32>, vector<1x128xf32> -> vector<2x128xf32>
    %c0_54 = arith.constant 0 : index
    %c0_55 = arith.constant 0 : index
    %73 = vector.load %arg23[%c0_54, %c0_55] : memref<2x128xf32, #tpu.memory_space<vmem>>, vector<2x128xf32>
    tpu.vector_store %arg23[%c0_54, %c0_55], %72 {strides = array<i32>} : memref<2x128xf32, #tpu.memory_space<vmem>>, vector<2x128xf32>,
    %c0_56 = arith.constant 0 : index
    %c0_57 = arith.constant 0 : index
    %74 = vector.load %arg15[%c0_56, %c0_57] : memref<128x128xf32, #tpu.memory_space<vmem>>, vector<128x128xf32>
    %cst_58 = arith.constant dense<0.000000e+00> : vector<2x128xf32>
    %75 = tpu.matmul %72, %74, %cst_58 {dimension_numbers = #tpu.dot_dimension_numbers<[1], [0], [0], [1], [0, 0, 1, 1], [], []>} : vector<2x128xf32>, vector<128x128xf32>, vector<2x128xf32> -> vector<2x128xf32>
    %c0_59 = arith.constant 0 : index
    %c0_60 = arith.constant 0 : index
    %76 = vector.load %arg16[%c0_59, %c0_60] : memref<1x128xf32, #tpu.memory_space<vmem>>, vector<1x128xf32>
    %77 = vector.broadcast %76 : vector<1x128xf32> to vector<2x128xf32>
    %78 = arith.addf %75, %77 : vector<2x128xf32>
    %cst_61 = arith.constant dense<0xFF800000> : vector<2xf32>
    %79 = vector.multi_reduction <maximumf>, %78, %cst_61 [1] : vector<2x128xf32> to vector<2xf32>
    %80 = vector.shape_cast %79 : vector<2xf32> to vector<2x1xf32>
    %81 = vector.broadcast %80 : vector<2x1xf32> to vector<2x128xf32>
    %82 = arith.subf %78, %81 : vector<2x128xf32>
    %83 = math.exp %82 : vector<2x128xf32>
    %cst_62 = arith.constant dense<0.000000e+00> : vector<2xf32>
    %84 = vector.multi_reduction <add>, %83, %cst_62 [1] : vector<2x128xf32> to vector<2xf32>
    %85 = vector.shape_cast %84 : vector<2xf32> to vector<2x1xf32>
    %86 = math.log %85 : vector<2x1xf32>
    %87 = vector.broadcast %86 : vector<2x1xf32> to vector<2x128xf32>
    %88 = arith.subf %82, %87 : vector<2x128xf32>
    %c0_63 = arith.constant 0 : index
    %c0_64 = arith.constant 0 : index
    %89 = vector.load %arg24[%c0_63, %c0_64] : memref<2x128xf32, #tpu.memory_space<vmem>>, vector<2x128xf32>
    tpu.vector_store %arg24[%c0_63, %c0_64], %88 {strides = array<i32>} : memref<2x128xf32, #tpu.memory_space<vmem>>, vector<2x128xf32>,
    return
  }
}

</mosaic_0001>

<bundles_post_ra>
// kernel: tpu_custom_call.1
= control target key start
LH: loop header
LB: loop body
LE: loop exit
PB: predicated region body
PF: predicated region fallthrough
CT: control target
= control target key end

     0   :  { %s6310_s0 = inlined_call_operand.vmem [shape: bf16[256,256], index: 0, kind: input, shape index: {}]   ;;  %s6311_s1 = inlined_call_operand.hbm [shape: bf16[256,128], index: 1, kind: input, shape index: {}]   ;;  %s6312_s2 = inlined_call_operand.hbm [shape: bf16[128,128], index: 2, kind: input, shape index: {}]   ;;  %s6313_s3 = inlined_call_operand.vmem [shape: f32[1,128], index: 3, kind: input, shape index: {}]   ;;  %s6314_s4 = inlined_call_operand.vmem [shape: f32[1,128], index: 4, kind: input, shape index: {}]   ;;  %s6315_s5 = inlined_call_operand.hbm [shape: bf16[128,128], index: 5, kind: input, shape index: {}]   ;;  %s6316_s6 = inlined_call_operand.vmem [shape: f32[1,128], index: 6, kind: input, shape index: {}]   ;;  %s6317_s7 = inlined_call_operand.vmem [shape: f32[1,128], index: 7, kind: input, shape index: {}]   ;;  %s6318_s8 = inlined_call_operand.hbm [shape: bf16[128,128], index: 8, kind: input, shape index: {}]   ;;  %s6319_s9 = inlined_call_operand.vmem [shape: f32[1,128], index: 9, kind: input, shape index: {}]   ;;  %s6320_s10 = inlined_call_operand.vmem [shape: f32[1,128], index: 10, kind: input, shape index: {}]   ;;  %s6321_s11 = inlined_call_operand.hbm [shape: bf16[128,128], index: 11, kind: input, shape index: {}]   ;;  %s6322_s12 = inlined_call_operand.vmem [shape: f32[1,128], index: 12, kind: input, shape index: {}]   ;;  %s6323_s13 = inlined_call_operand.hbm [shape: bf16[128,128], index: 13, kind: input, shape index: {}]   ;;  %s6324_s14 = inlined_call_operand.vmem [shape: f32[1,128], index: 14, kind: input, shape index: {}]   ;;  %s6325_s15 = inlined_call_operand.hbm [shape: f32[128,128], index: 15, kind: input, shape index: {}]   ;;  %s6326_s16 = inlined_call_operand.vmem [shape: f32[1,128], index: 16, kind: input, shape index: {}]   ;;  %s6327_s17 = inlined_call_operand.vmem [shape: f32[256,2], index: 17, kind: input, shape index: {}]   ;;  %s6328_s18 = inlined_call_operand.hbm [shape: bf16[256,128], index: 18, kind: output, shape index: {0}]   ;;  %s6329_s19 = inlined_call_operand.hbm [shape: bf16[256,128], index: 19, kind: output, shape index: {1}]   ;;  %s6330_s20 = inlined_call_operand.hbm [shape: bf16[256,128], index: 20, kind: output, shape index: {2}]   ;;  %s6331_s21 = inlined_call_operand.hbm [shape: bf16[256,128], index: 21, kind: output, shape index: {3}]   ;;  %s6332_s22 = inlined_call_operand.hbm [shape: bf16[256,128], index: 22, kind: output, shape index: {4}]   ;;  %s6333_s23 = inlined_call_operand.hbm [shape: f32[2,128], index: 23, kind: output, shape index: {5}]   ;;  %s6334_s24 = inlined_call_operand.hbm [shape: f32[2,128], index: 24, kind: output, shape index: {6}]  }
   0x1   :  { %6338 = sst [smem:[#allocation33_spill]] %s6310_s0 }
   0x2   :  { %6339 = sst [smem:[#allocation34_spill]] %s6311_s1 }
   0x3   :  { %6340 = sst [smem:[#allocation35_spill]] %s6312_s2 }
   0x4   :  { %6341 = sst [smem:[#allocation36_spill]] %s6313_s3 }
   0x5   :  { %6342 = sst [smem:[#allocation37_spill]] %s6314_s4 }
   0x6   :  { %6343 = sst [smem:[#allocation38_spill]] %s6315_s5 }
   0x7   :  { %6344 = sst [smem:[#allocation39_spill]] %s6316_s6 }
   0x8   :  { %6345 = sst [smem:[#allocation40_spill]] %s6317_s7 }
   0x9   :  { %6346 = sst [smem:[#allocation41_spill]] %s6318_s8 }
   0xa   :  { %6347 = sst [smem:[#allocation42_spill]] %s6334_s24 }
   0xb   :  { %30 = vsyncpa [#allocation3], 0 }
   0xc   :  { %31 = vsyncpa [#allocation6], 0 }
   0xd   :  { %32 = vsyncpa [#allocation9], 0 }
   0xe   :  { %33 = vsyncpa [#allocation12], 0 }
   0xf   :  { %34 = vsyncpa [#allocation4], 0 }
  0x10   :  { %35 = vsyncpa [#allocation16], 0 }
  0x11   :  { %36 = vsyncpa [#allocation19], 0 }
  0x12   :  { %37 = vsyncpa [#allocation22], 0  ;;  %s6348_s27 = sld [smem:[#allocation35_spill]]  ;;  %s4858_s6 = smov [#allocation5]  }
  0x13   :  { %s59_s2 = sshll.u32 %s4858_s6, 4  ;;  %s6349_s7 = sld [smem:[#allocation41_spill]]  ;;  %s60_s2 = int_to_ptr.vmem [resolvable:$true] %s59_s2 }
  0x14   :  { %s4859_s3 = smov 64   ;;  %s4860_s25 = smov 4  }
  0x15   :  { %s4861_s8 = smov [#allocation8]   ;;  %s123_s26 = sshll.u32 %s6323_s13, 4  ;;  %s124_s26 = int_to_ptr.hbm [resolvable:$true] %s123_s26 }
  0x16   :  { %s93_s4 = sshll.u32 %s4861_s8, 4  ;;  %s6350_s29 = sld [smem:[#allocation34_spill]]  ;;  %s94_s4 = int_to_ptr.vmem [resolvable:$true] %s93_s4 }
  0x17   :  { %s6351_s1 = sld [smem:[#allocation38_spill]]  ;;  %s4864_s6 = smov [#allocation7]  }
  0x18   :  { %s57_s28 = sshll.u32 %s6348_s27, 4  ;;  %s108_s27 = sshll.u32 %s6321_s11, 4  ;;  %s58_s28 = int_to_ptr.hbm [resolvable:$true] %s57_s28  ;;  %s109_s27 = int_to_ptr.hbm [resolvable:$true] %s108_s27 }
  0x19   :  { %s91_s30 = sshll.u32 %s6349_s7, 4  ;;  %s4862_s7 = smov [#allocation11]   ;;  %s92_s30 = int_to_ptr.hbm [resolvable:$true] %s91_s30 }
  0x1a   :  { %65 = dma.hbm_to_vmem [thread:$0]  %s58_s28, 1024, %s60_s2, [#allocation6], %s4859_s3, %s4859_s3, %s4860_s25  }
  0x1b   :  { %99 = dma.hbm_to_vmem [thread:$0]  %s92_s30, 1024, %s94_s4, [#allocation9], %s4859_s3, %s4859_s3, %s4860_s25  }
  0x1c   :  { %s44_s0 = sshll.u32 %s6350_s29, 4  ;;  %s125_s24 = sshll.u32 %s4862_s7, 4  ;;  %s45_s0 = int_to_ptr.hbm [resolvable:$true] %s44_s0  ;;  %s126_s24 = int_to_ptr.vmem [resolvable:$true] %s125_s24 }
  0x1d   :  { %131 = dma.hbm_to_vmem [thread:$0]  %s124_s26, 1024, %s126_s24, [#allocation12], %s4859_s3, %s4859_s3, %s4860_s25  }
  0x1e   :  { %s4863_s28 = smov [#allocation2]   ;;  %s74_s5 = sshll.u32 %s6351_s1, 4  ;;  %s75_s5 = int_to_ptr.hbm [resolvable:$true] %s74_s5 }
  0x1f   :  { %s46_s13 = sshll.u32 %s4863_s28, 4  ;;  %s76_s29 = sshll.u32 %s4864_s6, 4  ;;  %s47_s13 = int_to_ptr.vmem [resolvable:$true] %s46_s13  ;;  %s77_s29 = int_to_ptr.vmem [resolvable:$true] %s76_s29 }
  0x20   :  { %52 = dma.hbm_to_vmem [thread:$0]  %s45_s0, 2048, %s47_s13, [#allocation3], %s4859_s3, %s4859_s3, %s4860_s25  }
  0x21   :  { %82 = dma.hbm_to_vmem [thread:$0]  %s75_s5, 1024, %s77_s29, [#allocation6], %s4859_s3, %s4859_s3, %s4860_s25  }
  0x22   :  { %s4865_s24 = smov [#allocation10]   ;;  %s138_s2 = sshll.u32 %s6325_s15, 4  ;;  %s139_s2 = int_to_ptr.hbm [resolvable:$true] %s138_s2 }
  0x23   :  { %s110_s26 = sshll.u32 %s4865_s24, 4  ;;  %s4866_s11 = smov [#allocation13]   ;;  %s111_s26 = int_to_ptr.vmem [resolvable:$true] %s110_s26 }
  0x24   :  { %116 = dma.hbm_to_vmem [thread:$0]  %s109_s27, 1024, %s111_s26, [#allocation9], %s4859_s3, %s4859_s3, %s4860_s25  }
  0x25   :  { %s140_s0 = sshll.u32 %s4866_s11, 4  ;;  %s4867_s13 = smov 128   ;;  %s141_s0 = int_to_ptr.vmem [resolvable:$true] %s140_s0 }
  0x26   :  { %s4868_s8 = smov 8  }
  0x27   :  { %146 = dma.hbm_to_vmem [thread:$0]  %s139_s2, 2048, %s141_s0, [#allocation12], %s4867_s13, %s4867_s13, %s4868_s8  }
  0x28   :  { %4842 = dma.done.wait [#allocation3], 2048  }
  0x29   :  { %4843 = vsyncadd [#allocation3], 4294965248 }
  0x2a   :  { %4844 = dma.done.wait [#allocation6], 2048  }
  0x2b   :  { %4845 = vsyncadd [#allocation6], 4294965248 }
  0x2c   :  { %4846 = dma.done.wait [#allocation9], 2048  }
  0x2d   :  { %4847 = vsyncadd [#allocation9], 4294965248 }
  0x2e   :  { %4848 = dma.done.wait [#allocation12], 3072  }
  0x2f   :  { %4849 = vsyncadd [#allocation12], 4294964224  ;;  %v3915_v0 = vld [vmem:[#allocation5 + $0x38] sm:$0xff]  ;;  %v3914_v1 = vld [vmem:[#allocation5 + $0x30] sm:$0xff]  ;;  %s6352_s5 = sld [smem:[#allocation33_spill]]  ;;  %vm3328_vm0 = vcmask 1040384  }
  0x30   :  { %403 = vmatpush.bf16.msra.mxu0 %v3915_v0  ;;  %4423 = vmatpush.bf16.msra.mxu3 %v3915_v0  ;;  %v3913_v2 = vld [vmem:[#allocation5 + $0x28] sm:$0xff]  ;;  %v3912_v3 = vld [vmem:[#allocation5 + $0x20] sm:$0xff]  ;;  %v3911_v4 = vld [vmem:[#allocation5 + $0x18] sm:$0xff]  ;;  %s6354_s28 = sld [smem:[#allocation36_spill]]  ;;  %vm3371_vm1 = vcmask 1041408   ;;  %s4871_s7 = smov [#allocation15]  }
  0x31   :  { %v3910_v5 = vld [vmem:[#allocation5 + $0x10] sm:$0xff]  ;;  %v3909_v6 = vld [vmem:[#allocation5 + $0x8] sm:$0xff]  ;;  %v3908_v7 = vld [vmem:[#allocation5] sm:$0xff]  ;;  %s6355_s0 = sld [smem:[#allocation37_spill]]  ;;  %s3430_s8 = sshll.u32 %s6331_s21, 4  ;;  %s3431_s8 = int_to_ptr.hbm [resolvable:$true] %s3430_s8 }
  0x32   :  { %v3892_v8 = vld [vmem:[#allocation2] sm:$0xff]  ;;  %v3893_v9 = vld [vmem:[#allocation2 + $0x8] sm:$0xff]  ;;  %v3894_v10 = vld [vmem:[#allocation2 + $0x10] sm:$0xff]  ;;  %s6361_s24 = sld [smem:[#allocation39_spill]]  ;;  %s3457_s1 = sshll.u32 %s6333_s23, 4  ;;  %s3458_s1 = int_to_ptr.hbm [resolvable:$true] %s3457_s1 }
  0x33   :  { %v3895_v11 = vld [vmem:[#allocation2 + $0x18] sm:$0xff]  ;;  %v3905_v12 = vld [vmem:[#allocation2 + $0x68] sm:$0xff]  ;;  %v3896_v13 = vld [vmem:[#allocation2 + $0x20] sm:$0xff]  ;;  %s4873_s30 = smov [#allocation21]   ;;  %s4874_s27 = smov [#allocation14]  }
  0x34   :  { %404 = vmatpush.bf16.msra.mxu0 %v3914_v1  ;;  %4424 = vmatpush.bf16.msra.mxu3 %v3914_v1  ;;  %v3906_v14 = vld [vmem:[#allocation2 + $0x70] sm:$0xff]  ;;  %v3897_v15 = vld [vmem:[#allocation2 + $0x28] sm:$0xff]  ;;  %v3907_v17 = vld [vmem:[#allocation2 + $0x78] sm:$0xff]  ;;  %s3455_s4 = sshll.u32 %s4873_s30, 4  ;;  %s3389_s6 = sshll.u32 %s4874_s27, 4  ;;  %s3456_s4 = int_to_ptr.vmem [resolvable:$true] %s3455_s4  ;;  %s3390_s6 = int_to_ptr.vmem [resolvable:$true] %s3389_s6 }
  0x35   :  { %v3898_v16 = vld [vmem:[#allocation2 + $0x30] sm:$0xff]  ;;  %v3899_v18 = vld [vmem:[#allocation2 + $0x38] sm:$0xff]  ;;  %v3900_v19 = vld [vmem:[#allocation2 + $0x40] sm:$0xff]  ;;  %s3391_s21 = sshll.u32 %s6328_s18, 4  ;;  %s3417_s23 = sshll.u32 %s6330_s20, 4  ;;  %s3392_s21 = int_to_ptr.hbm [resolvable:$true] %s3391_s21  ;;  %s3418_s23 = int_to_ptr.hbm [resolvable:$true] %s3417_s23 }
  0x36   :  { %v3901_v23 = vld [vmem:[#allocation2 + $0x48] sm:$0xff]  ;;  %v3902_v26 = vld [vmem:[#allocation2 + $0x50] sm:$0xff]  ;;  %v3903_v29 = vld [vmem:[#allocation2 + $0x58] sm:$0xff]  ;;  %s4875_s26 = smov [#allocation17]   ;;  %s3443_s2 = sshll.u32 %s6332_s22, 4  ;;  %s3444_s2 = int_to_ptr.hbm [resolvable:$true] %s3443_s2 }
  0x37   :  { %v3904_v32 = vld [vmem:[#allocation2 + $0x60] sm:$0xff]  ;;  %s4877_s20 = smov [#allocation23]  }
  0x38   :  { %405 = vmatpush.bf16.msra.mxu0 %v3913_v2  ;;  %4425 = vmatpush.bf16.msra.mxu3 %v3913_v2  ;;  %v3606_v1 = vld [vmem:[%s6352_s5] sm:$0xf]  ;;  %v3861_v2 = vld [vmem:[%s6352_s5 + $0x4] sm:$0xf0]  ;;  %s3466_s11 = sshll.u32 %s4877_s20, 4  ;;  %s3467_s11 = int_to_ptr.vmem [resolvable:$true] %s3466_s11 }
  0x3c   :  { %406 = vmatpush.bf16.msra.mxu0 %v3912_v3  ;;  %4426 = vmatpush.bf16.msra.mxu3 %v3912_v3  ;;  %v5050_v3 = vor.u32 %v3861_v2, %v3606_v1  ;;  %v3648_v1 = vld [vmem:[%s6352_s5 + $0x58] sm:$0xf0] }
  0x40   :  { %407 = vmatpush.bf16.msra.mxu0 %v3911_v4  ;;  %4427 = vmatpush.bf16.msra.mxu3 %v3911_v4  ;;  %v3710_v4 = vld [vmem:[%s6352_s5 + $0xd0] sm:$0xf] }
  0x44   :  { %408 = vmatpush.bf16.msra.mxu0 %v3910_v5  ;;  %4428 = vmatpush.bf16.msra.mxu3 %v3910_v5  ;;  %v3887_v5 = vld [vmem:[%s6352_s5 + $0xd4] sm:$0xf0] }
  0x48   :  { %409 = vmatpush.bf16.msra.mxu0 %v3909_v6  ;;  %4429 = vmatpush.bf16.msra.mxu3 %v3909_v6  ;;  %v5059_v6 = vor.u32 %v3887_v5, %v3710_v4  ;;  %v3923_v5 = vld [vmem:[#allocation7 + $0x38] sm:$0xff] }
  0x4c   :  { %410 = vmatpush.bf16.msra.mxu0 %v3908_v7  ;;  %4430 = vmatpush.bf16.msra.mxu3 %v3908_v7 }
  0x4f   :  { %411 = vmatmul.bf16.vlgmr.msra.gmra.mxu0 %v3892_v8  ;;  %476 = vmatmul.bf16.vlgmr.msra.gmra.mxu3 %v3905_v12  ;;  %v3614_v8 = vld [vmem:[%s6352_s5 + $0x10] sm:$0xf] }
  0x5f   :  { %416 = vmatmul.bf16.gmra.mxu0 %v3893_v9  ;;  %481 = vmatmul.bf16.gmra.mxu3 %v3906_v14  ;;  %v3863_v9 = vld [vmem:[%s6352_s5 + $0x14] sm:$0xf0]  ;;  %v3718_v14 = vld [vmem:[%s6352_s5 + $0xe0] sm:$0xf] }
  0x6f   :  { %421 = vmatmul.bf16.gmra.mxu0 %v3894_v10  ;;  %486 = vmatmul.bf16.gmra.mxu3 %v3907_v17 }
  0x7f   :  { %426 = vmatmul.bf16.gmra.mxu0 %v3895_v11  ;;  %v5068_v11 = vor.u32 %v3863_v9, %v3614_v8  ;;  %v3670_v8 = vld [vmem:[%s6352_s5 + $0x80] sm:$0xf]  ;;  %v3877_v9 = vld [vmem:[%s6352_s5 + $0x84] sm:$0xf0] }
  0x8f   :  { %431 = vmatmul.bf16.gmra.mxu0 %v3896_v13 }
  0x9f   :  { %436 = vmatmul.bf16.gmra.mxu0 %v3897_v15  ;;  %v3889_v15 = vld [vmem:[%s6352_s5 + $0xe4] sm:$0xf0] }
  0xaf   :  { %441 = vmatmul.bf16.gmra.mxu0 %v3898_v16  ;;  %v5077_v16 = vor.u32 %v3889_v15, %v3718_v14 }
  0xbf   :  { %446 = vmatmul.bf16.gmra.mxu0 %v3899_v18 }
  0xcc   :  { %v412_v20 = vpop.f32.mrf.mxu0 }
  0xcf   :  { %451 = vmatmul.bf16.gmra.mxu0 %v3900_v19  ;;  %v3622_v19 = vld [vmem:[%s6352_s5 + $0x20] sm:$0xf] }
  0xd2   :  { %v477_v34 = vpop.f32.mrf.mxu3 }
  0xd4   :  { %v414_v21 = vpop.f32.mrf.mxu0 }
  0xd5   :  { %v492_v22 = vpack.c.bf16 %v414_v21, %v412_v20  ;;  %v3865_v20 = vld [vmem:[%s6352_s5 + $0x24] sm:$0xf0]  ;;  %v3860_v21 = vld [vmem:[%s6352_s5 + $0x4] sm:$0xf] }
  0xda   :  { %v479_v36 = vpop.f32.mrf.mxu3 }
  0xdb   :  { %v505_v48 = vpack.c.bf16 %v479_v36, %v477_v34  ;;  %v3712_v36 = vld [vmem:[%s6352_s5 + $0xd8] sm:$0xf0] }
  0xdc   :  { %v417_v24 = vpop.f32.mrf.mxu0 }
  0xdf   :  { %456 = vmatmul.bf16.gmra.mxu0 %v3901_v23  ;;  %v5092_v23 = vor.u32 %v3865_v20, %v3622_v19  ;;  %v3920_v20 = vld [vmem:[#allocation7 + $0x20] sm:$0xff] }
  0xe2   :  { %v482_v38 = vpop.f32.mrf.mxu3 }
  0xe4   :  { %v419_v25 = vpop.f32.mrf.mxu0 }
  0xe5   :  { %v493_v59 = vpack.c.bf16 %v419_v25, %v417_v24 }
  0xea   :  { %v484_v40 = vpop.f32.mrf.mxu3 }
  0xeb   :  { %v506_v47 = vpack.c.bf16 %v484_v40, %v482_v38  ;;  %v3638_v38 = vld [vmem:[%s6352_s5 + $0x40] sm:$0xf]  ;;  %v3864_v40 = vld [vmem:[%s6352_s5 + $0x24] sm:$0xf] }
  0xec   :  { %v422_v27 = vpop.f32.mrf.mxu0 }
  0xef   :  { %461 = vmatmul.bf16.gmra.mxu0 %v3902_v26  ;;  %v3726_v26 = vld [vmem:[%s6352_s5 + $0xf0] sm:$0xf] }
  0xf2   :  { %v487_v42 = vpop.f32.mrf.mxu3 }
  0xf4   :  { %v424_v28 = vpop.f32.mrf.mxu0 }
  0xf5   :  { %v494_v57 = vpack.c.bf16 %v424_v28, %v422_v27  ;;  %v3891_v27 = vld [vmem:[%s6352_s5 + $0xf4] sm:$0xf0] }
  0xf6   :  { %v5105_v28 = vor.u32 %v3891_v27, %v3726_v26  ;;  %v3678_v27 = vld [vmem:[%s6352_s5 + $0x90] sm:$0xf] }
  0xfa   :  { %v489_v44 = vpop.f32.mrf.mxu3 }
  0xfb   :  { %v507_v45 = vpack.c.bf16 %v489_v44, %v487_v42  ;;  %v3888_v44 = vld [vmem:[%s6352_s5 + $0xe4] sm:$0xf] }
  0xfc   :  { %v427_v30 = vpop.f32.mrf.mxu0 }
  0xfd   :  { %757 = vmatpush.bf16.msra.mxu2 %v507_v45 }
  0xff   :  { %466 = vmatmul.bf16.gmra.mxu0 %v3903_v29  ;;  %v3630_v29 = vld [vmem:[%s6352_s5 + $0x30] sm:$0xf] }
 0x101   :  { %758 = vmatpush.bf16.msra.mxu2 %v506_v47 }
 0x104   :  { %v429_v31 = vpop.f32.mrf.mxu0 }
 0x105   :  { %759 = vmatpush.bf16.msra.mxu2 %v505_v48  ;;  %v495_v56 = vpack.c.bf16 %v429_v31, %v427_v30  ;;  %v3867_v30 = vld [vmem:[%s6352_s5 + $0x34] sm:$0xf0]  ;;  %v3862_v31 = vld [vmem:[%s6352_s5 + $0x14] sm:$0xf] }
 0x10c   :  { %v432_v33 = vpop.f32.mrf.mxu0 }
 0x10f   :  { %471 = vmatmul.bf16.gmra.mxu0 %v3904_v32  ;;  %v3616_v32 = vld [vmem:[%s6352_s5 + $0x18] sm:$0xf0] }
 0x110   :  { %v5122_v34 = vor.u32 %v3862_v31, %v3616_v32 }
 0x114   :  { %v434_v35 = vpop.f32.mrf.mxu0 }
 0x115   :  { %v496_v54 = vpack.c.bf16 %v434_v35, %v432_v33  ;;  %v5120_v33 = vor.u32 %v3867_v30, %v3630_v29  ;;  %v3886_v35 = vld [vmem:[%s6352_s5 + $0xd4] sm:$0xf]  ;;  %v3879_v29 = vld [vmem:[%s6352_s5 + $0x94] sm:$0xf0] }
 0x116   :  { %v5259_v31 = vor.u32 %v3879_v29, %v3678_v27 }
 0x11c   :  { %v437_v37 = vpop.f32.mrf.mxu0 }
 0x124   :  { %v439_v39 = vpop.f32.mrf.mxu0 }
 0x125   :  { %v497_v53 = vpack.c.bf16 %v439_v39, %v437_v37  ;;  %v5132_v37 = vor.u32 %v3886_v35, %v3712_v36  ;;  %v3869_v39 = vld [vmem:[%s6352_s5 + $0x44] sm:$0xf0]  ;;  %v3918_v35 = vld [vmem:[#allocation7 + $0x10] sm:$0xff] }
 0x126   :  { %v5147_v42 = vor.u32 %v3869_v39, %v3638_v38  ;;  %v3917_v36 = vld [vmem:[#allocation7 + $0x8] sm:$0xff] }
 0x12c   :  { %v442_v41 = vpop.f32.mrf.mxu0 }
 0x134   :  { %v444_v43 = vpop.f32.mrf.mxu0 }
 0x135   :  { %v498_v51 = vpack.c.bf16 %v444_v43, %v442_v41  ;;  %v3624_v41 = vld [vmem:[%s6352_s5 + $0x28] sm:$0xf0] }
 0x136   :  { %v5149_v43 = vor.u32 %v3864_v40, %v3624_v41  ;;  %v3916_v40 = vld [vmem:[#allocation7] sm:$0xff] }
 0x137   :  { %v3876_v41 = vld [vmem:[%s6352_s5 + $0x84] sm:$0xf] }
 0x13c   :  { %v447_v46 = vpop.f32.mrf.mxu0 }
 0x144   :  { %v449_v49 = vpop.f32.mrf.mxu0 }
 0x145   :  { %v499_v50 = vpack.c.bf16 %v449_v49, %v447_v46  ;;  %v3866_v49 = vld [vmem:[%s6352_s5 + $0x34] sm:$0xf] }
 0x147   :  { %668 = vmatpush.bf16.msra.mxu1 %v499_v50  ;;  %4431 = vmatpush.bf16.msrb.mxu3 %v499_v50  ;;  %v3632_v50 = vld [vmem:[%s6352_s5 + $0x38] sm:$0xf0] }
 0x14b   :  { %669 = vmatpush.bf16.msra.mxu1 %v498_v51  ;;  %4432 = vmatpush.bf16.msrb.mxu3 %v498_v51 }
 0x14c   :  { %v5042_v52 = vpop.f32.mrf.mxu0 }
 0x14f   :  { %670 = vmatpush.bf16.msra.mxu1 %v497_v53  ;;  %4433 = vmatpush.bf16.msrb.mxu3 %v497_v53  ;;  %v3890_v53 = vld [vmem:[%s6352_s5 + $0xf4] sm:$0xf] }
 0x153   :  { %671 = vmatpush.bf16.msra.mxu1 %v496_v54  ;;  %4434 = vmatpush.bf16.msrb.mxu3 %v496_v54  ;;  %v3728_v54 = vld [vmem:[%s6352_s5 + $0xf8] sm:$0xf0] }
 0x154   :  { %v454_v55 = vpop.f32.mrf.mxu0 }
 0x155   :  { %v500_v24 = vpack.c.bf16 %v454_v55, %v5042_v52  ;;  %v5176_v52 = vor.u32 %v3866_v49, %v3632_v50  ;;  %v5186_v55 = vor.u32 %v3890_v53, %v3728_v54  ;;  %v5292_v54 = vld [vmem:[%s6354_s28] ss:$0 sm:$0xff]  ;;  %s6362_s28 = sld [smem:[#allocation40_spill]] }
 0x157   :  { %672 = vmatpush.bf16.msra.mxu1 %v495_v56  ;;  %4435 = vmatpush.bf16.msrb.mxu3 %v495_v56  ;;  %6353 = vst [vmem:[#allocation32_spill] sm:$0xff] %v5186_v55  ;;  %v3654_v56 = vld [vmem:[%s6352_s5 + $0x60] sm:$0xf] }
 0x15b   :  { %673 = vmatpush.bf16.msra.mxu1 %v494_v57  ;;  %4436 = vmatpush.bf16.msrb.mxu3 %v494_v57  ;;  %v3873_v57 = vld [vmem:[%s6352_s5 + $0x64] sm:$0xf0] }
 0x15c   :  { %v457_v58 = vpop.f32.mrf.mxu0 }
 0x15f   :  { %674 = vmatpush.bf16.msra.mxu1 %v493_v59  ;;  %4437 = vmatpush.bf16.msrb.mxu3 %v493_v59  ;;  %v3640_v59 = vld [vmem:[%s6352_s5 + $0x48] sm:$0xf0] }
 0x163   :  { %675 = vmatpush.bf16.msra.mxu1 %v492_v22  ;;  %4438 = vmatpush.bf16.msrb.mxu3 %v492_v22  ;;  %v3608_v22 = vld [vmem:[%s6352_s5 + $0x8] sm:$0xf0] }
 0x164   :  { %v459_v60 = vpop.f32.mrf.mxu0  ;;  %v5095_v25 = vor.u32 %v3860_v21, %v3608_v22  ;;  %v3874_v21 = vld [vmem:[%s6352_s5 + $0x74] sm:$0xf]  ;;  %v3664_v22 = vld [vmem:[%s6352_s5 + $0x78] sm:$0xf0] }
 0x165   :  { %v501_v18 = vpack.c.bf16 %v459_v60, %v457_v58  ;;  %v3868_v58 = vld [vmem:[%s6352_s5 + $0x44] sm:$0xf]  ;;  %v5201_v60 = vor.u32 %v3873_v57, %v3654_v56  ;;  %v5257_v30 = vor.u32 %v3874_v21, %v3664_v22 }
 0x166   :  { %676 = vmatmul.bf16.vlgmr.msra.gmra.mxu1 %v5050_v3  ;;  %741 = vmatmul.bf16.vlgmr.msrb.gmra.mxu3 %v5059_v6 }
 0x167   :  { %4439 = vmatpush.bf16.msra.mxu3 %v507_v45  ;;  %v3720_v45 = vld [vmem:[%s6352_s5 + $0xe8] sm:$0xf0] }
 0x168   :  { %v5159_v46 = vor.u32 %v3888_v44, %v3720_v45  ;;  %v3672_v44 = vld [vmem:[%s6352_s5 + $0x88] sm:$0xf0] }
 0x169   :  { %v5281_v49 = vor.u32 %v3876_v41, %v3672_v44 }
 0x16b   :  { %4440 = vmatpush.bf16.msra.mxu3 %v506_v47  ;;  %v3646_v47 = vld [vmem:[%s6352_s5 + $0x50] sm:$0xf] }
 0x16c   :  { %v462_v61 = vpop.f32.mrf.mxu0 }
 0x16f   :  { %4441 = vmatpush.bf16.msra.mxu3 %v505_v48  ;;  %v3871_v48 = vld [vmem:[%s6352_s5 + $0x54] sm:$0xf0] }
 0x170   :  { %v5174_v51 = vor.u32 %v3871_v48, %v3646_v47  ;;  %v3686_v47 = vld [vmem:[%s6352_s5 + $0xa0] sm:$0xf]  ;;  %v3881_v48 = vld [vmem:[%s6352_s5 + $0xa4] sm:$0xf0] }
 0x171   :  { %v5283_v50 = vor.u32 %v3881_v48, %v3686_v47 }
 0x174   :  { %v464_v62 = vpop.f32.mrf.mxu0 }
 0x175   :  { %v502_v17 = vpack.c.bf16 %v464_v62, %v462_v61  ;;  %v5203_v61 = vor.u32 %v3868_v58, %v3640_v59  ;;  %v3662_v62 = vld [vmem:[%s6352_s5 + $0x70] sm:$0xf] }
 0x176   :  { %681 = vmatmul.bf16.gmra.mxu1 %v5068_v11  ;;  %746 = vmatmul.bf16.gmra.mxu3 %v5077_v16 }
 0x17c   :  { %v467_v63 = vpop.f32.mrf.mxu0 }
 0x184   :  { %v469_v0 = vpop.f32.mrf.mxu0 }
 0x185   :  { %v503_v13 = vpack.c.bf16 %v469_v0, %v467_v63  ;;  %v3875_v63 = vld [vmem:[%s6352_s5 + $0x74] sm:$0xf0]  ;;  %v3870_v0 = vld [vmem:[%s6352_s5 + $0x54] sm:$0xf] }
 0x186   :  { %686 = vmatmul.bf16.gmra.mxu1 %v5092_v23  ;;  %751 = vmatmul.bf16.gmra.mxu3 %v5105_v28  ;;  %v5219_v2 = vor.u32 %v3875_v63, %v3662_v62  ;;  %v5221_v4 = vor.u32 %v3870_v0, %v3648_v1  ;;  %v5302_v63 = vld [vmem:[%s6355_s0] ss:$0 sm:$0xff]  ;;  %v3878_v0 = vld [vmem:[%s6352_s5 + $0x94] sm:$0xf]  ;;  %v3680_v1 = vld [vmem:[%s6352_s5 + $0x98] sm:$0xf0] }
 0x187   :  { %s3404_s0 = sshll.u32 %s6329_s19, 4  ;;  %s3405_s0 = int_to_ptr.hbm [resolvable:$true] %s3404_s0 }
 0x18c   :  { %v472_v7 = vpop.f32.mrf.mxu0 }
 0x194   :  { %v474_v10 = vpop.f32.mrf.mxu0 }
 0x195   :  { %v504_v12 = vpack.c.bf16 %v474_v10, %v472_v7  ;;  %v3922_v7 = vld [vmem:[#allocation7 + $0x30] sm:$0xff]  ;;  %v3872_v10 = vld [vmem:[%s6352_s5 + $0x64] sm:$0xf] }
 0x196   :  { %691 = vmatmul.bf16.gmra.mxu1 %v5120_v33 }
 0x197   :  { %760 = vmatpush.bf16.msra.mxu2 %v504_v12  ;;  %4442 = vmatpush.bf16.msra.mxu3 %v504_v12  ;;  %v3656_v12 = vld [vmem:[%s6352_s5 + $0x68] sm:$0xf0] }
 0x198   :  { %v5239_v15 = vor.u32 %v3872_v10, %v3656_v12  ;;  %v5317_v12 = vor.u32 %v3878_v0, %v3680_v1  ;;  %v3880_v0 = vld [vmem:[%s6352_s5 + $0xa4] sm:$0xf]  ;;  %v3688_v1 = vld [vmem:[%s6352_s5 + $0xa8] sm:$0xf0] }
 0x19b   :  { %761 = vmatpush.bf16.msra.mxu2 %v503_v13  ;;  %4443 = vmatpush.bf16.msra.mxu3 %v503_v13  ;;  %v5237_v13 = vor.u32 %v3877_v9, %v3670_v8  ;;  %v3694_v8 = vld [vmem:[%s6352_s5 + $0xb0] sm:$0xf]  ;;  %v3883_v9 = vld [vmem:[%s6352_s5 + $0xb4] sm:$0xf0] }
 0x19f   :  { %762 = vmatpush.bf16.msra.mxu2 %v502_v17  ;;  %4444 = vmatpush.bf16.msra.mxu3 %v502_v17  ;;  %v3921_v17 = vld [vmem:[#allocation7 + $0x28] sm:$0xff] }
 0x1a3   :  { %763 = vmatpush.bf16.msra.mxu2 %v501_v18  ;;  %4445 = vmatpush.bf16.msra.mxu3 %v501_v18 }
 0x1a6   :  { %696 = vmatmul.bf16.gmra.mxu1 %v5147_v42 }
 0x1a7   :  { %764 = vmatpush.bf16.msra.mxu2 %v500_v24  ;;  %4446 = vmatpush.bf16.msra.mxu3 %v500_v24  ;;  %v3919_v24 = vld [vmem:[#allocation7 + $0x18] sm:$0xff] }
 0x1aa   :  { %765 = vmatmul.bf16.vlgmr.msra.gmra.mxu2 %v5095_v25  ;;  %830 = vmatmul.bf16.vlgmr.msra.gmra.mxu3 %v5132_v37 }
 0x1ab   :  { %1174 = vmatpush.bf16.msrb.mxu3 %v3923_v5 }
 0x1af   :  { %1175 = vmatpush.bf16.msrb.mxu3 %v3922_v7 }
 0x1b3   :  { %1176 = vmatpush.bf16.msrb.mxu3 %v3921_v17 }
 0x1b6   :  { %701 = vmatmul.bf16.gmra.mxu1 %v5174_v51 }
 0x1b7   :  { %1177 = vmatpush.bf16.msrb.mxu3 %v3920_v20 }
 0x1ba   :  { %770 = vmatmul.bf16.gmra.mxu2 %v5122_v34  ;;  %835 = vmatmul.bf16.gmra.mxu3 %v5159_v46 }
 0x1bb   :  { %1178 = vmatpush.bf16.msrb.mxu3 %v3919_v24 }
 0x1bf   :  { %1179 = vmatpush.bf16.msrb.mxu3 %v3918_v35 }
 0x1c3   :  { %1180 = vmatpush.bf16.msrb.mxu3 %v3917_v36 }
 0x1c6   :  { %706 = vmatmul.bf16.gmra.mxu1 %v5201_v60 }
 0x1c7   :  { %1181 = vmatpush.bf16.msrb.mxu3 %v3916_v40 }
 0x1ca   :  { %775 = vmatmul.bf16.gmra.mxu2 %v5149_v43  ;;  %840 = vmatmul.bf16.gmra.mxu3 %v5186_v55 }
 0x1d6   :  { %711 = vmatmul.bf16.gmra.mxu1 %v5219_v2 }
 0x1da   :  { %780 = vmatmul.bf16.gmra.mxu2 %v5176_v52 }
 0x1e3   :  { %v677_v14 = vpop.f32.mrf.mxu1 }
 0x1e6   :  { %716 = vmatmul.bf16.gmra.mxu1 %v5237_v13 }
 0x1e9   :  { %v5243_v19 = vpop.f32.mrf.mxu3 }
 0x1ea   :  { %785 = vmatmul.bf16.gmra.mxu2 %v5203_v61 }
 0x1eb   :  { %v679_v18 = vpop.f32.mrf.mxu1 }
 0x1f1   :  { %v5261_v32 = vpop.f32.mrf.mxu3 }
 0x1f3   :  { %v682_v26 = vpop.f32.mrf.mxu1 }
 0x1f6   :  { %721 = vmatmul.bf16.gmra.mxu1 %v5259_v31 }
 0x1f9   :  { %v5265_v39 = vpop.f32.mrf.mxu3 }
 0x1fa   :  { %790 = vmatmul.bf16.gmra.mxu2 %v5221_v4 }
 0x1fb   :  { %v684_v38 = vpop.f32.mrf.mxu1 }
 0x201   :  { %v5285_v53 = vpop.f32.mrf.mxu3 }
 0x203   :  { %v5273_v45 = vpop.f32.mrf.mxu1 }
 0x206   :  { %726 = vmatmul.bf16.gmra.mxu1 %v5283_v50 }
 0x209   :  { %v5296_v59 = vpop.f32.mrf.mxu3 }
 0x20a   :  { %795 = vmatmul.bf16.gmra.mxu2 %v5239_v15 }
 0x20b   :  { %v5294_v57 = vpop.f32.mrf.mxu1 }
 0x211   :  { %v5323_v20 = vpop.f32.mrf.mxu3 }
 0x213   :  { %v5321_v17 = vpop.f32.mrf.mxu1 }
 0x21a   :  { %800 = vmatmul.bf16.gmra.mxu2 %v5257_v30 }
 0x22a   :  { %805 = vmatmul.bf16.gmra.mxu2 %v5281_v49 }
 0x22d   :  { %v766_v56 = vpop.f32.mrf.mxu2  ;;  %v831_v41 = vpop.f32.mrf.mxu3 }
 0x22e   :  { %v767_v58 = vadd.f32 %v766_v56, %v677_v14  ;;  %v5319_v14 = vor.u32 %v3883_v9, %v3694_v8  ;;  %v5330_v56 = vpop.f32.mrf.mxu1  ;;  %v3885_v8 = vld [vmem:[%s6352_s5 + $0xc4] sm:$0xf0] }
 0x230   :  { %v850_v62 = vmul.f32 %v5292_v54, %v767_v58  ;;  %731 = vmatmul.bf16.gmra.mxu1 %v5319_v14 }
 0x232   :  { %v886_v5 = vadd.f32 %v5302_v63, %v850_v62 }
 0x234   :  { %v918_v21 = vmax.f32 %v886_v5, 0.0 }
 0x235   :  { %v768_v7 = vpop.f32.mrf.mxu2 }
 0x236   :  { %v769_v10 = vadd.f32 %v768_v7, %v679_v18  ;;  %v950_v27 = vpack.c.bf16 %v918_v21, %v918_v21  ;;  %v3702_v7 = vld [vmem:[%s6352_s5 + $0xc0] sm:$0xf] }
 0x238   :  { %v851_v22 = vmul.f32 %v5292_v54, %v769_v10  ;;  %v1062_v44 = vunpack.c.l.b16 %v950_v27  ;;  %v5346_v10 = vor.u32 %v3880_v0, %v3688_v1  ;;  %v833_v27 = vpop.f32.mrf.mxu3 }
 0x23a   :  { %v887_v24 = vadd.f32 %v5302_v63, %v851_v22  ;;  %810 = vmatmul.bf16.gmra.mxu2 %v5317_v12  ;;  %v5349_v22 = vor.u32 %v3885_v8, %v3702_v7 }
 0x23c   :  { %v919_v29 = vmax.f32 %v887_v24, 0.0 }
 0x23d   :  { %v771_v18 = vpop.f32.mrf.mxu2 }
 0x23e   :  { %v951_v35 = vpack.c.bf16 %v919_v29, %v919_v29  ;;  %v3951_v36 = vpack.c.bf16 %v919_v29, %v918_v21  ;;  %v772_v40 = vadd.f32 %v771_v18, %v682_v26  ;;  %v832_v26 = vadd.f32 %v831_v41, %v5243_v19 }
 0x23f   :  { %v834_v18 = vadd.f32 %v833_v27, %v5261_v32 }
 0x240   :  { %3952 = vst [vmem:[#allocation14] sm:$0xff] %v3951_v36   ;;  %v1063_v47 = vunpack.c.l.b16 %v951_v35  ;;  %v852_v48 = vmul.f32 %v5292_v54, %v772_v40  ;;  %v876_v21 = vmul.f32 %v5292_v54, %v832_v26  ;;  %736 = vmatmul.bf16.gmra.mxu1 %v5349_v22  ;;  %v5358_v40 = vpop.f32.mrf.mxu1  ;;  %v836_v26 = vpop.f32.mrf.mxu3 }
 0x242   :  { %v1094_v58 = vpack.c.b16 %v1063_v47, %v1062_v44  ;;  %v888_v62 = vadd.f32 %v5302_v63, %v852_v48  ;;  %v912_v29 = vadd.f32 %v5302_v63, %v876_v21 }
 0x244   :  { %1182 = vmatmul.bf16.vlgmr.msrb.gmra.mxu3 %v1094_v58  ;;  %v920_v24 = vmax.f32 %v888_v62, 0.0  ;;  %v944_v44 = vmax.f32 %v912_v29, 0.0 }
 0x245   :  { %v773_v5 = vpop.f32.mrf.mxu2 }
 0x246   :  { %v774_v9 = vadd.f32 %v773_v5, %v684_v38  ;;  %v877_v38 = vmul.f32 %v5292_v54, %v834_v18  ;;  %v952_v36 = vpack.c.bf16 %v920_v24, %v920_v24 }
 0x248   :  { %v853_v19 = vmul.f32 %v5292_v54, %v774_v9  ;;  %v913_v47 = vadd.f32 %v5302_v63, %v877_v38  ;;  %v1064_v1 = vunpack.c.l.b16 %v952_v36  ;;  %v976_v9 = vpack.c.bf16 %v944_v44, %v944_v44  ;;  %v5375_v36 = vpop.f32.mrf.mxu1 }
 0x24a   :  { %v889_v35 = vadd.f32 %v5302_v63, %v853_v19  ;;  %815 = vmatmul.bf16.gmra.mxu2 %v5346_v10  ;;  %v945_v0 = vmax.f32 %v913_v47, 0.0  ;;  %v5363_v19 = vunpack.c.l.b16 %v976_v9 }
 0x24c   :  { %v921_v41 = vmax.f32 %v889_v35, 0.0  ;;  %v4016_v8 = vpack.c.bf16 %v945_v0, %v944_v44  ;;  %v977_v21 = vpack.c.bf16 %v945_v0, %v945_v0  ;;  %v837_v35 = vadd.f32 %v836_v26, %v5265_v39 }
 0x24d   :  { %v776_v48 = vpop.f32.mrf.mxu2 }
 0x24e   :  { %v777_v58 = vadd.f32 %v776_v48, %v5273_v45  ;;  %v953_v62 = vpack.c.bf16 %v921_v41, %v921_v41  ;;  %v3956_v32 = vpack.c.bf16 %v921_v41, %v920_v24  ;;  %4360 = vst [vmem:[#allocation14 + $0x68] sm:$0xff] %v4016_v8   ;;  %v3882_v45 = vld [vmem:[%s6352_s5 + $0xb4] sm:$0xf]  ;;  %v3696_v24 = vld [vmem:[%s6352_s5 + $0xb8] sm:$0xf0]  ;;  %v5372_v18 = vunpack.c.l.b16 %v977_v21 }
 0x24f   :  { %v5380_v47 = vor.u32 %v3882_v45, %v3696_v24  ;;  %v878_v48 = vmul.f32 %v5292_v54, %v837_v35 }
 0x250   :  { %v854_v5 = vmul.f32 %v5292_v54, %v777_v58  ;;  %4348 = vst [vmem:[#allocation14 + $0x8] sm:$0xff] %v3956_v32   ;;  %v1065_v7 = vunpack.c.l.b16 %v953_v62  ;;  %v838_v62 = vpop.f32.mrf.mxu3  ;;  %v5391_v35 = vpop.f32.mrf.mxu1 }
 0x251   :  { %v914_v0 = vadd.f32 %v5302_v63, %v878_v48  ;;  %v839_v39 = vadd.f32 %v838_v62, %v5285_v53 }
 0x252   :  { %v1095_v27 = vpack.c.b16 %v1065_v7, %v1064_v1  ;;  %v890_v29 = vadd.f32 %v5302_v63, %v854_v5 }
 0x253   :  { %v879_v26 = vmul.f32 %v5292_v54, %v839_v39  ;;  %v946_v7 = vmax.f32 %v914_v0, 0.0 }
 0x254   :  { %1187 = vmatmul.bf16.gmra.mxu3 %v1095_v27  ;;  %v922_v58 = vmax.f32 %v890_v29, 0.0 }
 0x255   :  { %v778_v38 = vpop.f32.mrf.mxu2  ;;  %v915_v8 = vadd.f32 %v5302_v63, %v879_v26  ;;  %v978_v62 = vpack.c.bf16 %v946_v7, %v946_v7 }
 0x256   :  { %v779_v44 = vadd.f32 %v778_v38, %v5294_v57  ;;  %v954_v5 = vpack.c.bf16 %v922_v58, %v922_v58 }
 0x257   :  { %v947_v45 = vmax.f32 %v915_v8, 0.0  ;;  %v5394_v39 = vunpack.c.l.b16 %v978_v62 }
 0x258   :  { %v855_v32 = vmul.f32 %v5292_v54, %v779_v44  ;;  %v1066_v24 = vunpack.c.l.b16 %v954_v5  ;;  %v841_v53 = vpop.f32.mrf.mxu3 }
 0x259   :  { %v4021_v48 = vpack.c.bf16 %v947_v45, %v946_v7  ;;  %v842_v5 = vadd.f32 %v841_v53, %v5296_v59 }
 0x25a   :  { %v891_v1 = vadd.f32 %v5302_v63, %v855_v32  ;;  %820 = vmatmul.bf16.gmra.mxu2 %v5380_v47  ;;  %v979_v32 = vpack.c.bf16 %v947_v45, %v947_v45 }
 0x25b   :  { %4361 = vst [vmem:[#allocation14 + $0x70] sm:$0xff] %v4021_v48  }
 0x25c   :  { %v923_v57 = vmax.f32 %v891_v1, 0.0  ;;  %v3704_v1 = vld [vmem:[%s6352_s5 + $0xc8] sm:$0xf0]  ;;  %v5403_v26 = vunpack.c.l.b16 %v979_v32 }
 0x25d   :  { %v781_v9 = vpop.f32.mrf.mxu2 }
 0x25e   :  { %v782_v21 = vadd.f32 %v781_v9, %v5321_v17  ;;  %v955_v27 = vpack.c.bf16 %v923_v57, %v923_v57  ;;  %v3961_v29 = vpack.c.bf16 %v923_v57, %v922_v58  ;;  %v3884_v58 = vld [vmem:[%s6352_s5 + $0xc4] sm:$0xf] }
 0x25f   :  { %v5409_v9 = vor.u32 %v3884_v58, %v3704_v1 }
 0x260   :  { %v856_v38 = vmul.f32 %v5292_v54, %v782_v21  ;;  %4349 = vst [vmem:[#allocation14 + $0x10] sm:$0xff] %v3961_v29   ;;  %v1067_v44 = vunpack.c.l.b16 %v955_v27  ;;  %v880_v21 = vmul.f32 %v5292_v54, %v842_v5  ;;  %v843_v29 = vpop.f32.mrf.mxu3 }
 0x262   :  { %v1096_v0 = vpack.c.b16 %v1067_v44, %v1066_v24  ;;  %v892_v17 = vadd.f32 %v5302_v63, %v856_v38  ;;  %v916_v24 = vadd.f32 %v5302_v63, %v880_v21  ;;  %v844_v38 = vadd.f32 %v843_v29, %v5323_v20  ;;  %v704_v44 = vpop.f32.mrf.mxu1 }
 0x264   :  { %1192 = vmatmul.bf16.gmra.mxu3 %v1096_v0  ;;  %v924_v27 = vmax.f32 %v892_v17, 0.0  ;;  %v881_v53 = vmul.f32 %v5292_v54, %v844_v38  ;;  %v948_v62 = vmax.f32 %v916_v24, 0.0 }
 0x265   :  { %v783_v57 = vpop.f32.mrf.mxu2 }
 0x266   :  { %v784_v8 = vadd.f32 %v783_v57, %v5330_v56  ;;  %v956_v56 = vpack.c.bf16 %v924_v27, %v924_v27  ;;  %v917_v32 = vadd.f32 %v5302_v63, %v881_v53  ;;  %v980_v29 = vpack.c.bf16 %v948_v62, %v948_v62 }
 0x268   :  { %v857_v45 = vmul.f32 %v5292_v54, %v784_v8  ;;  %v949_v5 = vmax.f32 %v917_v32, 0.0  ;;  %v1068_v57 = vunpack.c.l.b16 %v956_v56 }
 0x26a   :  { %v893_v59 = vadd.f32 %v5302_v63, %v857_v45  ;;  %825 = vmatmul.bf16.gmra.mxu2 %v5409_v9  ;;  %v4026_v21 = vpack.c.bf16 %v949_v5, %v948_v62  ;;  %v981_v45 = vpack.c.bf16 %v949_v5, %v949_v5  ;;  %v707_v24 = vpop.f32.mrf.mxu1 }
 0x26c   :  { %v925_v48 = vmax.f32 %v893_v59, 0.0  ;;  %4362 = vst [vmem:[#allocation14 + $0x78] sm:$0xff] %v4026_v21   ;;  %v5421_v59 = vunpack.c.l.b16 %v980_v29  ;;  %v5423_v53 = vunpack.c.l.b16 %v981_v45 }
 0x26d   :  { %v786_v0 = vpop.f32.mrf.mxu2 }
 0x26e   :  { %v3966_v17 = vpack.c.bf16 %v925_v48, %v924_v27  ;;  %v787_v58 = vadd.f32 %v786_v0, %v5358_v40  ;;  %v957_v1 = vpack.c.bf16 %v925_v48, %v925_v48 }
 0x270   :  { %4350 = vst [vmem:[#allocation14 + $0x18] sm:$0xff] %v3966_v17   ;;  %v858_v20 = vmul.f32 %v5292_v54, %v787_v58  ;;  %v1069_v8 = vunpack.c.l.b16 %v957_v1 }
 0x272   :  { %v1097_v38 = vpack.c.b16 %v1069_v8, %v1068_v57  ;;  %v894_v27 = vadd.f32 %v5302_v63, %v858_v20  ;;  %v709_v5 = vpop.f32.mrf.mxu1 }
 0x274   :  { %1197 = vmatmul.bf16.gmra.mxu3 %v1097_v38  ;;  %v926_v32 = vmax.f32 %v894_v27, 0.0 }
 0x275   :  { %v788_v40 = vpop.f32.mrf.mxu2 }
 0x276   :  { %v789_v48 = vadd.f32 %v788_v40, %v5375_v36  ;;  %v958_v58 = vpack.c.bf16 %v926_v32, %v926_v32 }
 0x278   :  { %v859_v62 = vmul.f32 %v5292_v54, %v789_v48  ;;  %v1070_v29 = vunpack.c.l.b16 %v958_v58 }
 0x27a   :  { %v895_v0 = vadd.f32 %v5302_v63, %v859_v62  ;;  %v712_v48 = vpop.f32.mrf.mxu1 }
 0x27c   :  { %v927_v17 = vmax.f32 %v895_v0, 0.0 }
 0x27d   :  { %v791_v1 = vpop.f32.mrf.mxu2 }
 0x27e   :  { %v3971_v57 = vpack.c.bf16 %v927_v17, %v926_v32  ;;  %v792_v8 = vadd.f32 %v791_v1, %v5391_v35  ;;  %v959_v20 = vpack.c.bf16 %v927_v17, %v927_v17 }
 0x280   :  { %4351 = vst [vmem:[#allocation14 + $0x20] sm:$0xff] %v3971_v57   ;;  %v860_v21 = vmul.f32 %v5292_v54, %v792_v8  ;;  %v1071_v45 = vunpack.c.l.b16 %v959_v20 }
 0x282   :  { %v1098_v38 = vpack.c.b16 %v1071_v45, %v1070_v29  ;;  %v896_v36 = vadd.f32 %v5302_v63, %v860_v21  ;;  %v714_v29 = vpop.f32.mrf.mxu1 }
 0x284   :  { %1202 = vmatmul.bf16.gmra.mxu3 %v1098_v38  ;;  %v928_v62 = vmax.f32 %v896_v36, 0.0 }
 0x285   :  { %v793_v27 = vpop.f32.mrf.mxu2 }
 0x286   :  { %v794_v40 = vadd.f32 %v793_v27, %v704_v44  ;;  %v960_v35 = vpack.c.bf16 %v928_v62, %v928_v62 }
 0x288   :  { %v861_v0 = vmul.f32 %v5292_v54, %v794_v40  ;;  %v1072_v20 = vunpack.c.l.b16 %v960_v35 }
 0x28a   :  { %v897_v32 = vadd.f32 %v5302_v63, %v861_v0 }
 0x28c   :  { %v929_v56 = vmax.f32 %v897_v32, 0.0 }
 0x28d   :  { %v796_v17 = vpop.f32.mrf.mxu2 }
 0x28e   :  { %v3976_v1 = vpack.c.bf16 %v929_v56, %v928_v62  ;;  %v797_v57 = vadd.f32 %v796_v17, %v707_v24  ;;  %v961_v8 = vpack.c.bf16 %v929_v56, %v929_v56  ;;  %v717_v62 = vpop.f32.mrf.mxu1 }
 0x290   :  { %4352 = vst [vmem:[#allocation14 + $0x28] sm:$0xff] %v3976_v1   ;;  %v862_v58 = vmul.f32 %v5292_v54, %v797_v57  ;;  %v1073_v21 = vunpack.c.l.b16 %v961_v8 }
 0x292   :  { %v1099_v45 = vpack.c.b16 %v1073_v21, %v1072_v20  ;;  %v898_v44 = vadd.f32 %v5302_v63, %v862_v58 }
 0x294   :  { %1207 = vmatmul.bf16.gmra.mxu3 %v1099_v45  ;;  %v930_v27 = vmax.f32 %v898_v44, 0.0 }
 0x295   :  { %v798_v38 = vpop.f32.mrf.mxu2 }
 0x296   :  { %v799_v36 = vadd.f32 %v798_v38, %v709_v5  ;;  %v962_v56 = vpack.c.bf16 %v930_v27, %v930_v27  ;;  %v719_v45 = vpop.f32.mrf.mxu1 }
 0x298   :  { %v863_v40 = vmul.f32 %v5292_v54, %v799_v36  ;;  %v1074_v8 = vunpack.c.l.b16 %v962_v56 }
 0x29a   :  { %v899_v0 = vadd.f32 %v5302_v63, %v863_v40 }
 0x29c   :  { %v931_v24 = vmax.f32 %v899_v0, 0.0 }
 0x29d   :  { %v801_v32 = vpop.f32.mrf.mxu2 }
 0x29e   :  { %v3981_v17 = vpack.c.bf16 %v931_v24, %v930_v27  ;;  %v802_v1 = vadd.f32 %v801_v32, %v712_v48  ;;  %v963_v35 = vpack.c.bf16 %v931_v24, %v931_v24  ;;  %v722_v56 = vpop.f32.mrf.mxu1 }
 0x2a0   :  { %4353 = vst [vmem:[#allocation14 + $0x30] sm:$0xff] %v3981_v17   ;;  %v864_v57 = vmul.f32 %v5292_v54, %v802_v1  ;;  %v1075_v58 = vunpack.c.l.b16 %v963_v35 }
 0x2a2   :  { %v1100_v20 = vpack.c.b16 %v1075_v58, %v1074_v8  ;;  %v900_v5 = vadd.f32 %v5302_v63, %v864_v57 }
 0x2a4   :  { %1212 = vmatmul.bf16.gmra.mxu3 %v1100_v20  ;;  %v932_v38 = vmax.f32 %v900_v5, 0.0 }
 0x2a5   :  { %v803_v21 = vpop.f32.mrf.mxu2 }
 0x2a6   :  { %v804_v44 = vadd.f32 %v803_v21, %v714_v29  ;;  %v964_v48 = vpack.c.bf16 %v932_v38, %v932_v38 }
 0x2a8   :  { %v865_v36 = vmul.f32 %v5292_v54, %v804_v44  ;;  %v1076_v35 = vunpack.c.l.b16 %v964_v48  ;;  %v724_v44 = vpop.f32.mrf.mxu1 }
 0x2aa   :  { %v901_v40 = vadd.f32 %v5302_v63, %v865_v36 }
 0x2ac   :  { %v933_v27 = vmax.f32 %v901_v40, 0.0 }
 0x2ad   :  { %v806_v0 = vpop.f32.mrf.mxu2 }
 0x2ae   :  { %v3986_v24 = vpack.c.bf16 %v933_v27, %v932_v38  ;;  %v807_v32 = vadd.f32 %v806_v0, %v717_v62  ;;  %v965_v17 = vpack.c.bf16 %v933_v27, %v933_v27 }
 0x2b0   :  { %4354 = vst [vmem:[#allocation14 + $0x38] sm:$0xff] %v3986_v24   ;;  %v866_v1 = vmul.f32 %v5292_v54, %v807_v32  ;;  %v1077_v57 = vunpack.c.l.b16 %v965_v17 }
 0x2b2   :  { %v1101_v8 = vpack.c.b16 %v1077_v57, %v1076_v35  ;;  %v902_v29 = vadd.f32 %v5302_v63, %v866_v1  ;;  %v727_v35 = vpop.f32.mrf.mxu1 }
 0x2b4   :  { %1217 = vmatmul.bf16.gmra.mxu3 %v1101_v8  ;;  %v934_v5 = vmax.f32 %v902_v29, 0.0 }
 0x2b5   :  { %v808_v58 = vpop.f32.mrf.mxu2 }
 0x2b6   :  { %v809_v20 = vadd.f32 %v808_v58, %v719_v45  ;;  %v966_v36 = vpack.c.bf16 %v934_v5, %v934_v5 }
 0x2b8   :  { %v867_v21 = vmul.f32 %v5292_v54, %v809_v20  ;;  %v1078_v32 = vunpack.c.l.b16 %v966_v36 }
 0x2ba   :  { %v903_v38 = vadd.f32 %v5302_v63, %v867_v21 }
 0x2bc   :  { %v935_v62 = vmax.f32 %v903_v38, 0.0  ;;  %v729_v38 = vpop.f32.mrf.mxu1 }
 0x2bd   :  { %v811_v40 = vpop.f32.mrf.mxu2 }
 0x2be   :  { %v3991_v27 = vpack.c.bf16 %v935_v62, %v934_v5  ;;  %v812_v0 = vadd.f32 %v811_v40, %v722_v56  ;;  %v967_v24 = vpack.c.bf16 %v935_v62, %v935_v62 }
 0x2c0   :  { %4355 = vst [vmem:[#allocation14 + $0x40] sm:$0xff] %v3991_v27   ;;  %v868_v48 = vmul.f32 %v5292_v54, %v812_v0  ;;  %v1079_v17 = vunpack.c.l.b16 %v967_v24 }
 0x2c2   :  { %v1102_v1 = vpack.c.b16 %v1079_v17, %v1078_v32  ;;  %v904_v45 = vadd.f32 %v5302_v63, %v868_v48 }
 0x2c4   :  { %1222 = vmatmul.bf16.gmra.mxu3 %v1102_v1  ;;  %v936_v58 = vmax.f32 %v904_v45, 0.0 }
 0x2c5   :  { %v813_v57 = vpop.f32.mrf.mxu2 }
 0x2c6   :  { %v814_v8 = vadd.f32 %v813_v57, %v724_v44  ;;  %v968_v21 = vpack.c.bf16 %v936_v58, %v936_v58 }
 0x2c7   :  { %v5450_v29 = vpop.f32.mrf.mxu3 }
 0x2c8   :  { %v869_v20 = vmul.f32 %v5292_v54, %v814_v8  ;;  %v1080_v44 = vunpack.c.l.b16 %v968_v21  ;;  %v732_v8 = vpop.f32.mrf.mxu1 }
 0x2ca   :  { %v905_v56 = vadd.f32 %v5302_v63, %v869_v20 }
 0x2cc   :  { %v937_v5 = vmax.f32 %v905_v56, 0.0 }
 0x2cd   :  { %v816_v62 = vpop.f32.mrf.mxu2 }
 0x2ce   :  { %v3996_v36 = vpack.c.bf16 %v937_v5, %v936_v58  ;;  %v817_v40 = vadd.f32 %v816_v62, %v727_v35  ;;  %v969_v27 = vpack.c.bf16 %v937_v5, %v937_v5 }
 0x2cf   :  { %v5454_v0 = vpop.f32.mrf.mxu3 }
 0x2d0   :  { %4356 = vst [vmem:[#allocation14 + $0x48] sm:$0xff] %v3996_v36   ;;  %v870_v24 = vmul.f32 %v5292_v54, %v817_v40  ;;  %v1081_v48 = vunpack.c.l.b16 %v969_v27 }
 0x2d2   :  { %v1103_v17 = vpack.c.b16 %v1081_v48, %v1080_v44  ;;  %v906_v1 = vadd.f32 %v5302_v63, %v870_v24 }
 0x2d4   :  { %1227 = vmatmul.bf16.gmra.mxu3 %v1103_v17  ;;  %v938_v35 = vmax.f32 %v906_v1, 0.0  ;;  %v734_v1 = vpop.f32.mrf.mxu1 }
 0x2d5   :  { %v818_v45 = vpop.f32.mrf.mxu2 }
 0x2d6   :  { %v819_v57 = vadd.f32 %v818_v45, %v729_v38  ;;  %v970_v21 = vpack.c.bf16 %v938_v35, %v938_v35 }
 0x2d7   :  { %v5460_v58 = vpop.f32.mrf.mxu3 }
 0x2d8   :  { %v871_v20 = vmul.f32 %v5292_v54, %v819_v57  ;;  %v1082_v38 = vunpack.c.l.b16 %v970_v21 }
 0x2da   :  { %v907_v56 = vadd.f32 %v5302_v63, %v871_v20 }
 0x2dc   :  { %v939_v5 = vmax.f32 %v907_v56, 0.0 }
 0x2dd   :  { %v821_v62 = vpop.f32.mrf.mxu2 }
 0x2de   :  { %v4001_v36 = vpack.c.bf16 %v939_v5, %v938_v35  ;;  %v822_v40 = vadd.f32 %v821_v62, %v732_v8  ;;  %v971_v27 = vpack.c.bf16 %v939_v5, %v939_v5 }
 0x2df   :  { %v5464_v44 = vpop.f32.mrf.mxu3 }
 0x2e0   :  { %4357 = vst [vmem:[#allocation14 + $0x50] sm:$0xff] %v4001_v36   ;;  %v872_v24 = vmul.f32 %v5292_v54, %v822_v40  ;;  %v1083_v48 = vunpack.c.l.b16 %v971_v27  ;;  %v737_v36 = vpop.f32.mrf.mxu1 }
 0x2e2   :  { %v1104_v45 = vpack.c.b16 %v1083_v48, %v1082_v38  ;;  %v908_v57 = vadd.f32 %v5302_v63, %v872_v24 }
 0x2e4   :  { %1232 = vmatmul.bf16.gmra.mxu3 %v1104_v45  ;;  %v940_v8 = vmax.f32 %v908_v57, 0.0 }
 0x2e5   :  { %v823_v20 = vpop.f32.mrf.mxu2 }
 0x2e6   :  { %v824_v56 = vadd.f32 %v823_v20, %v734_v1  ;;  %v972_v21 = vpack.c.bf16 %v940_v8, %v940_v8 }
 0x2e7   :  { %v1193_v35 = vpop.f32.mrf.mxu3 }
 0x2e8   :  { %v873_v5 = vmul.f32 %v5292_v54, %v824_v56  ;;  %v1084_v38 = vunpack.c.l.b16 %v972_v21  ;;  %v739_v20 = vpop.f32.mrf.mxu1 }
 0x2ea   :  { %v909_v62 = vadd.f32 %v5302_v63, %v873_v5 }
 0x2ec   :  { %v941_v40 = vmax.f32 %v909_v62, 0.0 }
 0x2ed   :  { %v826_v27 = vpop.f32.mrf.mxu2 }
 0x2ee   :  { %v4006_v32 = vpack.c.bf16 %v941_v40, %v940_v8  ;;  %v827_v7 = vadd.f32 %v826_v27, %v737_v36  ;;  %v973_v17 = vpack.c.bf16 %v941_v40, %v941_v40 }
 0x2ef   :  { %v1195_v41 = vpop.f32.mrf.mxu3 }
 0x2f0   :  { %4358 = vst [vmem:[#allocation14 + $0x58] sm:$0xff] %v4006_v32   ;;  %v874_v24 = vmul.f32 %v5292_v54, %v827_v7  ;;  %v1085_v48 = vunpack.c.l.b16 %v973_v17  ;;  %v1265_v1 = vpack.c.bf16 %v1195_v41, %v1193_v35 }
 0x2f2   :  { %v1105_v45 = vpack.c.b16 %v1085_v48, %v1084_v38  ;;  %v910_v57 = vadd.f32 %v5302_v63, %v874_v24 }
 0x2f4   :  { %1237 = vmatmul.bf16.gmra.mxu3 %v1105_v45  ;;  %v942_v55 = vmax.f32 %v910_v57, 0.0  ;;  %v6356_v45 = vpack.c.b16 %v5372_v18, %v5363_v19 }
 0x2f5   :  { %v828_v56 = vpop.f32.mrf.mxu2 }
 0x2f6   :  { %v829_v5 = vadd.f32 %v828_v56, %v739_v20  ;;  %v974_v32 = vpack.c.bf16 %v942_v55, %v942_v55  ;;  %v6358_v56 = vpack.c.b16 %v5423_v53, %v5421_v59  ;;  %v6360_v59 = vpack.c.bf16 %v5454_v0, %v5450_v29 }
 0x2f7   :  { %v1198_v62 = vpop.f32.mrf.mxu3 }
 0x2f8   :  { %v875_v8 = vmul.f32 %v5292_v54, %v829_v5  ;;  %v1086_v41 = vunpack.c.l.b16 %v974_v32 }
 0x2fa   :  { %v911_v36 = vadd.f32 %v5302_v63, %v875_v8  ;;  %v6357_v63 = vpack.c.b16 %v5403_v26, %v5394_v39  ;;  %v6359_v26 = vpack.c.bf16 %v5464_v44, %v5460_v58 }
 0x2fc   :  { %v943_v40 = vmax.f32 %v911_v36, 0.0 }
 0x2fe   :  { %v4011_v27 = vpack.c.bf16 %v943_v40, %v942_v55  ;;  %v975_v7 = vpack.c.bf16 %v943_v40, %v943_v40 }
 0x2ff   :  { %v1200_v21 = vpop.f32.mrf.mxu3 }
 0x300   :  { %4359 = vst [vmem:[#allocation14 + $0x60] sm:$0xff] %v4011_v27   ;;  %v1087_v17 = vunpack.c.l.b16 %v975_v7  ;;  %v1266_v35 = vpack.c.bf16 %v1200_v21, %v1198_v62 }
 0x301   :  { %3397 = dma.vmem_to_hbm [thread:$0]  %s3390_s6, 2048, %s3392_s21, [#allocation4], %s4859_s3, %s4859_s3, %s4860_s25  }
 0x302   :  { %v1106_v24 = vpack.c.b16 %v1087_v17, %v1086_v41 }
 0x304   :  { %1242 = vmatmul.bf16.gmra.mxu3 %v1106_v24 }
 0x307   :  { %v1203_v38 = vpop.f32.mrf.mxu3 }
 0x30f   :  { %v1205_v48 = vpop.f32.mrf.mxu3 }
 0x310   :  { %v1267_v40 = vpack.c.bf16 %v1205_v48, %v1203_v38 }
 0x314   :  { %1247 = vmatmul.bf16.gmra.mxu3 %v6356_v45 }
 0x317   :  { %v1208_v54 = vpop.f32.mrf.mxu3 }
 0x31f   :  { %v1210_v57 = vpop.f32.mrf.mxu3 }
 0x320   :  { %v1268_v18 = vpack.c.bf16 %v1210_v57, %v1208_v54 }
 0x324   :  { %1252 = vmatmul.bf16.gmra.mxu3 %v6357_v63 }
 0x327   :  { %v1213_v55 = vpop.f32.mrf.mxu3 }
 0x32f   :  { %v1215_v20 = vpop.f32.mrf.mxu3 }
 0x330   :  { %v1269_v36 = vpack.c.bf16 %v1215_v20, %v1213_v55 }
 0x334   :  { %1257 = vmatmul.bf16.gmra.mxu3 %v6358_v56 }
 0x337   :  { %v1218_v5 = vpop.f32.mrf.mxu3 }
 0x33f   :  { %v1220_v62 = vpop.f32.mrf.mxu3 }
 0x340   :  { %v1270_v8 = vpack.c.bf16 %v1220_v62, %v1218_v5  ;;  %v3931_v5 = vld [vmem:[#allocation8 + $0x38] sm:$0xff]  ;;  %v3930_v62 = vld [vmem:[#allocation8 + $0x30] sm:$0xff] }
 0x341   :  { %1785 = vmatpush.bf16.msrb.mxu2 %v3931_v5 }
 0x342   :  { %1279 = vmatpush.bf16.msrb.mxu0 %v1270_v8 }
 0x345   :  { %1786 = vmatpush.bf16.msrb.mxu2 %v3930_v62 }
 0x346   :  { %1280 = vmatpush.bf16.msrb.mxu0 %v1269_v36  ;;  %v3929_v36 = vld [vmem:[#allocation8 + $0x28] sm:$0xff] }
 0x347   :  { %v1223_v19 = vpop.f32.mrf.mxu3 }
 0x349   :  { %1787 = vmatpush.bf16.msrb.mxu2 %v3929_v36 }
 0x34a   :  { %1281 = vmatpush.bf16.msrb.mxu0 %v1268_v18  ;;  %v3927_v18 = vld [vmem:[#allocation8 + $0x18] sm:$0xff] }
 0x34e   :  { %1282 = vmatpush.bf16.msrb.mxu0 %v1267_v40 }
 0x34f   :  { %v1225_v32 = vpop.f32.mrf.mxu3 }
 0x350   :  { %v1271_v20 = vpack.c.bf16 %v1225_v32, %v1223_v19  ;;  %v3928_v19 = vld [vmem:[#allocation8 + $0x20] sm:$0xff]  ;;  %v3926_v32 = vld [vmem:[#allocation8 + $0x10] sm:$0xff] }
 0x351   :  { %1788 = vmatpush.bf16.msrb.mxu2 %v3928_v19 }
 0x352   :  { %1283 = vmatpush.bf16.msrb.mxu0 %v1266_v35 }
 0x355   :  { %1789 = vmatpush.bf16.msrb.mxu2 %v3927_v18 }
 0x356   :  { %1284 = vmatpush.bf16.msrb.mxu0 %v1265_v1 }
 0x357   :  { %v1228_v39 = vpop.f32.mrf.mxu3 }
 0x359   :  { %1790 = vmatpush.bf16.msrb.mxu2 %v3926_v32 }
 0x35a   :  { %1285 = vmatpush.bf16.msrb.mxu0 %v6359_v26 }
 0x35e   :  { %1286 = vmatpush.bf16.msrb.mxu0 %v6360_v59  ;;  %v3924_v59 = vld [vmem:[#allocation8] sm:$0xff] }
 0x35f   :  { %v1230_v53 = vpop.f32.mrf.mxu3 }
 0x360   :  { %v1272_v55 = vpack.c.bf16 %v1230_v53, %v1228_v39  ;;  %v3925_v39 = vld [vmem:[#allocation8 + $0x8] sm:$0xff] }
 0x361   :  { %1287 = vmatmul.bf16.vlgmr.msrb.gmra.mxu0 %v5050_v3  ;;  %1791 = vmatpush.bf16.msrb.mxu2 %v3925_v39 }
 0x365   :  { %1792 = vmatpush.bf16.msrb.mxu2 %v3924_v59 }
 0x367   :  { %v1233_v27 = vpop.f32.mrf.mxu3 }
 0x36f   :  { %v1235_v7 = vpop.f32.mrf.mxu3 }
 0x370   :  { %v1273_v63 = vpack.c.bf16 %v1235_v7, %v1233_v27  ;;  %v5516_v27 = vld [vmem:[%s6361_s24] ss:$0 sm:$0xff] }
 0x371   :  { %1292 = vmatmul.bf16.gmra.mxu0 %v5068_v11 }
 0x377   :  { %v1238_v21 = vpop.f32.mrf.mxu3 }
 0x37f   :  { %v1240_v41 = vpop.f32.mrf.mxu3 }
 0x380   :  { %v1274_v57 = vpack.c.bf16 %v1240_v41, %v1238_v21 }
 0x381   :  { %1297 = vmatmul.bf16.gmra.mxu0 %v5092_v23 }
 0x387   :  { %v1243_v1 = vpop.f32.mrf.mxu3 }
 0x38f   :  { %v1245_v17 = vpop.f32.mrf.mxu3 }
 0x390   :  { %v1275_v54 = vpack.c.bf16 %v1245_v17, %v1243_v1  ;;  %v5523_v17 = vld [vmem:[%s6362_s28] ss:$0 sm:$0xff]  ;;  %s3402_s28 = sshll.u32 %s4871_s7, 4  ;;  %s3403_s28 = int_to_ptr.vmem [resolvable:$true] %s3402_s28 }
 0x391   :  { %1302 = vmatmul.bf16.gmra.mxu0 %v5120_v33 }
 0x397   :  { %v1248_v58 = vpop.f32.mrf.mxu3 }
 0x39f   :  { %v1250_v44 = vpop.f32.mrf.mxu3 }
 0x3a0   :  { %v1276_v45 = vpack.c.bf16 %v1250_v44, %v1248_v58 }
 0x3a1   :  { %1307 = vmatmul.bf16.gmra.mxu0 %v5147_v42 }
 0x3a7   :  { %v1253_v29 = vpop.f32.mrf.mxu3 }
 0x3af   :  { %v1255_v0 = vpop.f32.mrf.mxu3 }
 0x3b0   :  { %v1277_v48 = vpack.c.bf16 %v1255_v0, %v1253_v29 }
 0x3b1   :  { %1312 = vmatmul.bf16.gmra.mxu0 %v5174_v51 }
 0x3b7   :  { %v1258_v35 = vpop.f32.mrf.mxu3 }
 0x3bf   :  { %v1260_v24 = vpop.f32.mrf.mxu3 }
 0x3c0   :  { %v1278_v38 = vpack.c.bf16 %v1260_v24, %v1258_v35 }
 0x3c1   :  { %1317 = vmatmul.bf16.gmra.mxu0 %v5201_v60 }
 0x3c2   :  { %1368 = vmatpush.bf16.msrb.mxu1 %v1278_v38 }
 0x3c6   :  { %1369 = vmatpush.bf16.msrb.mxu1 %v1277_v48 }
 0x3ca   :  { %1370 = vmatpush.bf16.msrb.mxu1 %v1276_v45 }
 0x3ce   :  { %1371 = vmatpush.bf16.msrb.mxu1 %v1275_v54 }
 0x3d1   :  { %1322 = vmatmul.bf16.gmra.mxu0 %v5219_v2 }
 0x3d2   :  { %1372 = vmatpush.bf16.msrb.mxu1 %v1274_v57 }
 0x3d6   :  { %1373 = vmatpush.bf16.msrb.mxu1 %v1273_v63 }
 0x3da   :  { %1374 = vmatpush.bf16.msrb.mxu1 %v1272_v55 }
 0x3de   :  { %1375 = vmatpush.bf16.msrb.mxu1 %v1271_v20  ;;  %v1288_v56 = vpop.f32.mrf.mxu0 }
 0x3e1   :  { %1376 = vmatmul.bf16.vlgmr.msrb.gmra.mxu1 %v5095_v25  ;;  %1327 = vmatmul.bf16.gmra.mxu0 %v5237_v13 }
 0x3e6   :  { %v1290_v8 = vpop.f32.mrf.mxu0 }
 0x3ee   :  { %v1293_v40 = vpop.f32.mrf.mxu0 }
 0x3f1   :  { %1381 = vmatmul.bf16.gmra.mxu1 %v5122_v34  ;;  %1332 = vmatmul.bf16.gmra.mxu0 %v5259_v31 }
 0x3f6   :  { %v1295_v26 = vpop.f32.mrf.mxu0 }
 0x3fe   :  { %v1298_v53 = vpop.f32.mrf.mxu0 }
 0x401   :  { %1386 = vmatmul.bf16.gmra.mxu1 %v5149_v43  ;;  %1337 = vmatmul.bf16.gmra.mxu0 %v5283_v50 }
 0x406   :  { %v1300_v21 = vpop.f32.mrf.mxu0 }
 0x40e   :  { %v1303_v29 = vpop.f32.mrf.mxu0 }
 0x411   :  { %1391 = vmatmul.bf16.gmra.mxu1 %v5176_v52  ;;  %1342 = vmatmul.bf16.gmra.mxu0 %v5319_v14 }
 0x416   :  { %v1305_v57 = vpop.f32.mrf.mxu0 }
 0x41e   :  { %v1308_v18 = vpop.f32.mrf.mxu0 }
 0x421   :  { %1396 = vmatmul.bf16.gmra.mxu1 %v5203_v61  ;;  %1347 = vmatmul.bf16.gmra.mxu0 %v5349_v22 }
 0x431   :  { %1401 = vmatmul.bf16.gmra.mxu1 %v5221_v4  ;;  %1352 = vmatmul.bf16.gmra.mxu0 %v5059_v6 }
 0x441   :  { %1406 = vmatmul.bf16.gmra.mxu1 %v5239_v15  ;;  %1357 = vmatmul.bf16.gmra.mxu0 %v5077_v16 }
 0x451   :  { %1411 = vmatmul.bf16.gmra.mxu1 %v5257_v30  ;;  %1362 = vmatmul.bf16.gmra.mxu0 %v5105_v28 }
 0x45e   :  { %v1377_v7 = vpop.f32.mrf.mxu1 }
 0x45f   :  { %v1378_v41 = vadd.f32 %v1377_v7, %v1288_v56 }
 0x461   :  { %v1461_v1 = vmul.f32 %v5516_v27, %v1378_v41  ;;  %1416 = vmatmul.bf16.gmra.mxu1 %v5281_v49 }
 0x463   :  { %v1497_v58 = vadd.f32 %v5523_v17, %v1461_v1 }
 0x465   :  { %v1529_v35 = vmax.f32 %v1497_v58, 0.0  ;;  %v1310_v58 = vpop.f32.mrf.mxu0 }
 0x466   :  { %v1379_v44 = vpop.f32.mrf.mxu1 }
 0x467   :  { %v1380_v0 = vadd.f32 %v1379_v44, %v1290_v8  ;;  %v1561_v48 = vpack.c.bf16 %v1529_v35, %v1529_v35 }
 0x469   :  { %v1462_v24 = vmul.f32 %v5516_v27, %v1380_v0  ;;  %v1673_v56 = vunpack.c.l.b16 %v1561_v48 }
 0x46b   :  { %v1498_v38 = vadd.f32 %v5523_v17, %v1462_v24 }
 0x46d   :  { %v1530_v45 = vmax.f32 %v1498_v38, 0.0 }
 0x46e   :  { %v1382_v54 = vpop.f32.mrf.mxu1 }
 0x46f   :  { %v1562_v63 = vpack.c.bf16 %v1530_v45, %v1530_v45  ;;  %v4031_v55 = vpack.c.bf16 %v1530_v45, %v1529_v35  ;;  %v1383_v20 = vadd.f32 %v1382_v54, %v1293_v40 }
 0x471   :  { %4032 = vst [vmem:[#allocation15] sm:$0xff] %v4031_v55   ;;  %v1674_v5 = vunpack.c.l.b16 %v1562_v63  ;;  %v1463_v62 = vmul.f32 %v5516_v27, %v1383_v20  ;;  %1421 = vmatmul.bf16.gmra.mxu1 %v5317_v12  ;;  %v1313_v63 = vpop.f32.mrf.mxu0 }
 0x473   :  { %v1705_v8 = vpack.c.b16 %v1674_v5, %v1673_v56  ;;  %v1499_v36 = vadd.f32 %v5523_v17, %v1463_v62 }
 0x475   :  { %1793 = vmatmul.bf16.vlgmr.msrb.gmra.mxu2 %v1705_v8  ;;  %v1531_v39 = vmax.f32 %v1499_v36, 0.0 }
 0x476   :  { %v1384_v19 = vpop.f32.mrf.mxu1 }
 0x477   :  { %v1385_v32 = vadd.f32 %v1384_v19, %v1295_v26  ;;  %v1563_v41 = vpack.c.bf16 %v1531_v39, %v1531_v39 }
 0x479   :  { %v1464_v59 = vmul.f32 %v5516_v27, %v1385_v32  ;;  %v1675_v38 = vunpack.c.l.b16 %v1563_v41  ;;  %v1315_v36 = vpop.f32.mrf.mxu0 }
 0x47b   :  { %v1500_v7 = vadd.f32 %v5523_v17, %v1464_v59 }
 0x47d   :  { %v1532_v40 = vmax.f32 %v1500_v7, 0.0 }
 0x47e   :  { %v1387_v1 = vpop.f32.mrf.mxu1 }
 0x47f   :  { %v4036_v44 = vpack.c.bf16 %v1532_v40, %v1531_v39  ;;  %v1388_v0 = vadd.f32 %v1387_v1, %v1298_v53  ;;  %v1564_v35 = vpack.c.bf16 %v1532_v40, %v1532_v40 }
 0x481   :  { %4363 = vst [vmem:[#allocation15 + $0x8] sm:$0xff] %v4036_v44   ;;  %v1465_v24 = vmul.f32 %v5516_v27, %v1388_v0  ;;  %1426 = vmatmul.bf16.gmra.mxu1 %v5346_v10  ;;  %v1676_v48 = vunpack.c.l.b16 %v1564_v35  ;;  %v1318_v0 = vpop.f32.mrf.mxu0 }
 0x483   :  { %v1706_v26 = vpack.c.b16 %v1676_v48, %v1675_v38  ;;  %v1501_v45 = vadd.f32 %v5523_v17, %v1465_v24 }
 0x485   :  { %1798 = vmatmul.bf16.gmra.mxu2 %v1706_v26  ;;  %v1533_v20 = vmax.f32 %v1501_v45, 0.0 }
 0x486   :  { %v1389_v54 = vpop.f32.mrf.mxu1 }
 0x487   :  { %v1390_v55 = vadd.f32 %v1389_v54, %v1300_v21  ;;  %v1565_v62 = vpack.c.bf16 %v1533_v20, %v1533_v20 }
 0x489   :  { %v1466_v56 = vmul.f32 %v5516_v27, %v1390_v55  ;;  %v1677_v7 = vunpack.c.l.b16 %v1565_v62 }
 0x48b   :  { %v1502_v53 = vadd.f32 %v5523_v17, %v1466_v56 }
 0x48d   :  { %v1534_v5 = vmax.f32 %v1502_v53, 0.0 }
 0x48e   :  { %v1392_v8 = vpop.f32.mrf.mxu1 }
 0x48f   :  { %v4041_v19 = vpack.c.bf16 %v1534_v5, %v1533_v20  ;;  %v1393_v32 = vadd.f32 %v1392_v8, %v1303_v29  ;;  %v1566_v39 = vpack.c.bf16 %v1534_v5, %v1534_v5 }
 0x491   :  { %4364 = vst [vmem:[#allocation15 + $0x10] sm:$0xff] %v4041_v19   ;;  %v1467_v59 = vmul.f32 %v5516_v27, %v1393_v32  ;;  %1431 = vmatmul.bf16.gmra.mxu1 %v5380_v47  ;;  %v1678_v40 = vunpack.c.l.b16 %v1566_v39 }
 0x493   :  { %v1707_v21 = vpack.c.b16 %v1678_v40, %v1677_v7  ;;  %v1503_v41 = vadd.f32 %v5523_v17, %v1467_v59 }
 0x495   :  { %1803 = vmatmul.bf16.gmra.mxu2 %v1707_v21  ;;  %v1535_v35 = vmax.f32 %v1503_v41, 0.0 }
 0x496   :  { %v1394_v1 = vpop.f32.mrf.mxu1 }
 0x497   :  { %v1395_v44 = vadd.f32 %v1394_v1, %v1305_v57  ;;  %v1567_v48 = vpack.c.bf16 %v1535_v35, %v1535_v35  ;;  %v1320_v57 = vpop.f32.mrf.mxu0 }
 0x499   :  { %v1468_v24 = vmul.f32 %v5516_v27, %v1395_v44  ;;  %v1679_v56 = vunpack.c.l.b16 %v1567_v48 }
 0x49b   :  { %v1504_v29 = vadd.f32 %v5523_v17, %v1468_v24 }
 0x49d   :  { %v1536_v38 = vmax.f32 %v1504_v29, 0.0 }
 0x49e   :  { %v1397_v26 = vpop.f32.mrf.mxu1 }
 0x49f   :  { %v4046_v45 = vpack.c.bf16 %v1536_v38, %v1535_v35  ;;  %v1398_v54 = vadd.f32 %v1397_v26, %v1308_v18  ;;  %v1568_v55 = vpack.c.bf16 %v1536_v38, %v1536_v38  ;;  %v1323_v59 = vpop.f32.mrf.mxu0 }
 0x4a1   :  { %4365 = vst [vmem:[#allocation15 + $0x18] sm:$0xff] %v4046_v45   ;;  %v1469_v20 = vmul.f32 %v5516_v27, %v1398_v54  ;;  %1436 = vmatmul.bf16.gmra.mxu1 %v5409_v9  ;;  %v1680_v53 = vunpack.c.l.b16 %v1568_v55 }
 0x4a3   :  { %v1708_v5 = vpack.c.b16 %v1680_v53, %v1679_v56  ;;  %v1505_v62 = vadd.f32 %v5523_v17, %v1469_v20 }
 0x4a5   :  { %1808 = vmatmul.bf16.gmra.mxu2 %v1708_v5  ;;  %v1537_v32 = vmax.f32 %v1505_v62, 0.0 }
 0x4a6   :  { %v1399_v8 = vpop.f32.mrf.mxu1 }
 0x4a7   :  { %v1400_v19 = vadd.f32 %v1399_v8, %v1310_v58  ;;  %v1569_v40 = vpack.c.bf16 %v1537_v32, %v1537_v32  ;;  %v1325_v26 = vpop.f32.mrf.mxu0 }
 0x4a9   :  { %v1470_v39 = vmul.f32 %v5516_v27, %v1400_v19  ;;  %v1681_v24 = vunpack.c.l.b16 %v1569_v40 }
 0x4ab   :  { %v1506_v18 = vadd.f32 %v5523_v17, %v1470_v39 }
 0x4ad   :  { %v1538_v7 = vmax.f32 %v1506_v18, 0.0 }
 0x4ae   :  { %v1402_v21 = vpop.f32.mrf.mxu1 }
 0x4af   :  { %v4051_v41 = vpack.c.bf16 %v1538_v7, %v1537_v32  ;;  %v1403_v1 = vadd.f32 %v1402_v21, %v1313_v63  ;;  %v1570_v44 = vpack.c.bf16 %v1538_v7, %v1538_v7  ;;  %v1328_v19 = vpop.f32.mrf.mxu0 }
 0x4b1   :  { %4366 = vst [vmem:[#allocation15 + $0x20] sm:$0xff] %v4051_v41   ;;  %v1471_v35 = vmul.f32 %v5516_v27, %v1403_v1  ;;  %1441 = vmatmul.bf16.gmra.mxu1 %v5132_v37  ;;  %v1682_v29 = vunpack.c.l.b16 %v1570_v44 }
 0x4b3   :  { %v1709_v58 = vpack.c.b16 %v1682_v29, %v1681_v24  ;;  %v1507_v38 = vadd.f32 %v5523_v17, %v1471_v35 }
 0x4b5   :  { %1813 = vmatmul.bf16.gmra.mxu2 %v1709_v58  ;;  %v1539_v54 = vmax.f32 %v1507_v38, 0.0 }
 0x4b6   :  { %v1404_v48 = vpop.f32.mrf.mxu1 }
 0x4b7   :  { %v1405_v45 = vadd.f32 %v1404_v48, %v1315_v36  ;;  %v1571_v56 = vpack.c.bf16 %v1539_v54, %v1539_v54  ;;  %v1330_v44 = vpop.f32.mrf.mxu0 }
 0x4b9   :  { %v1472_v55 = vmul.f32 %v5516_v27, %v1405_v45  ;;  %v1683_v39 = vunpack.c.l.b16 %v1571_v56 }
 0x4bb   :  { %v1508_v63 = vadd.f32 %v5523_v17, %v1472_v55 }
 0x4bd   :  { %v1540_v20 = vmax.f32 %v1508_v63, 0.0 }
 0x4be   :  { %v1407_v53 = vpop.f32.mrf.mxu1 }
 0x4bf   :  { %v4056_v5 = vpack.c.bf16 %v1540_v20, %v1539_v54  ;;  %v1408_v62 = vadd.f32 %v1407_v53, %v1318_v0  ;;  %v1572_v8 = vpack.c.bf16 %v1540_v20, %v1540_v20  ;;  %v6363_v54 = vld [vmem:[#allocation32_spill] sm:$0xff]  ;;  %v1333_v20 = vpop.f32.mrf.mxu0 }
 0x4c1   :  { %4367 = vst [vmem:[#allocation15 + $0x28] sm:$0xff] %v4056_v5   ;;  %v1473_v32 = vmul.f32 %v5516_v27, %v1408_v62  ;;  %1446 = vmatmul.bf16.gmra.mxu1 %v5159_v46  ;;  %v1684_v18 = vunpack.c.l.b16 %v1572_v8 }
 0x4c3   :  { %v1710_v36 = vpack.c.b16 %v1684_v18, %v1683_v39  ;;  %v1509_v7 = vadd.f32 %v5523_v17, %v1473_v32 }
 0x4c5   :  { %1818 = vmatmul.bf16.gmra.mxu2 %v1710_v36  ;;  %v1541_v41 = vmax.f32 %v1509_v7, 0.0 }
 0x4c6   :  { %v1409_v40 = vpop.f32.mrf.mxu1 }
 0x4c7   :  { %v1410_v21 = vadd.f32 %v1409_v40, %v1320_v57  ;;  %v1573_v24 = vpack.c.bf16 %v1541_v41, %v1541_v41  ;;  %v1335_v36 = vpop.f32.mrf.mxu0 }
 0x4c9   :  { %v1474_v1 = vmul.f32 %v5516_v27, %v1410_v21  ;;  %v1685_v55 = vunpack.c.l.b16 %v1573_v24 }
 0x4cb   :  { %v1510_v0 = vadd.f32 %v5523_v17, %v1474_v1 }
 0x4cd   :  { %v1542_v35 = vmax.f32 %v1510_v0, 0.0 }
 0x4ce   :  { %v1412_v29 = vpop.f32.mrf.mxu1 }
 0x4cf   :  { %v4061_v58 = vpack.c.bf16 %v1542_v35, %v1541_v41  ;;  %v1413_v38 = vadd.f32 %v1412_v29, %v1323_v59  ;;  %v1574_v48 = vpack.c.bf16 %v1542_v35, %v1542_v35 }
 0x4d1   :  { %4368 = vst [vmem:[#allocation15 + $0x30] sm:$0xff] %v4061_v58   ;;  %v1475_v45 = vmul.f32 %v5516_v27, %v1413_v38  ;;  %1451 = vmatmul.bf16.gmra.mxu1 %v6363_v54  ;;  %v1686_v63 = vunpack.c.l.b16 %v1574_v48  ;;  %v1338_v58 = vpop.f32.mrf.mxu0 }
 0x4d3   :  { %v1711_v57 = vpack.c.b16 %v1686_v63, %v1685_v55  ;;  %v1511_v56 = vadd.f32 %v5523_v17, %v1475_v45 }
 0x4d5   :  { %1823 = vmatmul.bf16.gmra.mxu2 %v1711_v57  ;;  %v1543_v62 = vmax.f32 %v1511_v56, 0.0 }
 0x4d6   :  { %v1414_v53 = vpop.f32.mrf.mxu1 }
 0x4d7   :  { %v1415_v5 = vadd.f32 %v1414_v53, %v1325_v26  ;;  %v1575_v39 = vpack.c.bf16 %v1543_v62, %v1543_v62 }
 0x4d9   :  { %v1476_v8 = vmul.f32 %v5516_v27, %v1415_v5  ;;  %v1687_v1 = vunpack.c.l.b16 %v1575_v39 }
 0x4db   :  { %v1512_v59 = vadd.f32 %v5523_v17, %v1476_v8 }
 0x4dd   :  { %v1544_v32 = vmax.f32 %v1512_v59, 0.0  ;;  %v1340_v59 = vpop.f32.mrf.mxu0 }
 0x4de   :  { %v1417_v18 = vpop.f32.mrf.mxu1 }
 0x4df   :  { %v4066_v7 = vpack.c.bf16 %v1544_v32, %v1543_v62  ;;  %v1418_v40 = vadd.f32 %v1417_v18, %v1328_v19  ;;  %v1576_v21 = vpack.c.bf16 %v1544_v32, %v1544_v32 }
 0x4e1   :  { %4369 = vst [vmem:[#allocation15 + $0x38] sm:$0xff] %v4066_v7   ;;  %v1477_v41 = vmul.f32 %v5516_v27, %v1418_v40  ;;  %v1688_v0 = vunpack.c.l.b16 %v1576_v21 }
 0x4e3   :  { %v1712_v35 = vpack.c.b16 %v1688_v0, %v1687_v1  ;;  %v1513_v26 = vadd.f32 %v5523_v17, %v1477_v41 }
 0x4e5   :  { %1828 = vmatmul.bf16.gmra.mxu2 %v1712_v35  ;;  %v1545_v38 = vmax.f32 %v1513_v26, 0.0  ;;  %v1343_v41 = vpop.f32.mrf.mxu0 }
 0x4e6   :  { %v1419_v24 = vpop.f32.mrf.mxu1 }
 0x4e7   :  { %v1420_v29 = vadd.f32 %v1419_v24, %v1330_v44  ;;  %v1577_v19 = vpack.c.bf16 %v1545_v38, %v1545_v38 }
 0x4e9   :  { %v1478_v48 = vmul.f32 %v5516_v27, %v1420_v29  ;;  %v1689_v62 = vunpack.c.l.b16 %v1577_v19 }
 0x4eb   :  { %v1514_v45 = vadd.f32 %v5523_v17, %v1478_v48 }
 0x4ed   :  { %v1546_v55 = vmax.f32 %v1514_v45, 0.0 }
 0x4ee   :  { %v1422_v63 = vpop.f32.mrf.mxu1 }
 0x4ef   :  { %v4071_v57 = vpack.c.bf16 %v1546_v55, %v1545_v38  ;;  %v1423_v56 = vadd.f32 %v1422_v63, %v1333_v20  ;;  %v1578_v53 = vpack.c.bf16 %v1546_v55, %v1546_v55 }
 0x4f1   :  { %4370 = vst [vmem:[#allocation15 + $0x40] sm:$0xff] %v4071_v57   ;;  %v1479_v5 = vmul.f32 %v5516_v27, %v1423_v56  ;;  %v1690_v8 = vunpack.c.l.b16 %v1578_v53  ;;  %v1345_v56 = vpop.f32.mrf.mxu0 }
 0x4f3   :  { %v1713_v32 = vpack.c.b16 %v1690_v8, %v1689_v62  ;;  %v1515_v44 = vadd.f32 %v5523_v17, %v1479_v5 }
 0x4f5   :  { %1833 = vmatmul.bf16.gmra.mxu2 %v1713_v32  ;;  %v1547_v40 = vmax.f32 %v1515_v44, 0.0 }
 0x4f6   :  { %v1424_v39 = vpop.f32.mrf.mxu1 }
 0x4f7   :  { %v1425_v18 = vadd.f32 %v1424_v39, %v1335_v36  ;;  %v1579_v0 = vpack.c.bf16 %v1547_v40, %v1547_v40 }
 0x4f8   :  { %v5571_v7 = vpop.f32.mrf.mxu2 }
 0x4f9   :  { %v1480_v21 = vmul.f32 %v5516_v27, %v1425_v18  ;;  %v1691_v45 = vunpack.c.l.b16 %v1579_v0 }
 0x4fb   :  { %v1516_v20 = vadd.f32 %v5523_v17, %v1480_v21 }
 0x4fd   :  { %v1548_v1 = vmax.f32 %v1516_v20, 0.0 }
 0x4fe   :  { %v1427_v35 = vpop.f32.mrf.mxu1 }
 0x4ff   :  { %v4076_v26 = vpack.c.bf16 %v1548_v1, %v1547_v40  ;;  %v1428_v24 = vadd.f32 %v1427_v35, %v1338_v58  ;;  %v1580_v29 = vpack.c.bf16 %v1548_v1, %v1548_v1  ;;  %v1348_v1 = vpop.f32.mrf.mxu0 }
 0x500   :  { %v5575_v38 = vpop.f32.mrf.mxu2 }
 0x501   :  { %4371 = vst [vmem:[#allocation15 + $0x48] sm:$0xff] %v4076_v26   ;;  %v1481_v48 = vmul.f32 %v5516_v27, %v1428_v24  ;;  %v1692_v55 = vunpack.c.l.b16 %v1580_v29 }
 0x503   :  { %v1714_v19 = vpack.c.b16 %v1692_v55, %v1691_v45  ;;  %v1517_v63 = vadd.f32 %v5523_v17, %v1481_v48 }
 0x505   :  { %1838 = vmatmul.bf16.gmra.mxu2 %v1714_v19  ;;  %v1549_v58 = vmax.f32 %v1517_v63, 0.0 }
 0x506   :  { %v1429_v57 = vpop.f32.mrf.mxu1 }
 0x507   :  { %v1430_v53 = vadd.f32 %v1429_v57, %v1340_v59  ;;  %v1581_v44 = vpack.c.bf16 %v1549_v58, %v1549_v58  ;;  %v1350_v63 = vpop.f32.mrf.mxu0 }
 0x508   :  { %v5581_v5 = vpop.f32.mrf.mxu2 }
 0x509   :  { %v1482_v62 = vmul.f32 %v5516_v27, %v1430_v53  ;;  %v1693_v35 = vunpack.c.l.b16 %v1581_v44 }
 0x50b   :  { %v1518_v8 = vadd.f32 %v5523_v17, %v1482_v62 }
 0x50d   :  { %v1550_v32 = vmax.f32 %v1518_v8, 0.0 }
 0x50e   :  { %v1432_v39 = vpop.f32.mrf.mxu1 }
 0x50f   :  { %v4081_v18 = vpack.c.bf16 %v1550_v32, %v1549_v58  ;;  %v1433_v40 = vadd.f32 %v1432_v39, %v1343_v41  ;;  %v1582_v21 = vpack.c.bf16 %v1550_v32, %v1550_v32 }
 0x510   :  { %v5585_v20 = vpop.f32.mrf.mxu2 }
 0x511   :  { %4372 = vst [vmem:[#allocation15 + $0x50] sm:$0xff] %v4081_v18   ;;  %v1483_v0 = vmul.f32 %v5516_v27, %v1433_v40  ;;  %v1694_v26 = vunpack.c.l.b16 %v1582_v21 }
 0x513   :  { %v1715_v24 = vpack.c.b16 %v1694_v26, %v1693_v35  ;;  %v1519_v29 = vadd.f32 %v5523_v17, %v1483_v0  ;;  %v1353_v35 = vpop.f32.mrf.mxu0 }
 0x515   :  { %1843 = vmatmul.bf16.gmra.mxu2 %v1715_v24  ;;  %v1551_v41 = vmax.f32 %v1519_v29, 0.0 }
 0x516   :  { %v1434_v48 = vpop.f32.mrf.mxu1 }
 0x517   :  { %v1435_v45 = vadd.f32 %v1434_v48, %v1345_v56  ;;  %v1583_v58 = vpack.c.bf16 %v1551_v41, %v1551_v41 }
 0x518   :  { %v5591_v55 = vpop.f32.mrf.mxu2 }
 0x519   :  { %v1484_v19 = vmul.f32 %v5516_v27, %v1435_v45  ;;  %v1695_v40 = vunpack.c.l.b16 %v1583_v58 }
 0x51b   :  { %v1520_v57 = vadd.f32 %v5523_v17, %v1484_v19 }
 0x51d   :  { %v1552_v53 = vmax.f32 %v1520_v57, 0.0 }
 0x51e   :  { %v1437_v62 = vpop.f32.mrf.mxu1 }
 0x51f   :  { %v4086_v8 = vpack.c.bf16 %v1552_v53, %v1551_v41  ;;  %v1438_v32 = vadd.f32 %v1437_v62, %v1348_v1  ;;  %v1584_v44 = vpack.c.bf16 %v1552_v53, %v1552_v53  ;;  %v1355_v53 = vpop.f32.mrf.mxu0 }
 0x520   :  { %v5595_v39 = vpop.f32.mrf.mxu2 }
 0x521   :  { %4373 = vst [vmem:[#allocation15 + $0x58] sm:$0xff] %v4086_v8   ;;  %v1485_v18 = vmul.f32 %v5516_v27, %v1438_v32  ;;  %v1696_v21 = vunpack.c.l.b16 %v1584_v44 }
 0x523   :  { %v1716_v0 = vpack.c.b16 %v1696_v21, %v1695_v40  ;;  %v1521_v26 = vadd.f32 %v5523_v17, %v1485_v18 }
 0x525   :  { %1848 = vmatmul.bf16.gmra.mxu2 %v1716_v0  ;;  %v1553_v1 = vmax.f32 %v1521_v26, 0.0 }
 0x526   :  { %v1439_v24 = vpop.f32.mrf.mxu1 }
 0x527   :  { %v1440_v29 = vadd.f32 %v1439_v24, %v1350_v63  ;;  %v1585_v57 = vpack.c.bf16 %v1553_v1, %v1553_v1 }
 0x528   :  { %v5601_v48 = vpop.f32.mrf.mxu2 }
 0x529   :  { %v1486_v45 = vmul.f32 %v5516_v27, %v1440_v29  ;;  %v1697_v40 = vunpack.c.l.b16 %v1585_v57 }
 0x52b   :  { %v1522_v41 = vadd.f32 %v5523_v17, %v1486_v45  ;;  %v1358_v45 = vpop.f32.mrf.mxu0 }
 0x52d   :  { %v1554_v19 = vmax.f32 %v1522_v41, 0.0 }
 0x52e   :  { %v1442_v62 = vpop.f32.mrf.mxu1 }
 0x52f   :  { %v4091_v58 = vpack.c.bf16 %v1554_v19, %v1553_v1  ;;  %v1443_v8 = vadd.f32 %v1442_v62, %v1353_v35  ;;  %v1586_v32 = vpack.c.bf16 %v1554_v19, %v1554_v19 }
 0x530   :  { %v5605_v44 = vpop.f32.mrf.mxu2 }
 0x531   :  { %4374 = vst [vmem:[#allocation15 + $0x60] sm:$0xff] %v4091_v58   ;;  %v1487_v18 = vmul.f32 %v5516_v27, %v1443_v8  ;;  %v1698_v21 = vunpack.c.l.b16 %v1586_v32 }
 0x533   :  { %v1717_v0 = vpack.c.b16 %v1698_v21, %v1697_v40  ;;  %v1523_v26 = vadd.f32 %v5523_v17, %v1487_v18 }
 0x535   :  { %1853 = vmatmul.bf16.gmra.mxu2 %v1717_v0  ;;  %v1555_v35 = vmax.f32 %v1523_v26, 0.0  ;;  %v1360_v0 = vpop.f32.mrf.mxu0 }
 0x536   :  { %v1444_v24 = vpop.f32.mrf.mxu1 }
 0x537   :  { %v1445_v29 = vadd.f32 %v1444_v24, %v1355_v53  ;;  %v1587_v58 = vpack.c.bf16 %v1555_v35, %v1555_v35 }
 0x538   :  { %v5611_v1 = vpop.f32.mrf.mxu2 }
 0x539   :  { %v1488_v41 = vmul.f32 %v5516_v27, %v1445_v29  ;;  %v1699_v21 = vunpack.c.l.b16 %v1587_v58 }
 0x53b   :  { %v1524_v19 = vadd.f32 %v5523_v17, %v1488_v41 }
 0x53d   :  { %v1556_v62 = vmax.f32 %v1524_v19, 0.0 }
 0x53e   :  { %v1447_v8 = vpop.f32.mrf.mxu1 }
 0x53f   :  { %v4096_v36 = vpack.c.bf16 %v1556_v62, %v1555_v35  ;;  %v1448_v57 = vadd.f32 %v1447_v8, %v1358_v45  ;;  %v1588_v32 = vpack.c.bf16 %v1556_v62, %v1556_v62  ;;  %v1363_v35 = vpop.f32.mrf.mxu0 }
 0x540   :  { %v1816_v40 = vpop.f32.mrf.mxu2 }
 0x541   :  { %4375 = vst [vmem:[#allocation15 + $0x68] sm:$0xff] %v4096_v36   ;;  %v1489_v18 = vmul.f32 %v5516_v27, %v1448_v57  ;;  %v1700_v53 = vunpack.c.l.b16 %v1588_v32 }
 0x543   :  { %v1718_v24 = vpack.c.b16 %v1700_v53, %v1699_v21  ;;  %v1525_v26 = vadd.f32 %v5523_v17, %v1489_v18 }
 0x545   :  { %1858 = vmatmul.bf16.gmra.mxu2 %v1718_v24  ;;  %v1557_v19 = vmax.f32 %v1525_v26, 0.0 }
 0x546   :  { %v1449_v29 = vpop.f32.mrf.mxu1 }
 0x547   :  { %v1450_v59 = vadd.f32 %v1449_v29, %v1360_v0  ;;  %v1589_v36 = vpack.c.bf16 %v1557_v19, %v1557_v19 }
 0x548   :  { %v1819_v41 = vpop.f32.mrf.mxu2 }
 0x549   :  { %v1490_v56 = vmul.f32 %v5516_v27, %v1450_v59  ;;  %v1701_v21 = vunpack.c.l.b16 %v1589_v36  ;;  %v1365_v59 = vpop.f32.mrf.mxu0 }
 0x54b   :  { %v1526_v45 = vadd.f32 %v5523_v17, %v1490_v56 }
 0x54d   :  { %v1558_v62 = vmax.f32 %v1526_v45, 0.0 }
 0x54e   :  { %v1452_v8 = vpop.f32.mrf.mxu1 }
 0x54f   :  { %v4101_v57 = vpack.c.bf16 %v1558_v62, %v1557_v19  ;;  %v1453_v58 = vadd.f32 %v1452_v8, %v1363_v35  ;;  %v1590_v32 = vpack.c.bf16 %v1558_v62, %v1558_v62 }
 0x550   :  { %v1821_v63 = vpop.f32.mrf.mxu2 }
 0x551   :  { %4376 = vst [vmem:[#allocation15 + $0x70] sm:$0xff] %v4101_v57   ;;  %v1491_v18 = vmul.f32 %v5516_v27, %v1453_v58  ;;  %v1702_v53 = vunpack.c.l.b16 %v1590_v32 }
 0x553   :  { %v1719_v0 = vpack.c.b16 %v1702_v53, %v1701_v21  ;;  %v1527_v24 = vadd.f32 %v5523_v17, %v1491_v18 }
 0x555   :  { %1863 = vmatmul.bf16.gmra.mxu2 %v1719_v0  ;;  %v1559_v45 = vmax.f32 %v1527_v24, 0.0 }
 0x556   :  { %v1454_v26 = vpop.f32.mrf.mxu1 }
 0x557   :  { %v1455_v56 = vadd.f32 %v1454_v26, %v1365_v59  ;;  %v1591_v62 = vpack.c.bf16 %v1559_v45, %v1559_v45  ;;  %v6364_v26 = vpack.c.bf16 %v5605_v44, %v5601_v48 }
 0x558   :  { %v1824_v29 = vpop.f32.mrf.mxu2 }
 0x559   :  { %v1492_v54 = vmul.f32 %v5516_v27, %v1455_v56  ;;  %v1703_v36 = vunpack.c.l.b16 %v1591_v62  ;;  %v1879_v27 = vpack.c.bf16 %v1821_v63, %v1819_v41  ;;  %v6365_v56 = vpack.c.bf16 %v5595_v39, %v5591_v55 }
 0x55a   :  { %v6367_v63 = vpack.c.bf16 %v5575_v38, %v5571_v7 }
 0x55b   :  { %v1528_v19 = vadd.f32 %v5523_v17, %v1492_v54  ;;  %v1878_v17 = vpack.c.bf16 %v1816_v40, %v5611_v1 }
 0x55d   :  { %v1560_v35 = vmax.f32 %v1528_v19, 0.0 }
 0x55f   :  { %v4106_v8 = vpack.c.bf16 %v1560_v35, %v1559_v45  ;;  %v1592_v57 = vpack.c.bf16 %v1560_v35, %v1560_v35 }
 0x560   :  { %v1826_v58 = vpop.f32.mrf.mxu2 }
 0x561   :  { %4377 = vst [vmem:[#allocation15 + $0x78] sm:$0xff] %v4106_v8   ;;  %v1704_v32 = vunpack.c.l.b16 %v1592_v57  ;;  %v1880_v59 = vpack.c.bf16 %v1826_v58, %v1824_v29  ;;  %v6366_v29 = vpack.c.bf16 %v5585_v20, %v5581_v5 }
 0x562   :  { %3410 = dma.vmem_to_hbm [thread:$0]  %s3403_s28, 2048, %s3405_s0, [#allocation16], %s4859_s3, %s4859_s3, %s4860_s25  }
 0x563   :  { %v1720_v21 = vpack.c.b16 %v1704_v32, %v1703_v36 }
 0x565   :  { %1868 = vmatmul.bf16.gmra.mxu2 %v1720_v21 }
 0x568   :  { %v1829_v18 = vpop.f32.mrf.mxu2 }
 0x570   :  { %v1831_v53 = vpop.f32.mrf.mxu2 }
 0x571   :  { %v1881_v0 = vpack.c.bf16 %v1831_v53, %v1829_v18 }
 0x573   :  { %1890 = vmatpush.bf16.msra.mxu3 %v1881_v0 }
 0x577   :  { %1891 = vmatpush.bf16.msra.mxu3 %v1880_v59 }
 0x578   :  { %v1834_v24 = vpop.f32.mrf.mxu2 }
 0x57b   :  { %1892 = vmatpush.bf16.msra.mxu3 %v1879_v27 }
 0x57f   :  { %1893 = vmatpush.bf16.msra.mxu3 %v1878_v17 }
 0x580   :  { %v1836_v54 = vpop.f32.mrf.mxu2 }
 0x583   :  { %1894 = vmatpush.bf16.msra.mxu3 %v6364_v26 }
 0x587   :  { %1895 = vmatpush.bf16.msra.mxu3 %v6365_v56 }
 0x588   :  { %v1839_v45 = vpop.f32.mrf.mxu2 }
 0x58b   :  { %1896 = vmatpush.bf16.msra.mxu3 %v6366_v29 }
 0x58f   :  { %1897 = vmatpush.bf16.msra.mxu3 %v6367_v63 }
 0x590   :  { %v1841_v1 = vpop.f32.mrf.mxu2 }
 0x591   :  { %v1883_v8 = vpack.c.bf16 %v1841_v1, %v1839_v45 }
 0x592   :  { %1898 = vmatmul.bf16.vlgmr.msra.gmra.mxu3 %v5050_v3 }
 0x598   :  { %v1844_v40 = vpop.f32.mrf.mxu2 }
 0x5a0   :  { %v1846_v41 = vpop.f32.mrf.mxu2 }
 0x5a2   :  { %1903 = vmatmul.bf16.gmra.mxu3 %v5068_v11 }
 0x5a8   :  { %v1849_v48 = vpop.f32.mrf.mxu2 }
 0x5b0   :  { %v1851_v44 = vpop.f32.mrf.mxu2 }
 0x5b2   :  { %1908 = vmatmul.bf16.gmra.mxu3 %v5092_v23 }
 0x5b8   :  { %v1854_v55 = vpop.f32.mrf.mxu2 }
 0x5c0   :  { %v1856_v39 = vpop.f32.mrf.mxu2 }
 0x5c1   :  { %v1886_v62 = vpack.c.bf16 %v1856_v39, %v1854_v55 }
 0x5c2   :  { %1913 = vmatmul.bf16.gmra.mxu3 %v5120_v33  ;;  %v1885_v33 = vpack.c.bf16 %v1851_v44, %v1849_v48 }
 0x5c8   :  { %v1859_v5 = vpop.f32.mrf.mxu2 }
 0x5d0   :  { %v1861_v20 = vpop.f32.mrf.mxu2 }
 0x5d1   :  { %v1887_v23 = vpack.c.bf16 %v1861_v20, %v1859_v5 }
 0x5d2   :  { %1918 = vmatmul.bf16.gmra.mxu3 %v5147_v42  ;;  %v1884_v42 = vpack.c.bf16 %v1846_v41, %v1844_v40 }
 0x5d8   :  { %v1864_v7 = vpop.f32.mrf.mxu2 }
 0x5e0   :  { %v1866_v38 = vpop.f32.mrf.mxu2 }
 0x5e1   :  { %v1888_v11 = vpack.c.bf16 %v1866_v38, %v1864_v7 }
 0x5e2   :  { %1923 = vmatmul.bf16.gmra.mxu3 %v5174_v51  ;;  %v1882_v51 = vpack.c.bf16 %v1836_v54, %v1834_v24 }
 0x5e8   :  { %v1869_v3 = vpop.f32.mrf.mxu2 }
 0x5f0   :  { %v1871_v19 = vpop.f32.mrf.mxu2 }
 0x5f1   :  { %v1889_v35 = vpack.c.bf16 %v1871_v19, %v1869_v3 }
 0x5f2   :  { %1928 = vmatmul.bf16.gmra.mxu3 %v5201_v60  ;;  %v3939_v60 = vld [vmem:[#allocation10 + $0x38] sm:$0xff] }
 0x5f3   :  { %1979 = vmatpush.bf16.msra.mxu0 %v1889_v35  ;;  %2400 = vmatpush.bf16.msra.mxu1 %v3939_v60 }
 0x5f7   :  { %1980 = vmatpush.bf16.msra.mxu0 %v1888_v11 }
 0x5fb   :  { %1981 = vmatpush.bf16.msra.mxu0 %v1887_v23 }
 0x5ff   :  { %1982 = vmatpush.bf16.msra.mxu0 %v1886_v62 }
 0x602   :  { %1933 = vmatmul.bf16.gmra.mxu3 %v5219_v2 }
 0x603   :  { %1983 = vmatpush.bf16.msra.mxu0 %v1885_v33 }
 0x607   :  { %1984 = vmatpush.bf16.msra.mxu0 %v1884_v42 }
 0x60b   :  { %1985 = vmatpush.bf16.msra.mxu0 %v1883_v8 }
 0x60f   :  { %1986 = vmatpush.bf16.msra.mxu0 %v1882_v51 }
 0x612   :  { %1987 = vmatmul.bf16.vlgmr.msra.gmra.mxu0 %v5095_v25  ;;  %1938 = vmatmul.bf16.gmra.mxu3 %v5237_v13  ;;  %v3938_v25 = vld [vmem:[#allocation10 + $0x30] sm:$0xff] }
 0x613   :  { %2401 = vmatpush.bf16.msra.mxu1 %v3938_v25 }
 0x615   :  { %v1899_v2 = vpop.f32.mrf.mxu3 }
 0x61d   :  { %v1901_v13 = vpop.f32.mrf.mxu3 }
 0x622   :  { %1992 = vmatmul.bf16.gmra.mxu0 %v5122_v34  ;;  %1943 = vmatmul.bf16.gmra.mxu3 %v5259_v31  ;;  %v3937_v34 = vld [vmem:[#allocation10 + $0x28] sm:$0xff] }
 0x623   :  { %2402 = vmatpush.bf16.msra.mxu1 %v3937_v34 }
 0x625   :  { %v1904_v31 = vpop.f32.mrf.mxu3 }
 0x632   :  { %1997 = vmatmul.bf16.gmra.mxu0 %v5149_v43  ;;  %1948 = vmatmul.bf16.gmra.mxu3 %v5283_v50  ;;  %v3936_v43 = vld [vmem:[#allocation10 + $0x20] sm:$0xff]  ;;  %v1906_v50 = vpop.f32.mrf.mxu3 }
 0x633   :  { %2403 = vmatpush.bf16.msra.mxu1 %v3936_v43 }
 0x63a   :  { %v1909_v57 = vpop.f32.mrf.mxu3 }
 0x642   :  { %2002 = vmatmul.bf16.gmra.mxu0 %v5176_v52  ;;  %1953 = vmatmul.bf16.gmra.mxu3 %v5319_v14  ;;  %v3935_v52 = vld [vmem:[#allocation10 + $0x18] sm:$0xff]  ;;  %v3932_v14 = vld [vmem:[#allocation10] sm:$0xff]  ;;  %v1911_v58 = vpop.f32.mrf.mxu3 }
 0x643   :  { %2404 = vmatpush.bf16.msra.mxu1 %v3935_v52 }
 0x64a   :  { %v1914_v18 = vpop.f32.mrf.mxu3 }
 0x652   :  { %2007 = vmatmul.bf16.gmra.mxu0 %v5203_v61  ;;  %1958 = vmatmul.bf16.gmra.mxu3 %v5349_v22  ;;  %v3934_v61 = vld [vmem:[#allocation10 + $0x10] sm:$0xff]  ;;  %v1916_v54 = vpop.f32.mrf.mxu3 }
 0x653   :  { %2405 = vmatpush.bf16.msra.mxu1 %v3934_v61 }
 0x65a   :  { %v1919_v48 = vpop.f32.mrf.mxu3 }
 0x662   :  { %2012 = vmatmul.bf16.gmra.mxu0 %v5221_v4  ;;  %v3933_v4 = vld [vmem:[#allocation10 + $0x8] sm:$0xff]  ;;  %1963 = vmatmul.bf16.gmra.mxu3 %v5059_v6  ;;  %v5668_v6 = vld [vmem:[%s6320_s10] ss:$0 sm:$0xff]  ;;  %v1921_v38 = vpop.f32.mrf.mxu3 }
 0x663   :  { %2406 = vmatpush.bf16.msra.mxu1 %v3933_v4 }
 0x667   :  { %2407 = vmatpush.bf16.msra.mxu1 %v3932_v14 }
 0x66a   :  { %v1924_v8 = vpop.f32.mrf.mxu3 }
 0x672   :  { %2017 = vmatmul.bf16.gmra.mxu0 %v5239_v15  ;;  %v5661_v15 = vld [vmem:[%s6319_s9] ss:$0 sm:$0xff]  ;;  %1968 = vmatmul.bf16.gmra.mxu3 %v5077_v16  ;;  %v1926_v52 = vpop.f32.mrf.mxu3 }
 0x682   :  { %2022 = vmatmul.bf16.gmra.mxu0 %v5257_v30  ;;  %1973 = vmatmul.bf16.gmra.mxu3 %v5105_v28 }
 0x68f   :  { %v1988_v22 = vpop.f32.mrf.mxu0 }
 0x690   :  { %v1989_v36 = vadd.f32 %v1988_v22, %v1899_v2 }
 0x692   :  { %v2072_v32 = vmul.f32 %v5661_v15, %v1989_v36  ;;  %2027 = vmatmul.bf16.gmra.mxu0 %v5281_v49 }
 0x694   :  { %v2108_v30 = vadd.f32 %v5668_v6, %v2072_v32  ;;  %v1929_v32 = vpop.f32.mrf.mxu3 }
 0x696   :  { %v2140_v0 = vmax.f32 %v2108_v30, 0.0 }
 0x697   :  { %v1990_v21 = vpop.f32.mrf.mxu0 }
 0x698   :  { %v1991_v53 = vadd.f32 %v1990_v21, %v1901_v13  ;;  %v2172_v24 = vpack.c.bf16 %v2140_v0, %v2140_v0 }
 0x69a   :  { %v2073_v59 = vmul.f32 %v5661_v15, %v1991_v53  ;;  %v2288_v49 = vunpack.c.l.b16 %v2172_v24 }
 0x69c   :  { %v2109_v16 = vadd.f32 %v5668_v6, %v2073_v59 }
 0x69e   :  { %v2141_v27 = vmax.f32 %v2109_v16, 0.0 }
 0x69f   :  { %v1993_v17 = vpop.f32.mrf.mxu0 }
 0x6a0   :  { %v2173_v26 = vpack.c.bf16 %v2141_v27, %v2141_v27  ;;  %v4111_v56 = vpack.c.bf16 %v2141_v27, %v2140_v0  ;;  %v1994_v45 = vadd.f32 %v1993_v17, %v1904_v31 }
 0x6a2   :  { %4112 = vst [vmem:[#allocation17] sm:$0xff] %v4111_v56   ;;  %v2289_v29 = vunpack.c.l.b16 %v2173_v26  ;;  %v2074_v63 = vmul.f32 %v5661_v15, %v1994_v45  ;;  %2032 = vmatmul.bf16.gmra.mxu0 %v5317_v12 }
 0x6a4   :  { %v2320_v1 = vpack.c.b16 %v2289_v29, %v2288_v49  ;;  %v2110_v40 = vadd.f32 %v5668_v6, %v2074_v63 }
 0x6a6   :  { %2408 = vmatmul.bf16.vlgmr.msra.gmra.mxu1 %v2320_v1  ;;  %v2142_v55 = vmax.f32 %v2110_v40, 0.0 }
 0x6a7   :  { %v1995_v41 = vpop.f32.mrf.mxu0 }
 0x6a8   :  { %v1996_v44 = vadd.f32 %v1995_v41, %v1906_v50  ;;  %v2174_v20 = vpack.c.bf16 %v2142_v55, %v2142_v55 }
 0x6aa   :  { %v2075_v28 = vmul.f32 %v5661_v15, %v1996_v44  ;;  %v2290_v11 = vunpack.c.l.b16 %v2174_v20 }
 0x6ac   :  { %v2111_v39 = vadd.f32 %v5668_v6, %v2075_v28 }
 0x6ae   :  { %v2143_v5 = vmax.f32 %v2111_v39, 0.0 }
 0x6af   :  { %v1998_v7 = vpop.f32.mrf.mxu0 }
 0x6b0   :  { %v4116_v3 = vpack.c.bf16 %v2143_v5, %v2142_v55  ;;  %v1999_v19 = vadd.f32 %v1998_v7, %v1909_v57  ;;  %v2175_v35 = vpack.c.bf16 %v2143_v5, %v2143_v5 }
 0x6b2   :  { %4378 = vst [vmem:[#allocation17 + $0x8] sm:$0xff] %v4116_v3   ;;  %v2076_v12 = vmul.f32 %v5661_v15, %v1999_v19  ;;  %2037 = vmatmul.bf16.gmra.mxu0 %v5346_v10  ;;  %v2291_v23 = vunpack.c.l.b16 %v2175_v35  ;;  %v4869_v3 = vmov 0   ;;  %v5704_v19 = vld [vmem:[%s6327_s17] sm:$0xff] }
 0x6b3   :  { %4468 = vset.pattern.permute.xlu1 %v4869_v3  ;;  %4469 = vset.pattern.permute.xlu2 %v4869_v3 }
 0x6b4   :  { %v2321_v62 = vpack.c.b16 %v2291_v23, %v2290_v11  ;;  %v2112_v33 = vadd.f32 %v5668_v6, %v2076_v12  ;;  %4467 = vset.pattern.permute.xlu0 %v4869_v3 }
 0x6b5   :  { %2904 = vperm.xlu0 %4467, %v5704_v19  }
 0x6b6   :  { %2413 = vmatmul.bf16.gmra.mxu1 %v2321_v62  ;;  %v2144_v60 = vmax.f32 %v2112_v33, 0.0 }
 0x6b7   :  { %v2000_v42 = vpop.f32.mrf.mxu0 }
 0x6b8   :  { %v2001_v51 = vadd.f32 %v2000_v42, %v1911_v58  ;;  %v2176_v13 = vpack.c.bf16 %v2144_v60, %v2144_v60  ;;  %v5716_v42 = vld [vmem:[%s6327_s17 + $0x8] sm:$0xff] }
 0x6ba   :  { %v2077_v25 = vmul.f32 %v5661_v15, %v2001_v51  ;;  %v2292_v50 = vunpack.c.l.b16 %v2176_v13 }
 0x6bc   :  { %v2113_v2 = vadd.f32 %v5668_v6, %v2077_v25 }
 0x6bd   :  { %2909 = vperm.xlu0 %4467, %v5716_v42  }
 0x6be   :  { %v2145_v34 = vmax.f32 %v2113_v2, 0.0 }
 0x6bf   :  { %v2003_v43 = vpop.f32.mrf.mxu0 }
 0x6c0   :  { %v4121_v31 = vpack.c.bf16 %v2145_v34, %v2144_v60  ;;  %v2004_v10 = vadd.f32 %v2003_v43, %v1914_v18  ;;  %v2177_v61 = vpack.c.bf16 %v2145_v34, %v2145_v34 }
 0x6c2   :  { %4379 = vst [vmem:[#allocation17 + $0x10] sm:$0xff] %v4121_v31   ;;  %v2078_v4 = vmul.f32 %v5661_v15, %v2004_v10  ;;  %2042 = vmatmul.bf16.gmra.mxu0 %v5380_v47  ;;  %v2293_v14 = vunpack.c.l.b16 %v2177_v61  ;;  %v3947_v10 = vld [vmem:[#allocation11 + $0x38] sm:$0xff] }
 0x6c3   :  { %2685 = vmatpush.bf16.msra.mxu2 %v3947_v10 }
 0x6c4   :  { %v2322_v57 = vpack.c.b16 %v2293_v14, %v2292_v50  ;;  %v2114_v22 = vadd.f32 %v5668_v6, %v2078_v4  ;;  %v5726_v4 = vld [vmem:[%s6327_s17 + $0x30] sm:$0xff] }
 0x6c5   :  { %2934 = vperm.xlu0 %4467, %v5726_v4  }
 0x6c6   :  { %2418 = vmatmul.bf16.gmra.mxu1 %v2322_v57  ;;  %v2146_v30 = vmax.f32 %v2114_v22, 0.0  ;;  %v3946_v57 = vld [vmem:[#allocation11 + $0x30] sm:$0xff] }
 0x6c7   :  { %v2005_v58 = vpop.f32.mrf.mxu0  ;;  %2686 = vmatpush.bf16.msra.mxu2 %v3946_v57 }
 0x6c8   :  { %v2006_v36 = vadd.f32 %v2005_v58, %v1916_v54  ;;  %v2178_v0 = vpack.c.bf16 %v2146_v30, %v2146_v30  ;;  %v1931_v54 = vpop.f32.mrf.mxu3 }
 0x6ca   :  { %v2079_v21 = vmul.f32 %v5661_v15, %v2006_v36  ;;  %v2294_v17 = vunpack.c.l.b16 %v2178_v0 }
 0x6cc   :  { %v2115_v18 = vadd.f32 %v5668_v6, %v2079_v21  ;;  %v5737_v21 = vld [vmem:[%s6327_s17 + $0x48] sm:$0xff] }
 0x6cd   :  { %2949 = vperm.xlu0 %4467, %v5737_v21  }
 0x6ce   :  { %v2147_v53 = vmax.f32 %v2115_v18, 0.0 }
 0x6cf   :  { %v2008_v59 = vpop.f32.mrf.mxu0 }
 0x6d0   :  { %v4126_v16 = vpack.c.bf16 %v2147_v53, %v2146_v30  ;;  %v2009_v24 = vadd.f32 %v2008_v59, %v1919_v48  ;;  %v2179_v47 = vpack.c.bf16 %v2147_v53, %v2147_v53  ;;  %v5695_v41 = vpop.f32.mrf.mxu3  ;;  %v3944_v59 = vld [vmem:[#allocation11 + $0x20] sm:$0xff] }
 0x6d2   :  { %4380 = vst [vmem:[#allocation17 + $0x18] sm:$0xff] %v4126_v16   ;;  %v2080_v27 = vmul.f32 %v5661_v15, %v2009_v24  ;;  %2047 = vmatmul.bf16.gmra.mxu0 %v5409_v9  ;;  %v2295_v26 = vunpack.c.l.b16 %v2179_v47 }
 0x6d4   :  { %v2323_v56 = vpack.c.b16 %v2295_v26, %v2294_v17  ;;  %v2116_v45 = vadd.f32 %v5668_v6, %v2080_v27  ;;  %v6368_v17 = vld [vmem:[#allocation32_spill] sm:$0xff] }
 0x6d6   :  { %2423 = vmatmul.bf16.gmra.mxu1 %v2323_v56  ;;  %v2148_v63 = vmax.f32 %v2116_v45, 0.0  ;;  %v3943_v56 = vld [vmem:[#allocation11 + $0x18] sm:$0xff] }
 0x6d7   :  { %v2010_v49 = vpop.f32.mrf.mxu0 }
 0x6d8   :  { %v2011_v29 = vadd.f32 %v2010_v49, %v1921_v38  ;;  %v2180_v44 = vpack.c.bf16 %v2148_v63, %v2148_v63 }
 0x6da   :  { %v2081_v1 = vmul.f32 %v5661_v15, %v2011_v29  ;;  %v2296_v20 = vunpack.c.l.b16 %v2180_v44  ;;  %v5746_v29 = vld [vmem:[%s6327_s17 + $0x10] sm:$0xff] }
 0x6db   :  { %2914 = vperm.xlu1 %4468, %v5746_v29  }
 0x6dc   :  { %v2117_v40 = vadd.f32 %v5668_v6, %v2081_v1 }
 0x6de   :  { %v2149_v48 = vmax.f32 %v2117_v40, 0.0 }
 0x6df   :  { %v2013_v55 = vpop.f32.mrf.mxu0 }
 0x6e0   :  { %v4131_v9 = vpack.c.bf16 %v2149_v48, %v2148_v63  ;;  %v2014_v28 = vadd.f32 %v2013_v55, %v1924_v8  ;;  %v2181_v39 = vpack.c.bf16 %v2149_v48, %v2149_v48  ;;  %v5751_v63 = vld [vmem:[%s6327_s17 + $0x60] sm:$0xff] }
 0x6e1   :  { %2964 = vperm.xlu0 %4467, %v5751_v63  }
 0x6e2   :  { %4381 = vst [vmem:[#allocation17 + $0x20] sm:$0xff] %v4131_v9   ;;  %v2082_v5 = vmul.f32 %v5661_v15, %v2014_v28  ;;  %2052 = vmatmul.bf16.gmra.mxu0 %v5132_v37  ;;  %v2297_v7 = vunpack.c.l.b16 %v2181_v39  ;;  %v5708_v37 = vpop.f32.mrf.mxu3  ;;  %v3941_v9 = vld [vmem:[#allocation11 + $0x8] sm:$0xff]  ;;  %v5762_v39 = vld [vmem:[%s6327_s17 + $0x18] sm:$0xff] }
 0x6e3   :  { %2919 = vperm.xlu1 %4468, %v5762_v39  }
 0x6e4   :  { %v2324_v38 = vpack.c.b16 %v2297_v7, %v2296_v20  ;;  %v2118_v35 = vadd.f32 %v5668_v6, %v2082_v5  ;;  %v5767_v5 = vld [vmem:[%s6327_s17 + $0x80] sm:$0xff] }
 0x6e6   :  { %2428 = vmatmul.bf16.gmra.mxu1 %v2324_v38  ;;  %v2150_v23 = vmax.f32 %v2118_v35, 0.0 }
 0x6e7   :  { %v2015_v12 = vpop.f32.mrf.mxu0 }
 0x6e8   :  { %v2016_v11 = vadd.f32 %v2015_v12, %v1926_v52  ;;  %v2182_v51 = vpack.c.bf16 %v2150_v23, %v2150_v23  ;;  %v3940_v12 = vld [vmem:[#allocation11] sm:$0xff] }
 0x6e9   :  { %2984 = vperm.xlu0 %4467, %v5767_v5  }
 0x6ea   :  { %v2083_v62 = vmul.f32 %v5661_v15, %v2016_v11  ;;  %v5719_v13 = vpop.f32.mrf.mxu3  ;;  %v2298_v52 = vunpack.c.l.b16 %v2182_v51 }
 0x6ec   :  { %v2119_v33 = vadd.f32 %v5668_v6, %v2083_v62 }
 0x6ee   :  { %v2151_v8 = vmax.f32 %v2119_v33, 0.0 }
 0x6ef   :  { %v2018_v60 = vpop.f32.mrf.mxu0 }
 0x6f0   :  { %v4136_v25 = vpack.c.bf16 %v2151_v8, %v2150_v23  ;;  %v2019_v2 = vadd.f32 %v2018_v60, %v1929_v32  ;;  %v2183_v34 = vpack.c.bf16 %v2151_v8, %v2151_v8  ;;  %v3945_v32 = vld [vmem:[#allocation11 + $0x28] sm:$0xff]  ;;  %v5776_v60 = vld [vmem:[%s6327_s17 + $0x38] sm:$0xff] }
 0x6f1   :  { %2687 = vmatpush.bf16.msra.mxu2 %v3945_v32  ;;  %2939 = vperm.xlu1 %4468, %v5776_v60  }
 0x6f2   :  { %4382 = vst [vmem:[#allocation17 + $0x28] sm:$0xff] %v4136_v25   ;;  %v2084_v43 = vmul.f32 %v5661_v15, %v2019_v2  ;;  %2057 = vmatmul.bf16.gmra.mxu0 %v5159_v46  ;;  %v2299_v31 = vunpack.c.l.b16 %v2183_v34  ;;  %v5731_v36 = vpop.f32.mrf.mxu3  ;;  %v5781_v25 = vld [vmem:[%s6327_s17 + $0xb0] sm:$0xff] }
 0x6f3   :  { %3014 = vperm.xlu0 %4467, %v5781_v25  }
 0x6f4   :  { %v2325_v61 = vpack.c.b16 %v2299_v31, %v2298_v52  ;;  %v2120_v50 = vadd.f32 %v5668_v6, %v2084_v43 }
 0x6f5   :  { %2688 = vmatpush.bf16.msra.mxu2 %v3944_v59 }
 0x6f6   :  { %2433 = vmatmul.bf16.gmra.mxu1 %v2325_v61  ;;  %v2152_v46 = vmax.f32 %v2120_v50, 0.0  ;;  %v5792_v61 = vld [vmem:[%s6327_s17 + $0x50] sm:$0xff] }
 0x6f7   :  { %v2020_v14 = vpop.f32.mrf.mxu0  ;;  %v2900_v50 = vld [vmem:[%s6327_s17 + $0xf0] sm:$0xff] }
 0x6f8   :  { %v2021_v22 = vadd.f32 %v2020_v14, %v1931_v54  ;;  %v2184_v53 = vpack.c.bf16 %v2152_v46, %v2152_v46 }
 0x6f9   :  { %2689 = vmatpush.bf16.msra.mxu2 %v3943_v56  ;;  %2954 = vperm.xlu1 %4468, %v5792_v61  }
 0x6fa   :  { %v2085_v58 = vmul.f32 %v5661_v15, %v2021_v22  ;;  %v2300_v26 = vunpack.c.l.b16 %v2184_v53  ;;  %v1944_v49 = vpop.f32.mrf.mxu3  ;;  %v5802_v53 = vld [vmem:[%s6322_s12] ss:$0 sm:$0xff] }
 0x6fb   :  { %3054 = vperm.xlu0 %4467, %v2900_v50  }
 0x6fc   :  { %v2121_v30 = vadd.f32 %v5668_v6, %v2085_v58 }
 0x6fe   :  { %v2153_v18 = vmax.f32 %v2121_v30, 0.0 }
 0x6ff   :  { %v2023_v0 = vpop.f32.mrf.mxu0 }
 0x700   :  { %v4141_v16 = vpack.c.bf16 %v2153_v18, %v2152_v46  ;;  %v2024_v24 = vadd.f32 %v2023_v0, %v5695_v41  ;;  %v2185_v47 = vpack.c.bf16 %v2153_v18, %v2153_v18  ;;  %v3942_v41 = vld [vmem:[#allocation11 + $0x10] sm:$0xff] }
 0x701   :  { %2690 = vmatpush.bf16.msra.mxu2 %v3942_v41 }
 0x702   :  { %4383 = vst [vmem:[#allocation17 + $0x30] sm:$0xff] %v4141_v16   ;;  %v2086_v27 = vmul.f32 %v5661_v15, %v2024_v24  ;;  %2062 = vmatmul.bf16.gmra.mxu0 %v6368_v17  ;;  %v2301_v54 = vunpack.c.l.b16 %v2185_v47  ;;  %v1946_v35 = vpop.f32.mrf.mxu3  ;;  %v5807_v24 = vld [vmem:[%s6327_s17 + $0x20] sm:$0xff]  ;;  %v5812_v47 = vld [vmem:[%s6327_s17 + $0x68] sm:$0xff] }
 0x703   :  { %2924 = vperm.xlu2 %4469, %v5807_v24   ;;  %2969 = vperm.xlu1 %4468, %v5812_v47  }
 0x704   :  { %v2326_v45 = vpack.c.b16 %v2301_v54, %v2300_v26  ;;  %v2122_v1 = vadd.f32 %v5668_v6, %v2086_v27  ;;  %v4870_v54 = vmov 1  }
 0x705   :  { %2691 = vmatpush.bf16.msra.mxu2 %v3941_v9  ;;  %4488 = vset.pattern.permute.xlu0 %v4870_v54 }
 0x706   :  { %2438 = vmatmul.bf16.gmra.mxu1 %v2326_v45  ;;  %v2154_v44 = vmax.f32 %v2122_v1, 0.0  ;;  %3132 = vperm.xlu0 %4488, %v5704_v19  }
 0x707   :  { %v2025_v40 = vpop.f32.mrf.mxu0 }
 0x708   :  { %v2026_v48 = vadd.f32 %v2025_v40, %v5708_v37  ;;  %v2186_v7 = vpack.c.bf16 %v2154_v44, %v2154_v44 }
 0x709   :  { %2692 = vmatpush.bf16.msra.mxu2 %v3940_v12 }
 0x70a   :  { %v2087_v55 = vmul.f32 %v5661_v15, %v2026_v48  ;;  %v2302_v33 = vunpack.c.l.b16 %v2186_v7  ;;  %v1949_v43 = vpop.f32.mrf.mxu3 }
 0x70b   :  { %4470 = vset.pattern.permute.xlu1 %v4870_v54 }
 0x70c   :  { %v2123_v28 = vadd.f32 %v5668_v6, %v2087_v55  ;;  %v2875_v55 = vld [vmem:[%s6327_s17 + $0x28] sm:$0xff]  ;;  %3136 = vperm.xlu1 %4470, %v5716_v42  }
 0x70d   :  { %2929 = vperm.xlu2 %4469, %v2875_v55  }
 0x70e   :  { %v2155_v20 = vmax.f32 %v2123_v28, 0.0  ;;  %3152 = vperm.xlu0 %4488, %v2875_v55  }
 0x70f   :  { %v2028_v38 = vpop.f32.mrf.mxu0 }
 0x710   :  { %v4146_v37 = vpack.c.bf16 %v2155_v20, %v2154_v44  ;;  %v2029_v11 = vadd.f32 %v2028_v38, %v5719_v13  ;;  %v2187_v23 = vpack.c.bf16 %v2155_v20, %v2155_v20 }
 0x712   :  { %4384 = vst [vmem:[#allocation17 + $0x38] sm:$0xff] %v4146_v37   ;;  %v2088_v62 = vmul.f32 %v5661_v15, %v2029_v11  ;;  %v2303_v8 = vunpack.c.l.b16 %v2187_v23  ;;  %v1951_v59 = vpop.f32.mrf.mxu3 }
 0x714   :  { %v2327_v51 = vpack.c.b16 %v2303_v8, %v2302_v33  ;;  %v2124_v2 = vadd.f32 %v5668_v6, %v2088_v62  ;;  %3144 = vperm.xlu1 %4470, %v5762_v39  }
 0x716   :  { %2443 = vmatmul.bf16.gmra.mxu1 %v2327_v51  ;;  %v2156_v52 = vmax.f32 %v2124_v2, 0.0 }
 0x717   :  { %v2030_v34 = vpop.f32.mrf.mxu0 }
 0x718   :  { %v2031_v13 = vadd.f32 %v2030_v34, %v5731_v36  ;;  %v2188_v57 = vpack.c.bf16 %v2156_v52, %v2156_v52  ;;  %v2878_v34 = vld [vmem:[%s6327_s17 + $0x40] sm:$0xff] }
 0x719   :  { %2944 = vperm.xlu2 %4469, %v2878_v34   ;;  %3164 = vperm.xlu0 %4488, %v2878_v34  }
 0x71a   :  { %v2089_v31 = vmul.f32 %v5661_v15, %v2031_v13  ;;  %v2304_v30 = vunpack.c.l.b16 %v2188_v57  ;;  %v1954_v44 = vpop.f32.mrf.mxu3 }
 0x71c   :  { %v2125_v10 = vadd.f32 %v5668_v6, %v2089_v31  ;;  %3156 = vperm.xlu1 %4470, %v5726_v4  }
 0x71e   :  { %v2157_v14 = vmax.f32 %v2125_v10, 0.0 }
 0x71f   :  { %v2033_v22 = vpop.f32.mrf.mxu0 }
 0x720   :  { %v4151_v46 = vpack.c.bf16 %v2157_v14, %v2156_v52  ;;  %v2034_v58 = vadd.f32 %v2033_v22, %v1944_v49  ;;  %v2189_v36 = vpack.c.bf16 %v2157_v14, %v2157_v14 }
 0x722   :  { %4385 = vst [vmem:[#allocation17 + $0x40] sm:$0xff] %v4151_v46   ;;  %v2090_v32 = vmul.f32 %v5661_v15, %v2034_v58  ;;  %v2305_v18 = vunpack.c.l.b16 %v2189_v36  ;;  %v1956_v52 = vpop.f32.mrf.mxu3  ;;  %v2881_v58 = vld [vmem:[%s6327_s17 + $0x58] sm:$0xff] }
 0x723   :  { %v2409_v0 = vpop.f32.mrf.mxu1  ;;  %2959 = vperm.xlu2 %4469, %v2881_v58   ;;  %3176 = vperm.xlu0 %4488, %v2881_v58  }
 0x724   :  { %v2328_v16 = vpack.c.b16 %v2305_v18, %v2304_v30  ;;  %v2126_v27 = vadd.f32 %v5668_v6, %v2090_v32  ;;  %v2410_v17 = vadd.f32 %v5802_v53, %v2409_v0  ;;  %3168 = vperm.xlu1 %4470, %v5737_v21  }
 0x726   :  { %2448 = vmatmul.bf16.gmra.mxu1 %v2328_v16  ;;  %v2158_v45 = vmax.f32 %v2126_v27, 0.0  ;;  %v2489_v1 = vpack.c.bf16 %v2410_v17, %v2410_v17 }
 0x727   :  { %v2035_v26 = vpop.f32.mrf.mxu0 }
 0x728   :  { %v2036_v56 = vadd.f32 %v2035_v26, %v1946_v35  ;;  %v2190_v7 = vpack.c.bf16 %v2158_v45, %v2158_v45  ;;  %v2573_v19 = vunpack.c.l.b16 %v2489_v1 }
 0x72a   :  { %v2091_v49 = vmul.f32 %v5661_v15, %v2036_v56  ;;  %v2306_v33 = vunpack.c.l.b16 %v2190_v7  ;;  %v1959_v26 = vpop.f32.mrf.mxu3 }
 0x72b   :  { %v2411_v40 = vpop.f32.mrf.mxu1  ;;  %3184 = vperm.xlu0 %4488, %v5812_v47  }
 0x72c   :  { %v2127_v41 = vadd.f32 %v5668_v6, %v2091_v49  ;;  %v2412_v48 = vadd.f32 %v5802_v53, %v2411_v40  ;;  %4472 = vset.pattern.permute.xlu1 %v4869_v3 }
 0x72e   :  { %v2159_v9 = vmax.f32 %v2127_v41, 0.0  ;;  %v2490_v28 = vpack.c.bf16 %v2412_v48, %v2412_v48  ;;  %v4191_v20 = vpack.c.bf16 %v2412_v48, %v2410_v17  ;;  %v5846_v48 = vld [vmem:[%s6327_s17 + $0x70] sm:$0xff] }
 0x72f   :  { %v2038_v38 = vpop.f32.mrf.mxu0  ;;  %2974 = vperm.xlu2 %4469, %v5846_v48  }
 0x730   :  { %v4156_v35 = vpack.c.bf16 %v2159_v9, %v2158_v45  ;;  %v2574_v12 = vunpack.c.l.b16 %v2490_v28  ;;  %4192 = vst [vmem:[#allocation18] sm:$0xff] %v4191_v20   ;;  %v2039_v37 = vadd.f32 %v2038_v38, %v1949_v43  ;;  %v2191_v11 = vpack.c.bf16 %v2159_v9, %v2159_v9 }
 0x732   :  { %4386 = vst [vmem:[#allocation17 + $0x48] sm:$0xff] %v4156_v35   ;;  %v2605_v23 = vpack.c.b16 %v2574_v12, %v2573_v19  ;;  %v2092_v62 = vmul.f32 %v5661_v15, %v2039_v37  ;;  %v2307_v8 = vunpack.c.l.b16 %v2191_v11  ;;  %v1961_v38 = vpop.f32.mrf.mxu3 }
 0x733   :  { %v2414_v51 = vpop.f32.mrf.mxu1 }
 0x734   :  { %2693 = vmatmul.bf16.vlgmr.msra.gmra.mxu2 %v2605_v23  ;;  %v2329_v2 = vpack.c.b16 %v2307_v8, %v2306_v33  ;;  %v2128_v13 = vadd.f32 %v5668_v6, %v2092_v62  ;;  %v2415_v42 = vadd.f32 %v5802_v53, %v2414_v51 }
 0x736   :  { %2453 = vmatmul.bf16.gmra.mxu1 %v2329_v2  ;;  %v2160_v10 = vmax.f32 %v2128_v13, 0.0  ;;  %v2491_v14 = vpack.c.bf16 %v2415_v42, %v2415_v42 }
 0x737   :  { %v2040_v43 = vpop.f32.mrf.mxu0  ;;  %4471 = vset.pattern.permute.xlu2 %v4870_v54 }
 0x738   :  { %v2041_v31 = vadd.f32 %v2040_v43, %v1951_v59  ;;  %v2192_v18 = vpack.c.bf16 %v2160_v10, %v2160_v10  ;;  %v2575_v39 = vunpack.c.l.b16 %v2491_v14  ;;  %3140 = vperm.xlu2 %4471, %v5746_v29  }
 0x73a   :  { %v2093_v50 = vmul.f32 %v5661_v15, %v2041_v31  ;;  %v2308_v49 = vunpack.c.l.b16 %v2192_v18 }
 0x73b   :  { %v2416_v57 = vpop.f32.mrf.mxu1 }
 0x73c   :  { %v2129_v22 = vadd.f32 %v5668_v6, %v2093_v50  ;;  %v2417_v46 = vadd.f32 %v5802_v53, %v2416_v57 }
 0x73e   :  { %v2161_v36 = vmax.f32 %v2129_v22, 0.0  ;;  %v2492_v32 = vpack.c.bf16 %v2417_v46, %v2417_v46  ;;  %v4196_v30 = vpack.c.bf16 %v2417_v46, %v2415_v42 }
 0x73f   :  { %v2043_v0 = vpop.f32.mrf.mxu0 }
 0x740   :  { %v4161_v59 = vpack.c.bf16 %v2161_v36, %v2160_v10  ;;  %v2576_v16 = vunpack.c.l.b16 %v2492_v32  ;;  %4393 = vst [vmem:[#allocation18 + $0x8] sm:$0xff] %v4196_v30   ;;  %v2044_v27 = vadd.f32 %v2043_v0, %v1954_v44  ;;  %v2193_v17 = vpack.c.bf16 %v2161_v36, %v2161_v36  ;;  %v1964_v10 = vpop.f32.mrf.mxu3  ;;  %3148 = vperm.xlu2 %4471, %v5807_v24  }
 0x742   :  { %4387 = vst [vmem:[#allocation17 + $0x50] sm:$0xff] %v4161_v59   ;;  %v2094_v56 = vmul.f32 %v5661_v15, %v2044_v27  ;;  %v2606_v45 = vpack.c.b16 %v2576_v16, %v2575_v39  ;;  %v2309_v1 = vunpack.c.l.b16 %v2193_v17 }
 0x743   :  { %v2419_v40 = vpop.f32.mrf.mxu1 }
 0x744   :  { %2698 = vmatmul.bf16.gmra.mxu2 %v2606_v45  ;;  %v2330_v41 = vpack.c.b16 %v2309_v1, %v2308_v49  ;;  %v2130_v44 = vadd.f32 %v5668_v6, %v2094_v56  ;;  %v2420_v4 = vadd.f32 %v5802_v53, %v2419_v40 }
 0x746   :  { %2458 = vmatmul.bf16.gmra.mxu1 %v2330_v41  ;;  %v2162_v28 = vmax.f32 %v2130_v44, 0.0  ;;  %v2493_v7 = vpack.c.bf16 %v2420_v4, %v2420_v4 }
 0x747   :  { %v2045_v55 = vpop.f32.mrf.mxu0 }
 0x748   :  { %v2046_v9 = vadd.f32 %v2045_v55, %v1956_v52  ;;  %v2194_v62 = vpack.c.bf16 %v2162_v28, %v2162_v28  ;;  %v2577_v33 = vunpack.c.l.b16 %v2493_v7  ;;  %v1966_v17 = vpop.f32.mrf.mxu3  ;;  %3160 = vperm.xlu2 %4471, %v5776_v60  }
 0x74a   :  { %v2095_v20 = vmul.f32 %v5661_v15, %v2046_v9  ;;  %v2310_v42 = vunpack.c.l.b16 %v2194_v62 }
 0x74b   :  { %v2421_v19 = vpop.f32.mrf.mxu1 }
 0x74c   :  { %v2131_v35 = vadd.f32 %v5668_v6, %v2095_v20  ;;  %v2422_v12 = vadd.f32 %v5802_v53, %v2421_v19 }
 0x74e   :  { %v2163_v37 = vmax.f32 %v2131_v35, 0.0  ;;  %v2494_v11 = vpack.c.bf16 %v2422_v12, %v2422_v12  ;;  %v4201_v23 = vpack.c.bf16 %v2422_v12, %v2420_v4 }
 0x74f   :  { %v2048_v21 = vpop.f32.mrf.mxu0 }
 0x750   :  { %v4166_v47 = vpack.c.bf16 %v2163_v37, %v2162_v28  ;;  %v2578_v8 = vunpack.c.l.b16 %v2494_v11  ;;  %4394 = vst [vmem:[#allocation18 + $0x10] sm:$0xff] %v4201_v23   ;;  %v2049_v51 = vadd.f32 %v2048_v21, %v1959_v26  ;;  %v2195_v2 = vpack.c.bf16 %v2163_v37, %v2163_v37  ;;  %3172 = vperm.xlu2 %4471, %v5792_v61   ;;  %v1969_v20 = vpop.f32.mrf.mxu3 }
 0x752   :  { %4388 = vst [vmem:[#allocation17 + $0x58] sm:$0xff] %v4166_v47   ;;  %v2096_v34 = vmul.f32 %v5661_v15, %v2049_v51  ;;  %v2607_v13 = vpack.c.b16 %v2578_v8, %v2577_v33  ;;  %v2311_v43 = vunpack.c.l.b16 %v2195_v2 }
 0x753   :  { %v2424_v52 = vpop.f32.mrf.mxu1 }
 0x754   :  { %2703 = vmatmul.bf16.gmra.mxu2 %v2607_v13  ;;  %v2331_v31 = vpack.c.b16 %v2311_v43, %v2310_v42  ;;  %v2132_v50 = vadd.f32 %v5668_v6, %v2096_v34  ;;  %v2425_v29 = vadd.f32 %v5802_v53, %v2424_v52 }
 0x756   :  { %2463 = vmatmul.bf16.gmra.mxu1 %v2331_v31  ;;  %v2164_v22 = vmax.f32 %v2132_v50, 0.0  ;;  %v2495_v58 = vpack.c.bf16 %v2425_v29, %v2425_v29 }
 0x757   :  { %v2050_v14 = vpop.f32.mrf.mxu0 }
 0x758   :  { %v2051_v57 = vadd.f32 %v2050_v14, %v1961_v38  ;;  %v2196_v59 = vpack.c.bf16 %v2164_v22, %v2164_v22  ;;  %v2579_v16 = vunpack.c.l.b16 %v2495_v58  ;;  %3180 = vperm.xlu2 %4471, %v5751_v63   ;;  %v1971_v31 = vpop.f32.mrf.mxu3 }
 0x75a   :  { %v2097_v46 = vmul.f32 %v5661_v15, %v2051_v57  ;;  %v2312_v40 = vunpack.c.l.b16 %v2196_v59 }
 0x75b   :  { %v2426_v36 = vpop.f32.mrf.mxu1 }
 0x75c   :  { %v2133_v32 = vadd.f32 %v5668_v6, %v2097_v46  ;;  %v2427_v30 = vadd.f32 %v5802_v53, %v2426_v36 }
 0x75e   :  { %v2165_v18 = vmax.f32 %v2133_v32, 0.0  ;;  %v2496_v39 = vpack.c.bf16 %v2427_v30, %v2427_v30  ;;  %v4206_v0 = vpack.c.bf16 %v2427_v30, %v2425_v29 }
 0x75f   :  { %v2053_v27 = vpop.f32.mrf.mxu0 }
 0x760   :  { %v4171_v24 = vpack.c.bf16 %v2165_v18, %v2164_v22  ;;  %v2580_v26 = vunpack.c.l.b16 %v2496_v39  ;;  %4395 = vst [vmem:[#allocation18 + $0x18] sm:$0xff] %v4206_v0   ;;  %v2054_v56 = vadd.f32 %v2053_v27, %v1964_v10  ;;  %v2197_v45 = vpack.c.bf16 %v2165_v18, %v2165_v18  ;;  %v1974_v30 = vpop.f32.mrf.mxu3 }
 0x762   :  { %4389 = vst [vmem:[#allocation17 + $0x60] sm:$0xff] %v4171_v24   ;;  %v2098_v49 = vmul.f32 %v5661_v15, %v2054_v56  ;;  %v2608_v1 = vpack.c.b16 %v2580_v26, %v2579_v16  ;;  %v2313_v41 = vunpack.c.l.b16 %v2197_v45 }
 0x763   :  { %v2429_v44 = vpop.f32.mrf.mxu1 }
 0x764   :  { %2708 = vmatmul.bf16.gmra.mxu2 %v2608_v1  ;;  %v2332_v4 = vpack.c.b16 %v2313_v41, %v2312_v40  ;;  %v2134_v55 = vadd.f32 %v5668_v6, %v2098_v49  ;;  %v2430_v9 = vadd.f32 %v5802_v53, %v2429_v44 }
 0x766   :  { %2468 = vmatmul.bf16.gmra.mxu1 %v2332_v4  ;;  %v2166_v7 = vmax.f32 %v2134_v55, 0.0  ;;  %v2497_v38 = vpack.c.bf16 %v2430_v9, %v2430_v9  ;;  %v5883_v55 = vpop.permute.xlu0 %2904 }
 0x767   :  { %v2055_v60 = vpop.f32.mrf.mxu0 }
 0x768   :  { %v2056_v28 = vadd.f32 %v2055_v60, %v1966_v17  ;;  %v2198_v33 = vpack.c.bf16 %v2166_v7, %v2166_v7  ;;  %v2581_v21 = vunpack.c.l.b16 %v2497_v38 }
 0x76a   :  { %v2099_v19 = vmul.f32 %v5661_v15, %v2056_v28  ;;  %v2314_v42 = vunpack.c.l.b16 %v2198_v33 }
 0x76b   :  { %v2431_v35 = vpop.f32.mrf.mxu1 }
 0x76c   :  { %v2135_v12 = vadd.f32 %v5668_v6, %v2099_v19  ;;  %v2432_v37 = vadd.f32 %v5802_v53, %v2431_v35 }
 0x76e   :  { %v2167_v11 = vmax.f32 %v2135_v12, 0.0  ;;  %v2498_v23 = vpack.c.bf16 %v2432_v37, %v2432_v37  ;;  %v4211_v62 = vpack.c.bf16 %v2432_v37, %v2430_v9  ;;  %v1976_v9 = vpop.f32.mrf.mxu3 }
 0x76f   :  { %v2058_v47 = vpop.f32.mrf.mxu0 }
 0x770   :  { %v4176_v61 = vpack.c.bf16 %v2167_v11, %v2166_v7  ;;  %v2582_v8 = vunpack.c.l.b16 %v2498_v23  ;;  %4396 = vst [vmem:[#allocation18 + $0x20] sm:$0xff] %v4211_v62   ;;  %v2059_v51 = vadd.f32 %v2058_v47, %v1969_v20  ;;  %v2199_v2 = vpack.c.bf16 %v2167_v11, %v2167_v11  ;;  %v2885_v11 = vld [vmem:[%s6327_s17 + $0x78] sm:$0xff]  ;;  %v5892_v23 = vpop.permute.xlu1 %2914 }
 0x771   :  { %2979 = vperm.xlu1 %4472, %v2885_v11   ;;  %3192 = vperm.xlu2 %4471, %v2885_v11  }
 0x772   :  { %4390 = vst [vmem:[#allocation17 + $0x68] sm:$0xff] %v4176_v61   ;;  %v2100_v34 = vmul.f32 %v5661_v15, %v2059_v51  ;;  %v2609_v13 = vpack.c.b16 %v2582_v8, %v2581_v21  ;;  %v2315_v43 = vunpack.c.l.b16 %v2199_v2 }
 0x773   :  { %v2434_v52 = vpop.f32.mrf.mxu1 }
 0x774   :  { %2713 = vmatmul.bf16.gmra.mxu2 %v2609_v13  ;;  %v2333_v10 = vpack.c.b16 %v2315_v43, %v2314_v42  ;;  %v2136_v50 = vadd.f32 %v5668_v6, %v2100_v34  ;;  %v2435_v63 = vadd.f32 %v5802_v53, %v2434_v52  ;;  %v5896_v52 = vpop.permute.xlu2 %2924 }
 0x776   :  { %2473 = vmatmul.bf16.gmra.mxu1 %v2333_v10  ;;  %v2168_v57 = vmax.f32 %v2136_v50, 0.0  ;;  %v2499_v46 = vpack.c.bf16 %v2435_v63, %v2435_v63 }
 0x777   :  { %v2060_v29 = vpop.f32.mrf.mxu0 }
 0x778   :  { %v2061_v14 = vadd.f32 %v2060_v29, %v1971_v31  ;;  %v2200_v59 = vpack.c.bf16 %v2168_v57, %v2168_v57  ;;  %v2583_v16 = vunpack.c.l.b16 %v2499_v46  ;;  %v5901_v31 = vpop.permute.xlu1 %2919 }
 0x779   :  { %4473 = vset.pattern.permute.xlu1 %v4870_v54  ;;  %4475 = vset.pattern.permute.xlu2 %v4869_v3 }
 0x77a   :  { %v2101_v22 = vmul.f32 %v5661_v15, %v2061_v14  ;;  %v2316_v1 = vunpack.c.l.b16 %v2200_v59  ;;  %3188 = vperm.xlu1 %4473, %v5846_v48  }
 0x77b   :  { %v2436_v58 = vpop.f32.mrf.mxu1 }
 0x77c   :  { %v2137_v36 = vadd.f32 %v5668_v6, %v2101_v22  ;;  %v2437_v32 = vadd.f32 %v5802_v53, %v2436_v58  ;;  %v5908_v46 = vpop.permute.xlu2 %2929 }
 0x77e   :  { %v2169_v18 = vmax.f32 %v2137_v36, 0.0  ;;  %v2500_v39 = vpack.c.bf16 %v2437_v32, %v2437_v32  ;;  %v4216_v0 = vpack.c.bf16 %v2437_v32, %v2435_v63 }
 0x77f   :  { %v2063_v27 = vpop.f32.mrf.mxu0 }
 0x780   :  { %v4181_v17 = vpack.c.bf16 %v2169_v18, %v2168_v57  ;;  %v2584_v24 = vunpack.c.l.b16 %v2500_v39  ;;  %4397 = vst [vmem:[#allocation18 + $0x28] sm:$0xff] %v4216_v0   ;;  %v2064_v26 = vadd.f32 %v2063_v27, %v1974_v30  ;;  %v2201_v56 = vpack.c.bf16 %v2169_v18, %v2169_v18  ;;  %v5910_v36 = vpop.permute.xlu1 %2939  ;;  %v2887_v18 = vld [vmem:[%s6327_s17 + $0x88] sm:$0xff]  ;;  %v2889_v27 = vld [vmem:[%s6327_s17 + $0x98] sm:$0xff] }
 0x781   :  { %3200 = vperm.xlu0 %4488, %v2887_v18  }
 0x782   :  { %4391 = vst [vmem:[#allocation17 + $0x70] sm:$0xff] %v4181_v17   ;;  %v2102_v45 = vmul.f32 %v5661_v15, %v2064_v26  ;;  %v2610_v49 = vpack.c.b16 %v2584_v24, %v2583_v16  ;;  %v2317_v40 = vunpack.c.l.b16 %v2201_v56  ;;  %4474 = vset.pattern.permute.xlu1 %v4869_v3 }
 0x783   :  { %v2439_v41 = vpop.f32.mrf.mxu1  ;;  %2989 = vperm.xlu1 %4474, %v2887_v18  }
 0x784   :  { %2718 = vmatmul.bf16.gmra.mxu2 %v2610_v49  ;;  %v2334_v44 = vpack.c.b16 %v2317_v40, %v2316_v1  ;;  %v2138_v4 = vadd.f32 %v5668_v6, %v2102_v45  ;;  %v2440_v28 = vadd.f32 %v5802_v53, %v2439_v41  ;;  %v5918_v59 = vpop.permute.xlu2 %2944 }
 0x786   :  { %2478 = vmatmul.bf16.gmra.mxu1 %v2334_v44  ;;  %v2170_v7 = vmax.f32 %v2138_v4, 0.0  ;;  %v2501_v35 = vpack.c.bf16 %v2440_v28, %v2440_v28 }
 0x787   :  { %v2065_v60 = vpop.f32.mrf.mxu0 }
 0x788   :  { %v2066_v20 = vadd.f32 %v2065_v60, %v1976_v9  ;;  %v2202_v47 = vpack.c.bf16 %v2170_v7, %v2170_v7  ;;  %v2585_v61 = vunpack.c.l.b16 %v2501_v35  ;;  %v5923_v17 = vpop.permute.xlu1 %2954  ;;  %v2888_v9 = vld [vmem:[%s6327_s17 + $0x90] sm:$0xff]  ;;  %v5942_v35 = vld [vmem:[%s6324_s14] ss:$0 sm:$0xff] }
 0x789   :  { %2994 = vperm.xlu2 %4475, %v2888_v9  }
 0x78a   :  { %v2103_v19 = vmul.f32 %v5661_v15, %v2066_v20  ;;  %v2318_v34 = vunpack.c.l.b16 %v2202_v47 }
 0x78b   :  { %v2441_v38 = vpop.f32.mrf.mxu1  ;;  %2999 = vperm.xlu1 %4474, %v2889_v27  }
 0x78c   :  { %v2139_v12 = vadd.f32 %v5668_v6, %v2103_v19  ;;  %v2442_v37 = vadd.f32 %v5802_v53, %v2441_v38  ;;  %v5894_v6 = vpop.permute.xlu0 %2909  ;;  %v5928_v4 = vpop.permute.xlu2 %2959 }
 0x78e   :  { %v2171_v62 = vmax.f32 %v2139_v12, 0.0  ;;  %v2502_v33 = vpack.c.bf16 %v2442_v37, %v2442_v37  ;;  %v4221_v21 = vpack.c.bf16 %v2442_v37, %v2440_v28  ;;  %v5949_v37 = vld [vmem:[%s6327_s17 + $0xa0] sm:$0xff] }
 0x790   :  { %v4186_v15 = vpack.c.bf16 %v2171_v62, %v2170_v7  ;;  %v2586_v8 = vunpack.c.l.b16 %v2502_v33  ;;  %4398 = vst [vmem:[#allocation18 + $0x30] sm:$0xff] %v4221_v21   ;;  %v2203_v51 = vpack.c.bf16 %v2171_v62, %v2171_v62  ;;  %v5934_v60 = vpop.permute.xlu1 %2969  ;;  %v2893_v21 = vld [vmem:[%s6327_s17 + $0xb8] sm:$0xff] }
 0x791   :  { %4476 = vset.pattern.permute.xlu2 %v4870_v54  ;;  %3224 = vperm.xlu0 %4488, %v2893_v21  }
 0x792   :  { %4392 = vst [vmem:[#allocation17 + $0x78] sm:$0xff] %v4186_v15   ;;  %v2611_v2 = vpack.c.b16 %v2586_v8, %v2585_v61  ;;  %v2319_v13 = vunpack.c.l.b16 %v2203_v51  ;;  %3196 = vperm.xlu2 %4476, %v5767_v5  }
 0x793   :  { %v2444_v42 = vpop.f32.mrf.mxu1  ;;  %4477 = vset.pattern.permute.xlu1 %v4870_v54 }
 0x794   :  { %2723 = vmatmul.bf16.gmra.mxu2 %v2611_v2  ;;  %v2335_v43 = vpack.c.b16 %v2319_v13, %v2318_v34  ;;  %v2445_v10 = vadd.f32 %v5802_v53, %v2444_v42  ;;  %v5904_v50 = vpop.permute.xlu0 %2934  ;;  %3204 = vperm.xlu1 %4477, %v2888_v9   ;;  %v5952_v11 = vpop.permute.xlu2 %2974 }
 0x796   :  { %2483 = vmatmul.bf16.gmra.mxu1 %v2335_v43  ;;  %v2503_v29 = vpack.c.bf16 %v2445_v10, %v2445_v10 }
 0x798   :  { %v2587_v58 = vunpack.c.l.b16 %v2503_v29  ;;  %v3137_v61 = vpop.permute.xlu1 %3136 }
 0x79a   :  { %3208 = vperm.xlu2 %4476, %v2889_v27   ;;  %v5990_v27 = vld [vmem:[%s6327_s17 + $0xd8] sm:$0xff] }
 0x79b   :  { %v2446_v63 = vpop.f32.mrf.mxu1 }
 0x79c   :  { %v2447_v14 = vadd.f32 %v5802_v53, %v2446_v63  ;;  %v5915_v39 = vpop.permute.xlu0 %2949  ;;  %4478 = vset.pattern.permute.xlu1 %v4869_v3  ;;  %v3141_v29 = vpop.permute.xlu2 %3140 }
 0x79d   :  { %3004 = vperm.xlu1 %4478, %v5949_v37  }
 0x79e   :  { %v2504_v57 = vpack.c.bf16 %v2447_v14, %v2447_v14  ;;  %v4226_v22 = vpack.c.bf16 %v2447_v14, %v2445_v10  ;;  %v2894_v10 = vld [vmem:[%s6327_s17 + $0xc0] sm:$0xff] }
 0x79f   :  { %3228 = vperm.xlu0 %4488, %v2894_v10  }
 0x7a0   :  { %v2588_v48 = vunpack.c.l.b16 %v2504_v57  ;;  %4399 = vst [vmem:[#allocation18 + $0x38] sm:$0xff] %v4226_v22  }
 0x7a2   :  { %v2612_v32 = vpack.c.b16 %v2588_v48, %v2587_v58  ;;  %4479 = vset.pattern.permute.xlu2 %v4869_v3 }
 0x7a3   :  { %v2449_v30 = vpop.f32.mrf.mxu1 }
 0x7a4   :  { %2728 = vmatmul.bf16.gmra.mxu2 %v2612_v32  ;;  %v2450_v0 = vadd.f32 %v5802_v53, %v2449_v30  ;;  %v5926_v49 = vpop.permute.xlu0 %2964 }
 0x7a5   :  { %3019 = vperm.xlu1 %4478, %v2893_v21  }
 0x7a6   :  { %v2505_v24 = vpack.c.bf16 %v2450_v0, %v2450_v0 }
 0x7a7   :  { %3240 = vperm.xlu0 %4488, %v5990_v27  }
 0x7a8   :  { %v2589_v1 = vunpack.c.l.b16 %v2505_v24 }
 0x7ab   :  { %v2451_v16 = vpop.f32.mrf.mxu1 }
 0x7ac   :  { %v2452_v26 = vadd.f32 %v5802_v53, %v2451_v16  ;;  %v5937_v7 = vpop.permute.xlu0 %2984  ;;  %v2891_v16 = vld [vmem:[%s6327_s17 + $0xa8] sm:$0xff] }
 0x7ad   :  { %4481 = vset.pattern.permute.xlu1 %v4870_v54  ;;  %3009 = vperm.xlu2 %4479, %v2891_v16  }
 0x7ae   :  { %v2506_v56 = vpack.c.bf16 %v2452_v26, %v2452_v26  ;;  %v4231_v45 = vpack.c.bf16 %v2452_v26, %v2450_v0  ;;  %3216 = vperm.xlu1 %4481, %v2891_v16   ;;  %v3145_v26 = vpop.permute.xlu1 %3144 }
 0x7b0   :  { %v2590_v40 = vunpack.c.l.b16 %v2506_v56  ;;  %4400 = vst [vmem:[#allocation18 + $0x40] sm:$0xff] %v4231_v45  }
 0x7b2   :  { %v2613_v41 = vpack.c.b16 %v2590_v40, %v2589_v1 }
 0x7b3   :  { %v2454_v44 = vpop.f32.mrf.mxu1 }
 0x7b4   :  { %2733 = vmatmul.bf16.gmra.mxu2 %v2613_v41  ;;  %v2455_v20 = vadd.f32 %v5802_v53, %v2454_v44  ;;  %v5967_v42 = vpop.permute.xlu0 %3014 }
 0x7b5   :  { %4480 = vset.pattern.permute.xlu2 %v4870_v54 }
 0x7b6   :  { %v2507_v38 = vpack.c.bf16 %v2455_v20, %v2455_v20  ;;  %4482 = vset.pattern.permute.xlu1 %v4869_v3  ;;  %3212 = vperm.xlu2 %4480, %v5949_v37  }
 0x7b7   :  { %v2694_v28 = vpop.f32.mrf.mxu2  ;;  %3024 = vperm.xlu1 %4482, %v2894_v10  }
 0x7b8   :  { %v2591_v15 = vunpack.c.l.b16 %v2507_v38  ;;  %v2695_v8 = vadd.f32 %v5942_v35, %v2694_v28  ;;  %v6004_v28 = vld [vmem:[%s6327_s17 + $0xf8] sm:$0xff]  ;;  %v3149_v38 = vpop.permute.xlu2 %3148 }
 0x7b9   :  { %3256 = vperm.xlu0 %4488, %v6004_v28  }
 0x7ba   :  { %v6016_v21 = vadd.f32 %v5883_v55, %v2695_v8 }
 0x7bb   :  { %v2456_v19 = vpop.f32.mrf.mxu1 }
 0x7bc   :  { %v2457_v12 = vadd.f32 %v5802_v53, %v2456_v19  ;;  %v5980_v30 = vpop.permute.xlu0 %3054 }
 0x7be   :  { %v2508_v62 = vpack.c.bf16 %v2457_v12, %v2457_v12  ;;  %v4236_v33 = vpack.c.bf16 %v2457_v12, %v2455_v20  ;;  %3220 = vperm.xlu2 %4480, %v5781_v25  }
 0x7bf   :  { %v2696_v47 = vpop.f32.mrf.mxu2 }
 0x7c0   :  { %v2592_v51 = vunpack.c.l.b16 %v2508_v62  ;;  %4401 = vst [vmem:[#allocation18 + $0x48] sm:$0xff] %v4236_v33   ;;  %v5961_v2 = vadd.f32 %v5942_v35, %v2696_v47 }
 0x7c2   :  { %v4271_v34 = vpack.c.bf16 %v5961_v2, %v2695_v8  ;;  %v2614_v13 = vpack.c.b16 %v2592_v51, %v2591_v15  ;;  %v5965_v5 = vadd.f32 %v3137_v61, %v5961_v2 }
 0x7c3   :  { %v2459_v43 = vpop.f32.mrf.mxu1 }
 0x7c4   :  { %4272 = vst [vmem:[#allocation20] sm:$0xff] %v4271_v34   ;;  %2738 = vmatmul.bf16.gmra.mxu2 %v2614_v13  ;;  %v2460_v14 = vadd.f32 %v5802_v53, %v2459_v43  ;;  %v3133_v20 = vpop.permute.xlu0 %3132 }
 0x7c5   :  { %v6020_v61 = vadd.f32 %v3133_v20, %v2695_v8 }
 0x7c6   :  { %v2509_v48 = vpack.c.bf16 %v2460_v14, %v2460_v14  ;;  %4483 = vset.pattern.permute.xlu2 %v4869_v3 }
 0x7c7   :  { %v2699_v63 = vpop.f32.mrf.mxu2 }
 0x7c8   :  { %v5974_v57 = vadd.f32 %v5942_v35, %v2699_v63  ;;  %v2593_v56 = vunpack.c.l.b16 %v2509_v48 }
 0x7ca   :  { %v5977_v22 = vadd.f32 %v3141_v29, %v5974_v57 }
 0x7cb   :  { %v2461_v58 = vpop.f32.mrf.mxu1 }
 0x7cc   :  { %v2462_v32 = vadd.f32 %v5802_v53, %v2461_v58  ;;  %v3153_v63 = vpop.permute.xlu0 %3152 }
 0x7ce   :  { %v2510_v18 = vpack.c.bf16 %v2462_v32, %v2462_v32  ;;  %v4241_v0 = vpack.c.bf16 %v2462_v32, %v2460_v14  ;;  %v6031_v14 = vadd.f32 %v5894_v6, %v5961_v2  ;;  %v2896_v6 = vld [vmem:[%s6327_s17 + $0xd0] sm:$0xff] }
 0x7cf   :  { %v2701_v24 = vpop.f32.mrf.mxu2  ;;  %3034 = vperm.xlu1 %4482, %v2896_v6  }
 0x7d0   :  { %v2594_v45 = vunpack.c.l.b16 %v2510_v18  ;;  %4402 = vst [vmem:[#allocation18 + $0x50] sm:$0xff] %v4241_v0   ;;  %v5993_v1 = vadd.f32 %v5942_v35, %v2701_v24  ;;  %v3157_v24 = vpop.permute.xlu1 %3156 }
 0x7d2   :  { %v4276_v40 = vpack.c.bf16 %v5993_v1, %v5974_v57  ;;  %v2615_v41 = vpack.c.b16 %v2594_v45, %v2593_v56  ;;  %v5999_v44 = vadd.f32 %v3145_v26, %v5993_v1  ;;  %v6050_v56 = vadd.f32 %v5892_v23, %v5974_v57  ;;  %v2895_v23 = vld [vmem:[%s6327_s17 + $0xc8] sm:$0xff]  ;;  %v3161_v57 = vpop.permute.xlu2 %3160 }
 0x7d3   :  { %v2464_v9 = vpop.f32.mrf.mxu1  ;;  %3029 = vperm.xlu2 %4483, %v2895_v23  }
 0x7d4   :  { %4408 = vst [vmem:[#allocation20 + $0x8] sm:$0xff] %v4276_v40   ;;  %2743 = vmatmul.bf16.gmra.mxu2 %v2615_v41  ;;  %v2465_v12 = vadd.f32 %v5802_v53, %v2464_v9 }
 0x7d6   :  { %v2511_v51 = vpack.c.bf16 %v2465_v12, %v2465_v12 }
 0x7d7   :  { %v2704_v19 = vpop.f32.mrf.mxu2  ;;  %4484 = vset.pattern.permute.xlu1 %v4870_v54 }
 0x7d8   :  { %v2705_v62 = vadd.f32 %v5942_v35, %v2704_v19  ;;  %v2595_v55 = vunpack.c.l.b16 %v2511_v51  ;;  %3232 = vperm.xlu1 %4484, %v2895_v23  }
 0x7da   :  { %v6013_v33 = vadd.f32 %v5896_v52, %v2705_v62  ;;  %v6018_v47 = vadd.f32 %v3149_v38, %v2705_v62 }
 0x7db   :  { %v2466_v15 = vpop.f32.mrf.mxu1  ;;  %3039 = vperm.xlu2 %4483, %v5990_v27  }
 0x7dc   :  { %v2467_v34 = vadd.f32 %v5802_v53, %v2466_v15  ;;  %v3094_v13 = vmax.f32 %v6016_v21, %v6013_v33  ;;  %v3291_v37 = vmax.f32 %v6020_v61, %v6018_v47 }
 0x7de   :  { %v2512_v43 = vpack.c.bf16 %v2467_v34, %v2467_v34  ;;  %v4246_v52 = vpack.c.bf16 %v2467_v34, %v2465_v12 }
 0x7df   :  { %v2706_v10 = vpop.f32.mrf.mxu2 }
 0x7e0   :  { %v2596_v29 = vunpack.c.l.b16 %v2512_v43  ;;  %4403 = vst [vmem:[#allocation18 + $0x58] sm:$0xff] %v4246_v52   ;;  %v2707_v8 = vadd.f32 %v5942_v35, %v2706_v10  ;;  %v6069_v43 = vadd.f32 %v5901_v31, %v5993_v1  ;;  %4486 = vset.pattern.permute.xlu1 %v4869_v3  ;;  %v3165_v31 = vpop.permute.xlu0 %3164 }
 0x7e2   :  { %v4281_v58 = vpack.c.bf16 %v2707_v8, %v2705_v62  ;;  %v2616_v48 = vpack.c.b16 %v2596_v29, %v2595_v55  ;;  %v6034_v32 = vadd.f32 %v5908_v46, %v2707_v8  ;;  %v6036_v18 = vadd.f32 %v3153_v63, %v2707_v8 }
 0x7e3   :  { %v2469_v0 = vpop.f32.mrf.mxu1  ;;  %4485 = vset.pattern.permute.xlu2 %v4870_v54 }
 0x7e4   :  { %4409 = vst [vmem:[#allocation20 + $0x10] sm:$0xff] %v4281_v58   ;;  %2748 = vmatmul.bf16.gmra.mxu2 %v2616_v48  ;;  %v3095_v16 = vmax.f32 %v6031_v14, %v6034_v32  ;;  %v3292_v25 = vmax.f32 %v5965_v5, %v6036_v18  ;;  %v2470_v46 = vadd.f32 %v5802_v53, %v2469_v0  ;;  %v2899_v14 = vld [vmem:[%s6327_s17 + $0xe8] sm:$0xff] }
 0x7e5   :  { %3236 = vperm.xlu2 %4485, %v2896_v6  }
 0x7e6   :  { %v2513_v9 = vpack.c.bf16 %v2470_v46, %v2470_v46 }
 0x7e7   :  { %v2709_v2 = vpop.f32.mrf.mxu2 }
 0x7e8   :  { %v2710_v26 = vadd.f32 %v5942_v35, %v2709_v2  ;;  %v2597_v15 = vunpack.c.l.b16 %v2513_v9  ;;  %v2898_v9 = vld [vmem:[%s6327_s17 + $0xe0] sm:$0xff] }
 0x7e9   :  { %3044 = vperm.xlu1 %4486, %v2898_v9  }
 0x7ea   :  { %v6052_v45 = vadd.f32 %v3157_v24, %v2710_v26  ;;  %v6055_v40 = vadd.f32 %v5904_v50, %v2710_v26 }
 0x7eb   :  { %v2471_v41 = vpop.f32.mrf.mxu1 }
 0x7ec   :  { %v2472_v20 = vadd.f32 %v5802_v53, %v2471_v41  ;;  %v3293_v19 = vmax.f32 %v5977_v22, %v6052_v45  ;;  %v3096_v38 = vmax.f32 %v6050_v56, %v6055_v40 }
 0x7ed   :  { %4487 = vset.pattern.permute.xlu2 %v4869_v3 }
 0x7ee   :  { %v2514_v12 = vpack.c.bf16 %v2472_v20, %v2472_v20  ;;  %v4251_v62 = vpack.c.bf16 %v2472_v20, %v2470_v46  ;;  %3049 = vperm.xlu2 %4487, %v2899_v14  }
 0x7ef   :  { %v2711_v50 = vpop.f32.mrf.mxu2 }
 0x7f0   :  { %v2598_v51 = vunpack.c.l.b16 %v2514_v12  ;;  %4404 = vst [vmem:[#allocation18 + $0x60] sm:$0xff] %v4251_v62   ;;  %v2712_v34 = vadd.f32 %v5942_v35, %v2711_v50  ;;  %v3169_v62 = vpop.permute.xlu1 %3168 }
 0x7f1   :  { %3059 = vperm.xlu1 %4486, %v6004_v28  }
 0x7f2   :  { %v4286_v52 = vpack.c.bf16 %v2712_v34, %v2710_v26  ;;  %v2617_v10 = vpack.c.b16 %v2598_v51, %v2597_v15  ;;  %v6072_v63 = vadd.f32 %v5910_v36, %v2712_v34  ;;  %v6074_v55 = vadd.f32 %v3161_v57, %v2712_v34  ;;  %v3173_v51 = vpop.permute.xlu2 %3172 }
 0x7f3   :  { %v2474_v29 = vpop.f32.mrf.mxu1 }
 0x7f4   :  { %4410 = vst [vmem:[#allocation20 + $0x18] sm:$0xff] %v4286_v52   ;;  %2753 = vmatmul.bf16.gmra.mxu2 %v2617_v10  ;;  %v3097_v8 = vmax.f32 %v6069_v43, %v6072_v63  ;;  %v3294_v58 = vmax.f32 %v5999_v44, %v6074_v55  ;;  %v2475_v36 = vadd.f32 %v5802_v53, %v2474_v29  ;;  %v3177_v29 = vpop.permute.xlu0 %3176  ;;  %v4505_v55 = vld [vmem:[%s6327_s17 + $0xf0] sm:$0xff]  ;;  %s4876_s17 = smov [#allocation20]  }
 0x7f5   :  { %s3441_s18 = sshll.u32 %s4876_s17, 4  ;;  %s3442_s18 = int_to_ptr.vmem [resolvable:$true] %s3441_s18 }
 0x7f6   :  { %v2515_v46 = vpack.c.bf16 %v2475_v36, %v2475_v36  ;;  %4489 = vset.pattern.permute.xlu2 %v4870_v54 }
 0x7f7   :  { %v2714_v48 = vpop.f32.mrf.mxu2  ;;  %3244 = vperm.xlu2 %4489, %v2898_v9  }
 0x7f8   :  { %v2715_v1 = vadd.f32 %v5942_v35, %v2714_v48  ;;  %v2599_v23 = vunpack.c.l.b16 %v2515_v46 }
 0x7f9   :  { %4490 = vset.pattern.permute.xlu1 %v4870_v54 }
 0x7fa   :  { %v3070_v0 = vadd.f32 %v5918_v59, %v2715_v1  ;;  %v3267_v2 = vadd.f32 %v3165_v31, %v2715_v1  ;;  %3248 = vperm.xlu1 %4490, %v2899_v14  }
 0x7fb   :  { %v2476_v24 = vpop.f32.mrf.mxu1 }
 0x7fc   :  { %v2477_v26 = vadd.f32 %v5802_v53, %v2476_v24  ;;  %v6089_v41 = vmax.f32 %v3094_v13, %v3070_v0  ;;  %v6094_v27 = vmax.f32 %v3291_v37, %v3267_v2  ;;  %v4504_v0 = vld [vmem:[%s6322_s12] ss:$0 sm:$0xff]  ;;  %s3415_s12 = sshll.u32 %s4875_s26, 4  ;;  %s3416_s12 = int_to_ptr.vmem [resolvable:$true] %s3415_s12 }
 0x7fd   :  { %3423 = dma.vmem_to_hbm [thread:$0]  %s3416_s12, 2048, %s3418_s23, [#allocation16], %s4859_s3, %s4859_s3, %s4860_s25  }
 0x7fe   :  { %v2516_v59 = vpack.c.bf16 %v2477_v26, %v2477_v26  ;;  %v4256_v20 = vpack.c.bf16 %v2477_v26, %v2475_v36 }
 0x7ff   :  { %v2716_v12 = vpop.f32.mrf.mxu2  ;;  %3252 = vperm.xlu2 %4489, %v4505_v55  }
 0x800   :  { %v2600_v33 = vunpack.c.l.b16 %v2516_v59  ;;  %4405 = vst [vmem:[#allocation18 + $0x68] sm:$0xff] %v4256_v20   ;;  %v2717_v21 = vadd.f32 %v5942_v35, %v2716_v12  ;;  %v3185_v12 = vpop.permute.xlu0 %3184 }
 0x802   :  { %v4291_v47 = vpack.c.bf16 %v2717_v21, %v2715_v1  ;;  %v2618_v61 = vpack.c.b16 %v2600_v33, %v2599_v23  ;;  %v3268_v13 = vadd.f32 %v3169_v62, %v2717_v21  ;;  %v3071_v37 = vadd.f32 %v5915_v39, %v2717_v21 }
 0x803   :  { %v2479_v50 = vpop.f32.mrf.mxu1 }
 0x804   :  { %4411 = vst [vmem:[#allocation20 + $0x20] sm:$0xff] %v4291_v47   ;;  %2758 = vmatmul.bf16.gmra.mxu2 %v2618_v61  ;;  %v6105_v57 = vmax.f32 %v3095_v16, %v3071_v37  ;;  %v6110_v15 = vmax.f32 %v3292_v25, %v3268_v13  ;;  %v2480_v34 = vadd.f32 %v5802_v53, %v2479_v50 }
 0x806   :  { %v2517_v18 = vpack.c.bf16 %v2480_v34, %v2480_v34 }
 0x807   :  { %v2719_v6 = vpop.f32.mrf.mxu2 }
 0x808   :  { %v2720_v39 = vadd.f32 %v5942_v35, %v2719_v6  ;;  %v2601_v48 = vunpack.c.l.b16 %v2517_v18 }
 0x80a   :  { %v3072_v52 = vadd.f32 %v5923_v17, %v2720_v39  ;;  %v3269_v32 = vadd.f32 %v3173_v51, %v2720_v39 }
 0x80b   :  { %v2481_v5 = vpop.f32.mrf.mxu1 }
 0x80c   :  { %v2482_v28 = vadd.f32 %v5802_v53, %v2481_v5  ;;  %v6124_v16 = vmax.f32 %v3096_v38, %v3072_v52  ;;  %v6129_v3 = vmax.f32 %v3293_v19, %v3269_v32 }
 0x80e   :  { %v2518_v17 = vpack.c.bf16 %v2482_v28, %v2482_v28  ;;  %v4261_v25 = vpack.c.bf16 %v2482_v28, %v2480_v34 }
 0x80f   :  { %v2721_v10 = vpop.f32.mrf.mxu2 }
 0x810   :  { %v2602_v31 = vunpack.c.l.b16 %v2518_v17  ;;  %4406 = vst [vmem:[#allocation18 + $0x70] sm:$0xff] %v4261_v25   ;;  %v2722_v53 = vadd.f32 %v5942_v35, %v2721_v10 }
 0x812   :  { %v4296_v56 = vpack.c.bf16 %v2722_v53, %v2720_v39  ;;  %v3073_v40 = vadd.f32 %v5928_v4, %v2722_v53  ;;  %v2619_v38 = vpack.c.b16 %v2602_v31, %v2601_v48  ;;  %v3270_v36 = vadd.f32 %v3177_v29, %v2722_v53  ;;  %v3181_v4 = vpop.permute.xlu2 %3180 }
 0x813   :  { %v2484_v22 = vpop.f32.mrf.mxu1 }
 0x814   :  { %4412 = vst [vmem:[#allocation20 + $0x28] sm:$0xff] %v4296_v56   ;;  %2763 = vmatmul.bf16.gmra.mxu2 %v2619_v38  ;;  %v6138_v45 = vmax.f32 %v3097_v8, %v3073_v40  ;;  %v6143_v19 = vmax.f32 %v3294_v58, %v3270_v36  ;;  %v2485_v54 = vadd.f32 %v4504_v0, %v2484_v22  ;;  %v2980_v8 = vpop.permute.xlu1 %2979  ;;  %v3201_v56 = vpop.permute.xlu0 %3200 }
 0x816   :  { %v2519_v46 = vpack.c.bf16 %v2485_v54, %v2485_v54 }
 0x817   :  { %v2724_v1 = vpop.f32.mrf.mxu2 }
 0x818   :  { %v2725_v2 = vadd.f32 %v5942_v35, %v2724_v1  ;;  %v2603_v62 = vunpack.c.l.b16 %v2519_v46 }
 0x81a   :  { %v3271_v24 = vadd.f32 %v3181_v4, %v2725_v2  ;;  %v3074_v43 = vadd.f32 %v5926_v49, %v2725_v2  ;;  %v3193_v61 = vpop.permute.xlu2 %3192 }
 0x81b   :  { %v2486_v63 = vpop.f32.mrf.mxu1 }
 0x81c   :  { %v2487_v26 = vadd.f32 %v4504_v0, %v2486_v63  ;;  %v3102_v44 = vmax.f32 %v6089_v41, %v3074_v43  ;;  %v3299_v58 = vmax.f32 %v6094_v27, %v3271_v24  ;;  %v3189_v37 = vpop.permute.xlu1 %3188 }
 0x81e   :  { %v2520_v9 = vpack.c.bf16 %v2487_v26, %v2487_v26  ;;  %v4266_v59 = vpack.c.bf16 %v2487_v26, %v2485_v54 }
 0x81f   :  { %v2726_v20 = vpop.f32.mrf.mxu2 }
 0x820   :  { %v2604_v23 = vunpack.c.l.b16 %v2520_v9  ;;  %4407 = vst [vmem:[#allocation18 + $0x78] sm:$0xff] %v4266_v59   ;;  %v2727_v49 = vadd.f32 %v5942_v35, %v2726_v20 }
 0x822   :  { %v4301_v33 = vpack.c.bf16 %v2727_v49, %v2725_v2  ;;  %v3075_v21 = vadd.f32 %v5934_v60, %v2727_v49  ;;  %v2620_v41 = vpack.c.b16 %v2604_v23, %v2603_v62  ;;  %v3272_v47 = vadd.f32 %v3185_v12, %v2727_v49  ;;  %v2995_v52 = vpop.permute.xlu2 %2994 }
 0x824   :  { %4413 = vst [vmem:[#allocation20 + $0x30] sm:$0xff] %v4301_v33   ;;  %2768 = vmatmul.bf16.gmra.mxu2 %v2620_v41  ;;  %v3103_v13 = vmax.f32 %v6105_v57, %v3075_v21  ;;  %v3300_v27 = vmax.f32 %v6110_v15, %v3272_v47  ;;  %v2990_v14 = vpop.permute.xlu1 %2989 }
 0x827   :  { %v2729_v50 = vpop.f32.mrf.mxu2 }
 0x828   :  { %v2730_v6 = vadd.f32 %v5942_v35, %v2729_v50 }
 0x82a   :  { %v3076_v51 = vadd.f32 %v5952_v11, %v2730_v6  ;;  %v3273_v34 = vadd.f32 %v3189_v37, %v2730_v6  ;;  %v3197_v25 = vpop.permute.xlu2 %3196 }
 0x82c   :  { %v3301_v39 = vmax.f32 %v6129_v3, %v3273_v34  ;;  %v3104_v60 = vmax.f32 %v6124_v16, %v3076_v51  ;;  %v3000_v10 = vpop.permute.xlu1 %2999 }
 0x82f   :  { %v2731_v32 = vpop.f32.mrf.mxu2 }
 0x830   :  { %v2732_v5 = vadd.f32 %v5942_v35, %v2731_v32 }
 0x832   :  { %v4306_v18 = vpack.c.bf16 %v2732_v5, %v2730_v6  ;;  %v3077_v57 = vadd.f32 %v2980_v8, %v2732_v5  ;;  %v3274_v28 = vadd.f32 %v3193_v61, %v2732_v5 }
 0x834   :  { %4414 = vst [vmem:[#allocation20 + $0x38] sm:$0xff] %v4306_v18   ;;  %v3105_v15 = vmax.f32 %v6138_v45, %v3077_v57  ;;  %v3302_v17 = vmax.f32 %v6143_v19, %v3274_v28  ;;  %v3205_v38 = vpop.permute.xlu1 %3204  ;;  %v3209_v19 = vpop.permute.xlu2 %3208 }
 0x837   :  { %v2734_v11 = vpop.f32.mrf.mxu2 }
 0x838   :  { %v2735_v3 = vadd.f32 %v5942_v35, %v2734_v11 }
 0x83a   :  { %v3078_v29 = vadd.f32 %v5937_v7, %v2735_v3  ;;  %v3275_v16 = vadd.f32 %v3197_v25, %v2735_v3 }
 0x83c   :  { %v6168_v48 = vmax.f32 %v3102_v44, %v3078_v29  ;;  %v6170_v31 = vmax.f32 %v3299_v58, %v3275_v16  ;;  %v3005_v24 = vpop.permute.xlu1 %3004  ;;  %v3010_v8 = vpop.permute.xlu2 %3009  ;;  %v3346_v16 = vld [vmem:[#allocation13 + $0x78] sm:$0xff] }
 0x83d   :  { %3351 = vmatpush.msrb.mxu3 %v3346_v16 }
 0x83f   :  { %v2736_v53 = vpop.f32.mrf.mxu2 }
 0x840   :  { %v2737_v40 = vadd.f32 %v5942_v35, %v2736_v53 }
 0x842   :  { %v4311_v36 = vpack.c.bf16 %v2737_v40, %v2735_v3  ;;  %v3079_v22 = vadd.f32 %v2990_v14, %v2737_v40  ;;  %v3276_v45 = vadd.f32 %v3201_v56, %v2737_v40  ;;  %v3345_v56 = vld [vmem:[#allocation13 + $0x70] sm:$0xff] }
 0x843   :  { %3352 = vmatpush.msrb.mxu3 %v3345_v56  ;;  %v3333_v56 = vld [vmem:[#allocation13 + $0x10] sm:$0xff] }
 0x844   :  { %4415 = vst [vmem:[#allocation20 + $0x40] sm:$0xff] %v4311_v36   ;;  %v6173_v1 = vmax.f32 %v3103_v13, %v3079_v22  ;;  %v6175_v4 = vmax.f32 %v3300_v27, %v3276_v45  ;;  %v6187_v20 = vpop.permute.xlu1 %3019  ;;  %v3213_v62 = vpop.permute.xlu2 %3212  ;;  %v3343_v36 = vld [vmem:[#allocation13 + $0x60] sm:$0xff]  ;;  %v3342_v45 = vld [vmem:[#allocation13 + $0x58] sm:$0xff] }
 0x847   :  { %v2739_v7 = vpop.f32.mrf.mxu2 }
 0x848   :  { %v2740_v0 = vadd.f32 %v5942_v35, %v2739_v7 }
 0x84a   :  { %v3080_v54 = vadd.f32 %v2995_v52, %v2740_v0  ;;  %v3277_v2 = vadd.f32 %v3205_v38, %v2740_v0  ;;  %v3344_v38 = vld [vmem:[#allocation13 + $0x68] sm:$0xff] }
 0x84b   :  { %3353 = vmatpush.msrb.mxu3 %v3344_v38 }
 0x84c   :  { %v6178_v43 = vmax.f32 %v3104_v60, %v3080_v54  ;;  %v6180_v63 = vmax.f32 %v3301_v39, %v3277_v2  ;;  %v3217_v61 = vpop.permute.xlu1 %3216  ;;  %v6207_v39 = vpop.permute.xlu2 %3220 }
 0x84d   :  { %3354 = vmatpush.msrb.mxu3 %v3343_v36  ;;  %v3225_v54 = vpop.permute.xlu0 %3224 }
 0x84f   :  { %v2741_v46 = vpop.f32.mrf.mxu2  ;;  %3355 = vmatpush.msrb.mxu3 %v3342_v45 }
 0x850   :  { %v2742_v26 = vadd.f32 %v5942_v35, %v2741_v46 }
 0x852   :  { %v4316_v44 = vpack.c.bf16 %v2742_v26, %v2740_v0  ;;  %v3081_v55 = vadd.f32 %v3000_v10, %v2742_v26  ;;  %v3278_v58 = vadd.f32 %v3209_v19, %v2742_v26  ;;  %v3341_v0 = vld [vmem:[#allocation13 + $0x50] sm:$0xff]  ;;  %v3339_v26 = vld [vmem:[#allocation13 + $0x40] sm:$0xff] }
 0x853   :  { %3356 = vmatpush.msrb.mxu3 %v3341_v0 }
 0x854   :  { %4416 = vst [vmem:[#allocation20 + $0x48] sm:$0xff] %v4316_v44   ;;  %v6183_v9 = vmax.f32 %v3105_v15, %v3081_v55  ;;  %v6185_v59 = vmax.f32 %v3302_v17, %v3278_v58  ;;  %v3025_v60 = vpop.permute.xlu1 %3024  ;;  %v3030_v18 = vpop.permute.xlu2 %3029  ;;  %v3338_v55 = vld [vmem:[#allocation13 + $0x38] sm:$0xff]  ;;  %v3337_v58 = vld [vmem:[#allocation13 + $0x30] sm:$0xff] }
 0x857   :  { %v2744_v12 = vpop.f32.mrf.mxu2 }
 0x858   :  { %v2745_v23 = vadd.f32 %v5942_v35, %v2744_v12 }
 0x85a   :  { %v6190_v49 = vadd.f32 %v3005_v24, %v2745_v23  ;;  %v6192_v33 = vadd.f32 %v3213_v62, %v2745_v23  ;;  %v3336_v62 = vld [vmem:[#allocation13 + $0x28] sm:$0xff] }
 0x85c   :  { %v3110_v21 = vmax.f32 %v6168_v48, %v6190_v49  ;;  %v3307_v41 = vmax.f32 %v6170_v31, %v6192_v33  ;;  %v6217_v28 = vpop.permute.xlu1 %3034  ;;  %v6219_v17 = vpop.permute.xlu2 %3039  ;;  %v3331_v48 = vld [vmem:[#allocation13] sm:$0xff] }
 0x85f   :  { %v2746_v47 = vpop.f32.mrf.mxu2 }
 0x860   :  { %v2747_v13 = vadd.f32 %v5942_v35, %v2746_v47 }
 0x862   :  { %v4321_v27 = vpack.c.bf16 %v2747_v13, %v2745_v23  ;;  %v6199_v37 = vadd.f32 %v3010_v8, %v2747_v13  ;;  %v6201_v50 = vadd.f32 %v3217_v61, %v2747_v13  ;;  %v3340_v8 = vld [vmem:[#allocation13 + $0x48] sm:$0xff]  ;;  %v3229_v23 = vpop.permute.xlu0 %3228 }
 0x863   :  { %3357 = vmatpush.msrb.mxu3 %v3340_v8 }
 0x864   :  { %4417 = vst [vmem:[#allocation20 + $0x50] sm:$0xff] %v4321_v27   ;;  %v3111_v6 = vmax.f32 %v6173_v1, %v6199_v37  ;;  %v3308_v51 = vmax.f32 %v6175_v4, %v6201_v50  ;;  %v3233_v3 = vpop.permute.xlu1 %3232  ;;  %v6223_v53 = vpop.permute.xlu2 %3236 }
 0x865   :  { %3358 = vmatpush.msrb.mxu3 %v3339_v26 }
 0x867   :  { %v2749_v34 = vpop.f32.mrf.mxu2  ;;  %3359 = vmatpush.msrb.mxu3 %v3338_v55 }
 0x868   :  { %v6210_v14 = vadd.f32 %v5942_v35, %v2749_v34  ;;  %v3335_v34 = vld [vmem:[#allocation13 + $0x20] sm:$0xff] }
 0x869   :  { %3360 = vmatpush.msrb.mxu3 %v3337_v58 }
 0x86a   :  { %v3241_v31 = vpop.permute.xlu0 %3240  ;;  %v3084_v4 = vadd.f32 %v5967_v42, %v6210_v14  ;;  %v3281_v50 = vadd.f32 %v6207_v39, %v6210_v14 }
 0x86b   :  { %3361 = vmatpush.msrb.mxu3 %v3336_v62 }
 0x86c   :  { %v3045_v40 = vpop.permute.xlu1 %3044  ;;  %v3050_v24 = vpop.permute.xlu2 %3049 }
 0x86d   :  { %3362 = vmatpush.msrb.mxu3 %v3335_v34 }
 0x86f   :  { %v2751_v52 = vpop.f32.mrf.mxu2 }
 0x870   :  { %v6213_v32 = vadd.f32 %v5942_v35, %v2751_v52 }
 0x872   :  { %v4326_v5 = vpack.c.bf16 %v6213_v32, %v6210_v14  ;;  %v3309_v14 = vmax.f32 %v6180_v63, %v3281_v50  ;;  %v3257_v55 = vpop.permute.xlu0 %3256 }
 0x874   :  { %4418 = vst [vmem:[#allocation20 + $0x58] sm:$0xff] %v4326_v5   ;;  %v6233_v46 = vpop.permute.xlu1 %3059  ;;  %v3245_v27 = vpop.permute.xlu2 %3244 }
 0x877   :  { %v2754_v57 = vpop.f32.mrf.mxu2 }
 0x878   :  { %v2755_v25 = vadd.f32 %v5942_v35, %v2754_v57 }
 0x87a   :  { %v3086_v47 = vadd.f32 %v3025_v60, %v2755_v25  ;;  %v3283_v13 = vadd.f32 %v3229_v23, %v2755_v25 }
 0x87c   :  { %v3114_v38 = vmax.f32 %v3110_v21, %v3086_v47  ;;  %v3253_v42 = vpop.permute.xlu2 %3252 }
 0x87f   :  { %v2756_v15 = vpop.f32.mrf.mxu2 }
 0x880   :  { %v2757_v11 = vadd.f32 %v5942_v35, %v2756_v15  ;;  %v3249_v15 = vpop.permute.xlu1 %3248 }
 0x882   :  { %v4331_v10 = vpack.c.bf16 %v2757_v11, %v2755_v25  ;;  %v3087_v61 = vadd.f32 %v3030_v18, %v2757_v11  ;;  %v3284_v52 = vadd.f32 %v3233_v3, %v2757_v11  ;;  %v3311_v18 = vmax.f32 %v3307_v41, %v3283_v13  ;;  %v3332_v25 = vld [vmem:[#allocation13 + $0x8] sm:$0xff] }
 0x883   :  { %v3085_v41 = vadd.f32 %v6187_v20, %v6213_v32  ;;  %v3112_v20 = vmax.f32 %v6178_v43, %v3084_v4 }
 0x884   :  { %4419 = vst [vmem:[#allocation20 + $0x60] sm:$0xff] %v4331_v10   ;;  %v3334_v10 = vld [vmem:[#allocation13 + $0x18] sm:$0xff]  ;;  %v3115_v60 = vmax.f32 %v3111_v6, %v3087_v61  ;;  %v3312_v11 = vmax.f32 %v3308_v51, %v3284_v52  ;;  %v3282_v51 = vadd.f32 %v3225_v54, %v6213_v32 }
 0x885   :  { %3363 = vmatpush.msrb.mxu3 %v3334_v10  ;;  %v3113_v39 = vmax.f32 %v6183_v9, %v3085_v41 }
 0x886   :  { %v3310_v54 = vmax.f32 %v6185_v59, %v3282_v51 }
 0x887   :  { %v2759_v29 = vpop.f32.mrf.mxu2  ;;  %3364 = vmatpush.msrb.mxu3 %v3333_v56 }
 0x888   :  { %v6226_v19 = vadd.f32 %v5942_v35, %v2759_v29 }
 0x889   :  { %3365 = vmatpush.msrb.mxu3 %v3332_v25 }
 0x88a   :  { %v3088_v0 = vadd.f32 %v6217_v28, %v6226_v19 }
 0x88b   :  { %3366 = vmatpush.msrb.mxu3 %v3331_v48 }
 0x88f   :  { %v2761_v22 = vpop.f32.mrf.mxu2 }
 0x890   :  { %v6229_v7 = vadd.f32 %v5942_v35, %v2761_v22 }
 0x892   :  { %v4336_v2 = vpack.c.bf16 %v6229_v7, %v6226_v19  ;;  %v3286_v8 = vadd.f32 %v3241_v31, %v6229_v7 }
 0x894   :  { %4420 = vst [vmem:[#allocation20 + $0x68] sm:$0xff] %v4336_v2   ;;  %v3285_v2 = vadd.f32 %v6223_v53, %v6226_v19  ;;  %v3116_v19 = vmax.f32 %v3112_v20, %v3088_v0  ;;  %v3314_v58 = vmax.f32 %v3310_v54, %v3286_v8 }
 0x897   :  { %v2764_v44 = vpop.f32.mrf.mxu2 }
 0x898   :  { %v2765_v12 = vadd.f32 %v5942_v35, %v2764_v44  ;;  %v3313_v44 = vmax.f32 %v3309_v14, %v3285_v2 }
 0x89a   :  { %v3090_v5 = vadd.f32 %v3045_v40, %v2765_v12  ;;  %v3287_v29 = vadd.f32 %v3245_v27, %v2765_v12 }
 0x89c   :  { %v3118_v22 = vmax.f32 %v3114_v38, %v3090_v5  ;;  %v3315_v49 = vmax.f32 %v3311_v18, %v3287_v29  ;;  %v4499_v38 = vld [vmem:[%s6326_s16] ss:$0 sm:$0xff]  ;;  %s4872_s16 = smov [#allocation18]  }
 0x89d   :  { %s3428_s13 = sshll.u32 %s4872_s16, 4  ;;  %s3429_s13 = int_to_ptr.vmem [resolvable:$true] %s3428_s13 }
 0x89e   :  { %3436 = dma.vmem_to_hbm [thread:$0]  %s3429_s13, 2048, %s3431_s8, [#allocation19], %s4859_s3, %s4859_s3, %s4860_s25  }
 0x89f   :  { %v2766_v57 = vpop.f32.mrf.mxu2  ;;  %s6369_s13 = sld [smem:[#allocation42_spill]] }
 0x8a0   :  { %v2767_v16 = vadd.f32 %v5942_v35, %v2766_v57 }
 0x8a2   :  { %v4341_v3 = vpack.c.bf16 %v2767_v16, %v2765_v12  ;;  %v3091_v40 = vadd.f32 %v3050_v24, %v2767_v16  ;;  %v3288_v36 = vadd.f32 %v3249_v15, %v2767_v16  ;;  %v3089_v24 = vadd.f32 %v6219_v17, %v6229_v7 }
 0x8a4   :  { %4421 = vst [vmem:[#allocation20 + $0x70] sm:$0xff] %v4341_v3   ;;  %v3119_v21 = vmax.f32 %v3115_v60, %v3091_v40  ;;  %v3316_v1 = vmax.f32 %v3312_v11, %v3288_v36  ;;  %v3117_v17 = vmax.f32 %v3113_v39, %v3089_v24 }
 0x8a5   :  { %s3468_s9 = sshll.u32 %s6369_s13, 4  ;;  %s3469_s9 = int_to_ptr.hbm [resolvable:$true] %s3468_s9 }
 0x8a6   :  { %v3122_v37 = vmax.f32 %v3118_v22, %v3119_v21  ;;  %v3319_v6 = vmax.f32 %v3315_v49, %v3316_v1 }
 0x8a7   :  { %v2769_v33 = vpop.f32.mrf.mxu2 }
 0x8a8   :  { %v2770_v45 = vadd.f32 %v5942_v35, %v2769_v33 }
 0x8aa   :  { %v3092_v28 = vadd.f32 %v5980_v30, %v2770_v45  ;;  %v3289_v26 = vadd.f32 %v3253_v42, %v2770_v45 }
 0x8ac   :  { %v3120_v9 = vmax.f32 %v3116_v19, %v3092_v28  ;;  %v3317_v62 = vmax.f32 %v3313_v44, %v3289_v26 }
 0x8af   :  { %v2771_v32 = vpop.f32.mrf.mxu2 }
 0x8b0   :  { %v2772_v53 = vadd.f32 %v5942_v35, %v2771_v32 }
 0x8b2   :  { %v4346_v7 = vpack.c.bf16 %v2772_v53, %v2770_v45  ;;  %v3093_v43 = vadd.f32 %v6233_v46, %v2772_v53  ;;  %v3290_v12 = vadd.f32 %v3257_v55, %v2772_v53 }
 0x8b4   :  { %4422 = vst [vmem:[#allocation20 + $0x78] sm:$0xff] %v4346_v7   ;;  %v3121_v63 = vmax.f32 %v3117_v17, %v3093_v43  ;;  %v3318_v23 = vmax.f32 %v3314_v58, %v3290_v12 }
 0x8b5   :  { %3449 = dma.vmem_to_hbm [thread:$0]  %s3442_s18, 2048, %s3444_s2, [#allocation19], %s4859_s3, %s4859_s3, %s4860_s25  }
 0x8b6   :  { %v3123_v59 = vmax.f32 %v3120_v9, %v3121_v63  ;;  %v3320_v47 = vmax.f32 %v3317_v62, %v3318_v23 }
 0x8b8   :  { %v3124_v30 = vmax.f32 %v3122_v37, %v3123_v59  ;;  %v3321_v61 = vmax.f32 %v3319_v6, %v3320_v47 }
 0x8ba   :  { %v3125_v13 = vrot.slane %v3124_v30, 4  ;;  %v3322_v35 = vrot.slane %v3321_v61, 4 }
 0x8bc   :  { %v3126_v27 = vmax.f32 %v3124_v30, %v3125_v13  ;;  %v3323_v34 = vmax.f32 %v3321_v61, %v3322_v35 }
 0x8be   :  { %v3324_v52 = vrot.slane %v3323_v34, 2  ;;  %v3127_v5 = vrot.slane %v3126_v27, 2 }
 0x8c0   :  { %v3325_v57 = vmax.f32 %v3323_v34, %v3324_v52  ;;  %v3128_v15 = vmax.f32 %v3126_v27, %v3127_v5 }
 0x8c2   :  { %v3129_v10 = vrot.slane %v3128_v15, 1  ;;  %v3326_v46 = vrot.slane %v3325_v57, 1 }
 0x8c4   :  { %v3130_v29 = vmax.f32 %v3128_v15, %v3129_v10  ;;  %v3327_v16 = vmax.f32 %v3325_v57, %v3326_v46 }
 0x8c6   :  { %v3329_v56 = vsel %vm3328_vm0, %v3130_v29, %v3327_v16 }
 0x8c7   :  { %3367 = vmatmul.f32.vlgmr.msrb.gmra.mxu3 %v3329_v56  ;;  %3330 = vst [vmem:[#allocation21] sm:$0x3] %v3329_v56 }
 0x8c8   :  { %3460 = dma.vmem_to_hbm [thread:$0]  %s3456_s4, 32, %s3458_s1, [#allocation22]  }
 0x94a   :  { %v3368_v60 = vpop.f32.mrf.mxu3 }
 0x94b   :  { %v3369_v18 = vadd.f32 %v4499_v38, %v3368_v60 }
 0x94d   :  { %v3372_v25 = vsel %vm3371_vm1, %v3369_v18, -inf }
 0x94e   :  { %3373 = vmax.xlane.f32.xlu1 %v3372_v25 }
 0x9c1   :  { %v3374_v11 = vpop.xlane.xlu1 %3373 }
 0x9c2   :  { %v3375_v3 = vsub.f32 %v3369_v18, %v3374_v11 }
 0x9c4   :  { %v3376_v40 = vmul.f32 1.442695, %v3375_v3 }
 0x9c6   :  { %4500 = vpow2.f32 %v3376_v40 }
 0x9cc   :  { %v4501_v36 = vpop.eup %4500 }
 0x9cd   :  { %v3378_v22 = vsel %vm3371_vm1, %v4501_v36, 0.0 }
 0x9ce   :  { %3379 = vadd.xlane.f32.xlu2 %v3378_v22 }
 0xa41   :  { %v3380_v48 = vpop.xlane.xlu2 %3379 }
 0xa42   :  { %4502 = vlog2.f32 %v3380_v48 }
 0xa48   :  { %v4503_v49 = vpop.eup %4502 }
 0xa49   :  { %v3382_v21 = vmul.f32 0.6931472, %v4503_v49 }
 0xa4b   :  { %v3383_v1 = vsub.f32 %v3375_v3, %v3382_v21 }
 0xa4d   :  { %3384 = vst [vmem:[#allocation23] sm:$0x3] %v3383_v1 }
 0xa4e   :  { %3471 = dma.vmem_to_hbm [thread:$0]  %s3467_s11, 32, %s3469_s9, [#allocation22]  }
 0xa4f   :  { %4850 = dma.done.wait [#allocation4], 2048  }
 0xa50   :  { %4851 = vsyncadd [#allocation4], 4294965248 }
 0xa51   :  { %4852 = dma.done.wait [#allocation16], 4096  }
 0xa52   :  { %4853 = vsyncadd [#allocation16], 4294963200 }
 0xa53   :  { %4854 = dma.done.wait [#allocation19], 4096  }
 0xa54   :  { %4855 = vsyncadd [#allocation19], 4294963200 }
 0xa55   :  { %4856 = dma.done.wait [#allocation22], 64  }
 0xa56   :  { %4857 = vsyncadd [#allocation22], 4294967232 }
 0xa57   :  { %3500 = vsyncpa [#allocation3], 1 }
 0xa58   :  { %3501 = vsyncpa [#allocation6], 1 }
 0xa59   :  { %3502 = vsyncpa [#allocation9], 1 }
 0xa5a   :  { %3503 = vsyncpa [#allocation12], 1 }
 0xa5b   :  { %3504 = vsyncpa [#allocation4], 1 }
 0xa5c   :  { %3505 = vsyncpa [#allocation16], 1 }
 0xa5d   :  { %3506 = vsyncpa [#allocation19], 1 }
 0xa5e   :  { %3507 = vsyncpa [#allocation22], 1 }

</bundles_post_ra>
